<compile_context>
chip_gen: v7x
topology: tpu7x:2x2x1
jax: 0.10.0
libtpu: 0.0.40
codegen_flags: <defaults>
</compile_context>

<pallas_src>
import math

import jax
import jax.numpy as jnp
from jax.experimental import pallas as pl
from jax.experimental.pallas import tpu as pltpu

# ----------------------------- hyper-parameters ------------------------------
B = 2              # batch
SRC_LEN = 8        # source sequence length
TRG_LEN = 8        # target sequence length
HID = 32           # hidden dim
N_HEADS = 4
HEAD_DIM = HID // N_HEADS
PF = 64            # position-wise FF inner dim
N_LAYERS = 2
SRC_VOCAB = 20
TRG_VOCAB = 24
MAX_LEN = 16
SRC_PAD_IDX = 0
TRG_PAD_IDX = 0

VOCAB_PAD = 128                      # fc_out padded to a lane-dense 128-wide store
ATTN_COLS = N_HEADS * SRC_LEN        # 32 valid attention columns per target row
ATTN_PAD = 128                       # attention slab padded to 128 lanes
NEG_BIG = -1e10                      # masked_fill value
ATTN_SCALE = math.sqrt(HEAD_DIM)

# packed parameter slab geometry
ENC_WIN_COLS = 3 * HID + HID + PF                    # wqkv | wo | ff_w1          -> 192
DEC_WIN_COLS = 3 * HID + HID + HID + HID + PF        # s_wqkv|s_wo|c_wq|c_wo|ff_w1 -> 256
B_SLAB_W = 3 * HID                                   # widest bias row (96)
ENC_B_ROWS = 8
DEC_B_ROWS = 16

VMEM_SPEC = pl.BlockSpec(memory_space=pltpu.MemorySpace.VMEM)


# --------------------------- in-kernel building blocks ------------------------
def _layer_norm(x, g, b):
    mean = jnp.mean(x, axis=-1, keepdims=True)
    var = jnp.mean((x - mean) * (x - mean), axis=-1, keepdims=True)
    return (x - mean) * jax.lax.rsqrt(var + 1e-5) * g + b


def _mha(q3, k3, v3, keep_mask, wo, bo, n_q_rows, want_attn=False):
    """Multi-head attention on VMEM-resident values.

    q3: [B, Lq, HID]; k3/v3: [B, Lk, HID]; keep_mask: [B, Lq, Lk] (1 keep / 0 drop).
    wo: [HID, HID]; bo: [1, HID].
    Heads are folded into the leading batch dim (z = h*B + b) so the score and
    context matmuls are each ONE batched dot_general; the output projection is a
    single [n_q_rows, HID] @ [HID, HID] matmul on the re-concatenated heads.
    Returns (out [n_q_rows, HID], attn_slab [n_q_rows, N_HEADS*Lk] or None).
    """
    Lk = k3.shape[1]
    qz = jnp.concatenate(
        [q3[:, :, h * HEAD_DIM:(h + 1) * HEAD_DIM] for h in range(N_HEADS)], axis=0)
    kz = jnp.concatenate(
        [k3[:, :, h * HEAD_DIM:(h + 1) * HEAD_DIM] for h in range(N_HEADS)], axis=0)
    vz = jnp.concatenate(
        [v3[:, :, h * HEAD_DIM:(h + 1) * HEAD_DIM] for h in range(N_HEADS)], axis=0)
    mask_z = jnp.concatenate([keep_mask] * N_HEADS, axis=0)          # [H*B, Lq, Lk]

    energy = jnp.einsum("zqd,zkd->zqk", qz, kz,
                        preferred_element_type=jnp.float32) * (1.0 / ATTN_SCALE)
    energy = jnp.where(mask_z != 0.0, energy, NEG_BIG)               # masked_fill semantics
    m = jnp.max(energy, axis=-1, keepdims=True)
    p = jnp.exp(energy - m)
    attn = p / jnp.sum(p, axis=-1, keepdims=True)                    # exact softmax
    ctx = jnp.einsum("zqk,zkd->zqd", attn, vz,
                     preferred_element_type=jnp.float32)             # [H*B, Lq, d]

    # concat heads back onto lanes -> one K=HID output-projection matmul
    ctx_cat = jnp.concatenate(
        [ctx[h * B:(h + 1) * B] for h in range(N_HEADS)], axis=-1)   # [B, Lq, HID]
    out = jnp.dot(ctx_cat.reshape(n_q_rows, HID), wo,
                  preferred_element_type=jnp.float32) + bo

    attn_slab = None
    if want_attn:
        attn_slab = jnp.concatenate(
            [attn[h * B:(h + 1) * B].reshape(n_q_rows, Lk) for h in range(N_HEADS)],
            axis=-1)                                                 # [n_q_rows, H*Lk]
    return out, attn_slab


# ------------------------------ fused kernel ----------------------------------
def _seq2seq_kernel(srcx_ref, trgx_ref, smask_ref, tmask_ref,
                    enc_win_ref, enc_w2_ref, enc_b_ref,
                    dec_win_ref, ckv_w_ref, ckv_b_ref, dec_w2_ref, dec_b_ref,
                    fc_w_ref, fc_b_ref,
                    logits_ref, attn_ref):
    # keep-masks; broadcast over the query dim here (not materialized in HBM)
    src_keep = smask_ref[...]                                         # [B, 1, Ls]
    enc_mask = jnp.broadcast_to(src_keep, (B, SRC_LEN, SRC_LEN))
    cross_mask = jnp.broadcast_to(src_keep, (B, TRG_LEN, SRC_LEN))
    trg_mask = tmask_ref[...]                                         # [B, Lt, Lt]

    # ------------------------------ encoder ------------------------------
    x = srcx_ref[...]                                                 # [B*Ls, HID]
    for l in range(N_LAYERS):                                         # unrolled, all VMEM-resident
        w = enc_win_ref[l]                                            # [HID, 192]
        bs = enc_b_ref[l]                                             # [8, 96]
        wqkv = w[:, 0:3 * HID]
        wo = w[:, 3 * HID:4 * HID]
        w1 = w[:, 4 * HID:4 * HID + PF]
        bqkv = bs[0:1, 0:3 * HID]
        bo = bs[1:2, 0:HID]
        b1 = bs[2:3, 0:PF]
        b2 = bs[3:4, 0:HID]
        ln1g, ln1b = bs[4:5, 0:HID], bs[5:6, 0:HID]
        ln2g, ln2b = bs[6:7, 0:HID], bs[7:8, 0:HID]

        qkv = jnp.dot(x, wqkv, preferred_element_type=jnp.float32) + bqkv
        q3 = qkv[:, 0:HID].reshape(B, SRC_LEN, HID)
        k3 = qkv[:, HID:2 * HID].reshape(B, SRC_LEN, HID)
        v3 = qkv[:, 2 * HID:3 * HID].reshape(B, SRC_LEN, HID)
        a, _ = _mha(q3, k3, v3, enc_mask, wo, bo, B * SRC_LEN)
        x = _layer_norm(x + a, ln1g, ln1b)
        h1 = jnp.maximum(jnp.dot(x, w1, preferred_element_type=jnp.float32) + b1, 0.0)
        f = jnp.dot(h1, enc_w2_ref[l], preferred_element_type=jnp.float32) + b2
        x = _layer_norm(x + f, ln2g, ln2b)
    enc = x                              # encoder output stays in VMEM, no HBM round trip

    # cross-attention K/V for ALL decoder layers: one lane-dense [16,32]@[32,128] matmul
    kv_all = jnp.dot(enc, ckv_w_ref[...],
                     preferred_element_type=jnp.float32) + ckv_b_ref[...]

    # ------------------------------ decoder ------------------------------
    y = trgx_ref[...]                                                 # [B*Lt, HID]
    attn_slab = None
    for l in range(N_LAYERS):
        w = dec_win_ref[l]                                            # [HID, 256]
        bs = dec_b_ref[l]                                             # [16, 96]
        s_wqkv = w[:, 0:3 * HID]
        s_wo = w[:, 3 * HID:4 * HID]
        c_wq = w[:, 4 * HID:5 * HID]
        c_wo = w[:, 5 * HID:6 * HID]
        w1 = w[:, 6 * HID:6 * HID + PF]
        s_bqkv = bs[0:1, 0:3 * HID]
        s_bo = bs[1:2, 0:HID]
        c_bq = bs[2:3, 0:HID]
        c_bo = bs[3:4, 0:HID]
        b1 = bs[4:5, 0:PF]
        b2 = bs[5:6, 0:HID]
        ln1g, ln1b = bs[6:7, 0:HID], bs[7:8, 0:HID]
        ln2g, ln2b = bs[8:9, 0:HID], bs[9:10, 0:HID]
        ln3g, ln3b = bs[10:11, 0:HID], bs[11:12, 0:HID]

        # ---- masked self-attention ----
        qkv = jnp.dot(y, s_wqkv, preferred_element_type=jnp.float32) + s_bqkv
        q3 = qkv[:, 0:HID].reshape(B, TRG_LEN, HID)
        k3 = qkv[:, HID:2 * HID].reshape(B, TRG_LEN, HID)
        v3 = qkv[:, 2 * HID:3 * HID].reshape(B, TRG_LEN, HID)
        a, _ = _mha(q3, k3, v3, trg_mask, s_wo, s_bo, B * TRG_LEN)
        y = _layer_norm(y + a, ln1g, ln1b)

        # ---- encoder-decoder cross-attention (K/V hoisted above the layer loop) ----
        q = jnp.dot(y, c_wq, preferred_element_type=jnp.float32) + c_bq
        q3 = q.reshape(B, TRG_LEN, HID)
        k3 = kv_all[:, (2 * l) * HID:(2 * l + 1) * HID].reshape(B, SRC_LEN, HID)
        v3 = kv_all[:, (2 * l + 1) * HID:(2 * l + 2) * HID].reshape(B, SRC_LEN, HID)
        is_last = l == N_LAYERS - 1
        a, maybe_attn = _mha(q3, k3, v3, cross_mask, c_wo, c_bo, B * TRG_LEN,
                             want_attn=is_last)
        if is_last:
            attn_slab = maybe_attn                                    # [B*Lt, H*Ls]
        y = _layer_norm(y + a, ln2g, ln2b)

        # ---- position-wise feed-forward ----
        h1 = jnp.maximum(jnp.dot(y, w1, preferred_element_type=jnp.float32) + b1, 0.0)
        f = jnp.dot(h1, dec_w2_ref[l], preferred_element_type=jnp.float32) + b2
        y = _layer_norm(y + f, ln3g, ln3b)

    # lane-dense 128-wide single stores for both outputs
    logits_ref[...] = (jnp.dot(y, fc_w_ref[...], preferred_element_type=jnp.float32)
                       + fc_b_ref[...]).astype(logits_ref.dtype)
    pad = jnp.zeros((B * TRG_LEN, ATTN_PAD - ATTN_COLS), jnp.float32)
    attn_ref[...] = jnp.concatenate([attn_slab, pad], axis=-1).astype(attn_ref.dtype)


# ------------------------------ wrapper ----------------------------------------
@jax.jit
def seq2seq_forward(src, trg, params):
    enc_p = params["encoder"]
    dec_p = params["decoder"]

    # embeddings + positions (gather glue in plain JAX; dropout = identity)
    src_x = (enc_p["tok_emb"][src] * math.sqrt(HID)
             + enc_p["pos_emb"][:SRC_LEN][None, :, :])
    trg_x = (dec_p["tok_emb"][trg] * math.sqrt(HID)
             + dec_p["pos_emb"][:TRG_LEN][None, :, :])

    # compact keep-masks (1 keep / 0 drop); query-dim broadcast happens in-kernel
    src_keep = (src != SRC_PAD_IDX).astype(jnp.float32)[:, None, :]           # [B,1,Ls]
    causal = jnp.tril(jnp.ones((TRG_LEN, TRG_LEN), jnp.float32))
    trg_keep = (trg != TRG_PAD_IDX).astype(jnp.float32)[:, None, :] * causal[None]  # [B,Lt,Lt]

    logits, attn2d = pl.pallas_call(
        _seq2seq_kernel,
        out_shape=(
            jax.ShapeDtypeStruct((B * TRG_LEN, VOCAB_PAD), jnp.float32),
            jax.ShapeDtypeStruct((B * TRG_LEN, ATTN_PAD), jnp.float32),
        ),
        in_specs=[VMEM_SPEC] * 14,
        out_specs=(VMEM_SPEC, VMEM_SPEC),
        compiler_params=pltpu.CompilerParams(vmem_limit_bytes=32 * 1024 * 1024),
    )(src_x.reshape(B * SRC_LEN, HID), trg_x.reshape(B * TRG_LEN, HID),
      src_keep, trg_keep,
      enc_p["win"], enc_p["w2"], enc_p["bln"],
      dec_p["win"], dec_p["ckv_w"], dec_p["ckv_b"], dec_p["w2"], dec_p["bln"],
      dec_p["fc_w"], dec_p["fc_b"])

    output = logits[:, :TRG_VOCAB].reshape(B, TRG_LEN, TRG_VOCAB)
    attention = (attn2d[:, :ATTN_COLS]
                 .reshape(B, TRG_LEN, N_HEADS, SRC_LEN)
                 .transpose(0, 2, 1, 3))                 # [B, n_heads, Lt, Ls]
    return output, attention


# ------------------------------ parameter init --------------------------------
def _init_linear(key, fan_in, fan_out):
    k1, k2 = jax.random.split(key)
    w = jax.random.normal(k1, (fan_in, fan_out), jnp.float32) / math.sqrt(fan_in)
    b = 0.01 * jax.random.normal(k2, (1, fan_out), jnp.float32)
    return w, b


def _pack_bias_rows(rows, n_rows, width=B_SLAB_W):
    slab = jnp.zeros((n_rows, width), jnp.float32)
    for i, r in enumerate(rows):
        slab = slab.at[i, : r.shape[-1]].set(r.reshape(-1))
    return slab


def init_encoder_params(key):
    k_tok, k_pos, k_layers = jax.random.split(key, 3)
    layer_keys = jax.random.split(k_layers, N_LAYERS)
    ones = jnp.ones((1, HID), jnp.float32)
    zeros = jnp.zeros((1, HID), jnp.float32)
    win, w2s, blns = [], [], []
    for lk in layer_keys:
        kq, ko, kf1, kf2 = jax.random.split(lk, 4)
        wqkv, bqkv = _init_linear(kq, HID, 3 * HID)
        wo, bo = _init_linear(ko, HID, HID)
        w1, b1 = _init_linear(kf1, HID, PF)
        w2, b2 = _init_linear(kf2, PF, HID)
        win.append(jnp.concatenate([wqkv, wo, w1], axis=1))           # [HID, 192]
        w2s.append(w2)
        blns.append(_pack_bias_rows([bqkv, bo, b1, b2, ones, zeros, ones, zeros],
                                    ENC_B_ROWS))
    return dict(
        tok_emb=0.1 * jax.random.normal(k_tok, (SRC_VOCAB, HID), jnp.float32),
        pos_emb=0.1 * jax.random.normal(k_pos, (MAX_LEN, HID), jnp.float32),
        win=jnp.stack(win), w2=jnp.stack(w2s), bln=jnp.stack(blns))


def init_decoder_params(key):
    k_tok, k_pos, k_fc, k_layers = jax.random.split(key, 4)
    layer_keys = jax.random.split(k_layers, N_LAYERS)
    ones = jnp.ones((1, HID), jnp.float32)
    zeros = jnp.zeros((1, HID), jnp.float32)
    win, ckv_w, ckv_b, w2s, blns = [], [], [], [], []
    for lk in layer_keys:
        ks = jax.random.split(lk, 7)
        s_wqkv, s_bqkv = _init_linear(ks[0], HID, 3 * HID)
        s_wo, s_bo = _init_linear(ks[1], HID, HID)
        c_wq, c_bq = _init_linear(ks[2], HID, HID)
        c_wkv, c_bkv = _init_linear(ks[3], HID, 2 * HID)
        c_wo, c_bo = _init_linear(ks[4], HID, HID)
        w1, b1 = _init_linear(ks[5], HID, PF)
        w2, b2 = _init_linear(ks[6], PF, HID)
        win.append(jnp.concatenate([s_wqkv, s_wo, c_wq, c_wo, w1], axis=1))   # [HID, 256]
        ckv_w.append(c_wkv)
        ckv_b.append(c_bkv)
        w2s.append(w2)
        blns.append(_pack_bias_rows(
            [s_bqkv, s_bo, c_bq, c_bo, b1, b2,
             ones, zeros, ones, zeros, ones, zeros], DEC_B_ROWS))
    fc_w, fc_b = _init_linear(k_fc, HID, TRG_VOCAB)
    fc_w_pad = jnp.zeros((HID, VOCAB_PAD), jnp.float32).at[:, :TRG_VOCAB].set(fc_w)
    fc_b_pad = jnp.zeros((1, VOCAB_PAD), jnp.float32).at[:, :TRG_VOCAB].set(fc_b)
    return dict(
        tok_emb=0.1 * jax.random.normal(k_tok, (TRG_VOCAB, HID), jnp.float32),
        pos_emb=0.1 * jax.random.normal(k_pos, (MAX_LEN, HID), jnp.float32),
        win=jnp.stack(win),
        ckv_w=jnp.concatenate(ckv_w, axis=1),        # [HID, N_LAYERS*2*HID] = [32, 128]
        ckv_b=jnp.concatenate(ckv_b, axis=1),        # [1, 128]
        w2=jnp.stack(w2s), bln=jnp.stack(blns),
        fc_w=fc_w_pad, fc_b=fc_b_pad)


def init_params(key):
    k_enc, k_dec = jax.random.split(key)
    return dict(encoder=init_encoder_params(k_enc),
                decoder=init_decoder_params(k_dec))


# ----------------------------------- main --------------------------------------
if __name__ == "__main__":
    root = jax.random.PRNGKey(0)
    k_params, k_src, k_trg = jax.random.split(root, 3)

    params = init_params(k_params)

    # tokens in [1, vocab); last positions set to pad idx (0) to exercise the masks
    src = jax.random.randint(k_src, (B, SRC_LEN), 1, SRC_VOCAB, dtype=jnp.int32)
    trg = jax.random.randint(k_trg, (B, TRG_LEN), 1, TRG_VOCAB, dtype=jnp.int32)
    src = src.at[:, -2:].set(SRC_PAD_IDX)
    trg = trg.at[:, -1:].set(TRG_PAD_IDX)

    output, attention = seq2seq_forward(src, trg, params)
    jax.block_until_ready((output, attention))

    assert output.shape == (B, TRG_LEN, TRG_VOCAB)
    assert attention.shape == (B, N_HEADS, TRG_LEN, SRC_LEN)
    assert bool(jnp.all(jnp.isfinite(output))) and bool(jnp.all(jnp.isfinite(attention)))
    # softmax rows must sum to ~1 (pad columns masked out)
    row_sums = attention.sum(-1)
    assert bool(jnp.all(jnp.abs(row_sums - 1.0) < 1e-3))

    print("KERNEL_OK")
</pallas_src>

<mosaic_0001>
module attributes {stable_mosaic.version = 11 : i64} {
  func.func @_seq2seq_kernel(%arg0: memref<16x32xf32, #tpu.memory_space<vmem>>, %arg1: memref<16x32xf32, #tpu.memory_space<vmem>>, %arg2: memref<2x1x8xf32, #tpu.memory_space<vmem>>, %arg3: memref<2x8x8xf32, #tpu.memory_space<vmem>>, %arg4: memref<2x32x192xf32, #tpu.memory_space<vmem>>, %arg5: memref<2x64x32xf32, #tpu.memory_space<vmem>>, %arg6: memref<2x8x96xf32, #tpu.memory_space<vmem>>, %arg7: memref<2x32x256xf32, #tpu.memory_space<vmem>>, %arg8: memref<32x128xf32, #tpu.memory_space<vmem>>, %arg9: memref<1x128xf32, #tpu.memory_space<vmem>>, %arg10: memref<2x64x32xf32, #tpu.memory_space<vmem>>, %arg11: memref<2x16x96xf32, #tpu.memory_space<vmem>>, %arg12: memref<32x128xf32, #tpu.memory_space<vmem>>, %arg13: memref<1x128xf32, #tpu.memory_space<vmem>>, %arg14: memref<16x128xf32, #tpu.memory_space<vmem>>, %arg15: memref<16x128xf32, #tpu.memory_space<vmem>>) attributes {dimension_semantics = [], scalar_prefetch = 0 : i64, scratch_operands = 0 : i64, tpu.core_type = #tpu.core_type<tc>} {
    %c0 = arith.constant 0 : index
    %c0_0 = arith.constant 0 : index
    %c0_1 = arith.constant 0 : index
    %0 = vector.load %arg2[%c0, %c0_0, %c0_1] : memref<2x1x8xf32, #tpu.memory_space<vmem>>, vector<2x1x8xf32>
    %1 = vector.shape_cast %0 : vector<2x1x8xf32> to vector<2x1x8xf32>
    %2 = vector.broadcast %1 : vector<2x1x8xf32> to vector<2x8x8xf32>
    %3 = vector.shape_cast %0 : vector<2x1x8xf32> to vector<2x1x8xf32>
    %4 = vector.broadcast %3 : vector<2x1x8xf32> to vector<2x8x8xf32>
    %c0_2 = arith.constant 0 : index
    %c0_3 = arith.constant 0 : index
    %c0_4 = arith.constant 0 : index
    %5 = vector.load %arg3[%c0_2, %c0_3, %c0_4] : memref<2x8x8xf32, #tpu.memory_space<vmem>>, vector<2x8x8xf32>
    %c0_5 = arith.constant 0 : index
    %c0_6 = arith.constant 0 : index
    %6 = vector.load %arg0[%c0_5, %c0_6] : memref<16x32xf32, #tpu.memory_space<vmem>>, vector<16x32xf32>
    %c0_7 = arith.constant 0 : index
    %c0_8 = arith.constant 0 : index
    %c0_9 = arith.constant 0 : index
    %7 = vector.load %arg4[%c0_7, %c0_8, %c0_9] : memref<2x32x192xf32, #tpu.memory_space<vmem>>, vector<1x32x192xf32>
    %8 = vector.shape_cast %7 : vector<1x32x192xf32> to vector<32x192xf32>
    %c0_10 = arith.constant 0 : index
    %c0_11 = arith.constant 0 : index
    %c0_12 = arith.constant 0 : index
    %9 = vector.load %arg6[%c0_10, %c0_11, %c0_12] : memref<2x8x96xf32, #tpu.memory_space<vmem>>, vector<1x8x96xf32>
    %10 = vector.shape_cast %9 : vector<1x8x96xf32> to vector<8x96xf32>
    %11 = vector.extract_strided_slice %8 {offsets = [0, 0], sizes = [32, 96], strides = [1, 1]} : vector<32x192xf32> to vector<32x96xf32>
    %12 = vector.extract_strided_slice %8 {offsets = [0, 96], sizes = [32, 32], strides = [1, 1]} : vector<32x192xf32> to vector<32x32xf32>
    %13 = vector.extract_strided_slice %8 {offsets = [0, 128], sizes = [32, 64], strides = [1, 1]} : vector<32x192xf32> to vector<32x64xf32>
    %14 = vector.extract_strided_slice %10 {offsets = [0, 0], sizes = [1, 96], strides = [1, 1]} : vector<8x96xf32> to vector<1x96xf32>
    %15 = vector.extract_strided_slice %10 {offsets = [1, 0], sizes = [1, 32], strides = [1, 1]} : vector<8x96xf32> to vector<1x32xf32>
    %16 = vector.extract_strided_slice %10 {offsets = [2, 0], sizes = [1, 64], strides = [1, 1]} : vector<8x96xf32> to vector<1x64xf32>
    %17 = vector.extract_strided_slice %10 {offsets = [3, 0], sizes = [1, 32], strides = [1, 1]} : vector<8x96xf32> to vector<1x32xf32>
    %18 = vector.extract_strided_slice %10 {offsets = [4, 0], sizes = [1, 32], strides = [1, 1]} : vector<8x96xf32> to vector<1x32xf32>
    %19 = vector.extract_strided_slice %10 {offsets = [5, 0], sizes = [1, 32], strides = [1, 1]} : vector<8x96xf32> to vector<1x32xf32>
    %20 = vector.extract_strided_slice %10 {offsets = [6, 0], sizes = [1, 32], strides = [1, 1]} : vector<8x96xf32> to vector<1x32xf32>
    %21 = vector.extract_strided_slice %10 {offsets = [7, 0], sizes = [1, 32], strides = [1, 1]} : vector<8x96xf32> to vector<1x32xf32>
    %cst = arith.constant dense<0.000000e+00> : vector<16x96xf32>
    %22 = tpu.matmul %6, %11, %cst {dimension_numbers = #tpu.dot_dimension_numbers<[1], [0], [0], [1], [0, 0, 1, 1], [], []>} : vector<16x32xf32>, vector<32x96xf32>, vector<16x96xf32> -> vector<16x96xf32>
    %23 = vector.broadcast %14 : vector<1x96xf32> to vector<16x96xf32>
    %24 = arith.addf %22, %23 : vector<16x96xf32>
    %25 = vector.extract_strided_slice %24 {offsets = [0, 0], sizes = [16, 32], strides = [1, 1]} : vector<16x96xf32> to vector<16x32xf32>
    %26 = vector.shape_cast %25 : vector<16x32xf32> to vector<2x8x32xf32>
    %27 = vector.extract_strided_slice %24 {offsets = [0, 32], sizes = [16, 32], strides = [1, 1]} : vector<16x96xf32> to vector<16x32xf32>
    %28 = vector.shape_cast %27 : vector<16x32xf32> to vector<2x8x32xf32>
    %29 = vector.extract_strided_slice %24 {offsets = [0, 64], sizes = [16, 32], strides = [1, 1]} : vector<16x96xf32> to vector<16x32xf32>
    %30 = vector.shape_cast %29 : vector<16x32xf32> to vector<2x8x32xf32>
    %31 = vector.extract_strided_slice %26 {offsets = [0, 0, 0], sizes = [2, 8, 8], strides = [1, 1, 1]} : vector<2x8x32xf32> to vector<2x8x8xf32>
    %32 = vector.extract_strided_slice %26 {offsets = [0, 0, 8], sizes = [2, 8, 8], strides = [1, 1, 1]} : vector<2x8x32xf32> to vector<2x8x8xf32>
    %33 = vector.extract_strided_slice %26 {offsets = [0, 0, 16], sizes = [2, 8, 8], strides = [1, 1, 1]} : vector<2x8x32xf32> to vector<2x8x8xf32>
    %34 = vector.extract_strided_slice %26 {offsets = [0, 0, 24], sizes = [2, 8, 8], strides = [1, 1, 1]} : vector<2x8x32xf32> to vector<2x8x8xf32>
    %35 = tpu.concatenate %31, %32, %33, %34 in 0 : vector<2x8x8xf32>, vector<2x8x8xf32>, vector<2x8x8xf32>, vector<2x8x8xf32> -> vector<8x8x8xf32>
    %36 = vector.extract_strided_slice %28 {offsets = [0, 0, 0], sizes = [2, 8, 8], strides = [1, 1, 1]} : vector<2x8x32xf32> to vector<2x8x8xf32>
    %37 = vector.extract_strided_slice %28 {offsets = [0, 0, 8], sizes = [2, 8, 8], strides = [1, 1, 1]} : vector<2x8x32xf32> to vector<2x8x8xf32>
    %38 = vector.extract_strided_slice %28 {offsets = [0, 0, 16], sizes = [2, 8, 8], strides = [1, 1, 1]} : vector<2x8x32xf32> to vector<2x8x8xf32>
    %39 = vector.extract_strided_slice %28 {offsets = [0, 0, 24], sizes = [2, 8, 8], strides = [1, 1, 1]} : vector<2x8x32xf32> to vector<2x8x8xf32>
    %40 = tpu.concatenate %36, %37, %38, %39 in 0 : vector<2x8x8xf32>, vector<2x8x8xf32>, vector<2x8x8xf32>, vector<2x8x8xf32> -> vector<8x8x8xf32>
    %41 = vector.extract_strided_slice %30 {offsets = [0, 0, 0], sizes = [2, 8, 8], strides = [1, 1, 1]} : vector<2x8x32xf32> to vector<2x8x8xf32>
    %42 = vector.extract_strided_slice %30 {offsets = [0, 0, 8], sizes = [2, 8, 8], strides = [1, 1, 1]} : vector<2x8x32xf32> to vector<2x8x8xf32>
    %43 = vector.extract_strided_slice %30 {offsets = [0, 0, 16], sizes = [2, 8, 8], strides = [1, 1, 1]} : vector<2x8x32xf32> to vector<2x8x8xf32>
    %44 = vector.extract_strided_slice %30 {offsets = [0, 0, 24], sizes = [2, 8, 8], strides = [1, 1, 1]} : vector<2x8x32xf32> to vector<2x8x8xf32>
    %45 = tpu.concatenate %41, %42, %43, %44 in 0 : vector<2x8x8xf32>, vector<2x8x8xf32>, vector<2x8x8xf32>, vector<2x8x8xf32> -> vector<8x8x8xf32>
    %46 = tpu.concatenate %2, %2, %2, %2 in 0 : vector<2x8x8xf32>, vector<2x8x8xf32>, vector<2x8x8xf32>, vector<2x8x8xf32> -> vector<8x8x8xf32>
    "tpu.trace_start"() <{level = 10 : i32, message = "zqd,zkd->zqk"}> : () -> ()
    %cst_13 = arith.constant dense<0.000000e+00> : vector<8x8x8xf32>
    %47 = tpu.matmul %35, %40, %cst_13 {dimension_numbers = #tpu.dot_dimension_numbers<[2], [2], [1], [1], [0, 0, 0, 1, 1, 1], [0], [0]>} : vector<8x8x8xf32>, vector<8x8x8xf32>, vector<8x8x8xf32> -> vector<8x8x8xf32>
    "tpu.trace_stop"() : () -> ()
    %cst_14 = arith.constant 0.353553385 : f32
    %48 = vector.broadcast %cst_14 : f32 to vector<8x8x8xf32>
    %49 = arith.mulf %47, %48 : vector<8x8x8xf32>
    %cst_15 = arith.constant 0.000000e+00 : f32
    %50 = vector.broadcast %cst_15 : f32 to vector<8x8x8xf32>
    %51 = arith.cmpf one, %46, %50 : vector<8x8x8xf32>
    %cst_16 = arith.constant -1.000000e+10 : f32
    %52 = vector.broadcast %cst_16 : f32 to vector<8x8x8xf32>
    %53 = arith.select %51, %49, %52 : vector<8x8x8xi1>, vector<8x8x8xf32>
    %cst_17 = arith.constant dense<0xFF800000> : vector<8x8xf32>
    %54 = vector.multi_reduction <maximumf>, %53, %cst_17 [2] : vector<8x8x8xf32> to vector<8x8xf32>
    %55 = vector.shape_cast %54 : vector<8x8xf32> to vector<8x8x1xf32>
    %56 = vector.broadcast %55 : vector<8x8x1xf32> to vector<8x8x8xf32>
    %57 = arith.subf %53, %56 : vector<8x8x8xf32>
    %58 = math.exp %57 : vector<8x8x8xf32>
    %cst_18 = arith.constant dense<0.000000e+00> : vector<8x8xf32>
    %59 = vector.multi_reduction <add>, %58, %cst_18 [2] : vector<8x8x8xf32> to vector<8x8xf32>
    %60 = vector.shape_cast %59 : vector<8x8xf32> to vector<8x8x1xf32>
    %61 = vector.broadcast %60 : vector<8x8x1xf32> to vector<8x8x8xf32>
    %62 = arith.divf %58, %61 : vector<8x8x8xf32>
    "tpu.trace_start"() <{level = 10 : i32, message = "zqk,zkd->zqd"}> : () -> ()
    %cst_19 = arith.constant dense<0.000000e+00> : vector<8x8x8xf32>
    %63 = tpu.matmul %62, %45, %cst_19 {dimension_numbers = #tpu.dot_dimension_numbers<[2], [1], [1], [2], [0, 0, 0, 1, 1, 2], [0], [0]>} : vector<8x8x8xf32>, vector<8x8x8xf32>, vector<8x8x8xf32> -> vector<8x8x8xf32>
    "tpu.trace_stop"() : () -> ()
    %64 = vector.extract_strided_slice %63 {offsets = [0, 0, 0], sizes = [2, 8, 8], strides = [1, 1, 1]} : vector<8x8x8xf32> to vector<2x8x8xf32>
    %65 = vector.extract_strided_slice %63 {offsets = [2, 0, 0], sizes = [2, 8, 8], strides = [1, 1, 1]} : vector<8x8x8xf32> to vector<2x8x8xf32>
    %66 = vector.extract_strided_slice %63 {offsets = [4, 0, 0], sizes = [2, 8, 8], strides = [1, 1, 1]} : vector<8x8x8xf32> to vector<2x8x8xf32>
    %67 = vector.extract_strided_slice %63 {offsets = [6, 0, 0], sizes = [2, 8, 8], strides = [1, 1, 1]} : vector<8x8x8xf32> to vector<2x8x8xf32>
    %68 = tpu.concatenate %64, %65, %66, %67 in 2 : vector<2x8x8xf32>, vector<2x8x8xf32>, vector<2x8x8xf32>, vector<2x8x8xf32> -> vector<2x8x32xf32>
    %69 = vector.shape_cast %68 : vector<2x8x32xf32> to vector<16x32xf32>
    %cst_20 = arith.constant dense<0.000000e+00> : vector<16x32xf32>
    %70 = tpu.matmul %69, %12, %cst_20 {dimension_numbers = #tpu.dot_dimension_numbers<[1], [0], [0], [1], [0, 0, 1, 1], [], []>} : vector<16x32xf32>, vector<32x32xf32>, vector<16x32xf32> -> vector<16x32xf32>
    %71 = vector.broadcast %15 : vector<1x32xf32> to vector<16x32xf32>
    %72 = arith.addf %70, %71 : vector<16x32xf32>
    %73 = arith.addf %6, %72 : vector<16x32xf32>
    %cst_21 = arith.constant dense<0.000000e+00> : vector<16xf32>
    %74 = vector.multi_reduction <add>, %73, %cst_21 [1] : vector<16x32xf32> to vector<16xf32>
    %75 = vector.shape_cast %74 : vector<16xf32> to vector<16x1xf32>
    %cst_22 = arith.constant 3.200000e+01 : f32
    %76 = vector.broadcast %cst_22 : f32 to vector<16x1xf32>
    %77 = arith.divf %75, %76 : vector<16x1xf32>
    %78 = vector.broadcast %77 : vector<16x1xf32> to vector<16x32xf32>
    %79 = arith.subf %73, %78 : vector<16x32xf32>
    %80 = vector.broadcast %77 : vector<16x1xf32> to vector<16x32xf32>
    %81 = arith.subf %73, %80 : vector<16x32xf32>
    %82 = arith.mulf %79, %81 : vector<16x32xf32>
    %cst_23 = arith.constant dense<0.000000e+00> : vector<16xf32>
    %83 = vector.multi_reduction <add>, %82, %cst_23 [1] : vector<16x32xf32> to vector<16xf32>
    %84 = vector.shape_cast %83 : vector<16xf32> to vector<16x1xf32>
    %cst_24 = arith.constant 3.200000e+01 : f32
    %85 = vector.broadcast %cst_24 : f32 to vector<16x1xf32>
    %86 = arith.divf %84, %85 : vector<16x1xf32>
    %87 = vector.broadcast %77 : vector<16x1xf32> to vector<16x32xf32>
    %88 = arith.subf %73, %87 : vector<16x32xf32>
    %cst_25 = arith.constant 9.99999974E-6 : f32
    %89 = vector.broadcast %cst_25 : f32 to vector<16x1xf32>
    %90 = arith.addf %86, %89 : vector<16x1xf32>
    %91 = math.rsqrt %90 : vector<16x1xf32>
    %92 = vector.broadcast %91 : vector<16x1xf32> to vector<16x32xf32>
    %93 = arith.mulf %88, %92 : vector<16x32xf32>
    %94 = vector.broadcast %18 : vector<1x32xf32> to vector<16x32xf32>
    %95 = arith.mulf %93, %94 : vector<16x32xf32>
    %96 = vector.broadcast %19 : vector<1x32xf32> to vector<16x32xf32>
    %97 = arith.addf %95, %96 : vector<16x32xf32>
    %cst_26 = arith.constant dense<0.000000e+00> : vector<16x64xf32>
    %98 = tpu.matmul %97, %13, %cst_26 {dimension_numbers = #tpu.dot_dimension_numbers<[1], [0], [0], [1], [0, 0, 1, 1], [], []>} : vector<16x32xf32>, vector<32x64xf32>, vector<16x64xf32> -> vector<16x64xf32>
    %99 = vector.broadcast %16 : vector<1x64xf32> to vector<16x64xf32>
    %100 = arith.addf %98, %99 : vector<16x64xf32>
    %cst_27 = arith.constant 0.000000e+00 : f32
    %101 = vector.broadcast %cst_27 : f32 to vector<16x64xf32>
    %102 = arith.maximumf %100, %101 : vector<16x64xf32>
    %c0_28 = arith.constant 0 : index
    %c0_29 = arith.constant 0 : index
    %c0_30 = arith.constant 0 : index
    %103 = vector.load %arg5[%c0_28, %c0_29, %c0_30] : memref<2x64x32xf32, #tpu.memory_space<vmem>>, vector<1x64x32xf32>
    %104 = vector.shape_cast %103 : vector<1x64x32xf32> to vector<64x32xf32>
    %cst_31 = arith.constant dense<0.000000e+00> : vector<16x32xf32>
    %105 = tpu.matmul %102, %104, %cst_31 {dimension_numbers = #tpu.dot_dimension_numbers<[1], [0], [0], [1], [0, 0, 1, 1], [], []>} : vector<16x64xf32>, vector<64x32xf32>, vector<16x32xf32> -> vector<16x32xf32>
    %106 = vector.broadcast %17 : vector<1x32xf32> to vector<16x32xf32>
    %107 = arith.addf %105, %106 : vector<16x32xf32>
    %108 = arith.addf %97, %107 : vector<16x32xf32>
    %cst_32 = arith.constant dense<0.000000e+00> : vector<16xf32>
    %109 = vector.multi_reduction <add>, %108, %cst_32 [1] : vector<16x32xf32> to vector<16xf32>
    %110 = vector.shape_cast %109 : vector<16xf32> to vector<16x1xf32>
    %cst_33 = arith.constant 3.200000e+01 : f32
    %111 = vector.broadcast %cst_33 : f32 to vector<16x1xf32>
    %112 = arith.divf %110, %111 : vector<16x1xf32>
    %113 = vector.broadcast %112 : vector<16x1xf32> to vector<16x32xf32>
    %114 = arith.subf %108, %113 : vector<16x32xf32>
    %115 = vector.broadcast %112 : vector<16x1xf32> to vector<16x32xf32>
    %116 = arith.subf %108, %115 : vector<16x32xf32>
    %117 = arith.mulf %114, %116 : vector<16x32xf32>
    %cst_34 = arith.constant dense<0.000000e+00> : vector<16xf32>
    %118 = vector.multi_reduction <add>, %117, %cst_34 [1] : vector<16x32xf32> to vector<16xf32>
    %119 = vector.shape_cast %118 : vector<16xf32> to vector<16x1xf32>
    %cst_35 = arith.constant 3.200000e+01 : f32
    %120 = vector.broadcast %cst_35 : f32 to vector<16x1xf32>
    %121 = arith.divf %119, %120 : vector<16x1xf32>
    %122 = vector.broadcast %112 : vector<16x1xf32> to vector<16x32xf32>
    %123 = arith.subf %108, %122 : vector<16x32xf32>
    %cst_36 = arith.constant 9.99999974E-6 : f32
    %124 = vector.broadcast %cst_36 : f32 to vector<16x1xf32>
    %125 = arith.addf %121, %124 : vector<16x1xf32>
    %126 = math.rsqrt %125 : vector<16x1xf32>
    %127 = vector.broadcast %126 : vector<16x1xf32> to vector<16x32xf32>
    %128 = arith.mulf %123, %127 : vector<16x32xf32>
    %129 = vector.broadcast %20 : vector<1x32xf32> to vector<16x32xf32>
    %130 = arith.mulf %128, %129 : vector<16x32xf32>
    %131 = vector.broadcast %21 : vector<1x32xf32> to vector<16x32xf32>
    %132 = arith.addf %130, %131 : vector<16x32xf32>
    %c1 = arith.constant 1 : index
    %c0_37 = arith.constant 0 : index
    %c0_38 = arith.constant 0 : index
    %133 = vector.load %arg4[%c1, %c0_37, %c0_38] : memref<2x32x192xf32, #tpu.memory_space<vmem>>, vector<1x32x192xf32>
    %134 = vector.shape_cast %133 : vector<1x32x192xf32> to vector<32x192xf32>
    %c1_39 = arith.constant 1 : index
    %c0_40 = arith.constant 0 : index
    %c0_41 = arith.constant 0 : index
    %135 = vector.load %arg6[%c1_39, %c0_40, %c0_41] : memref<2x8x96xf32, #tpu.memory_space<vmem>>, vector<1x8x96xf32>
    %136 = vector.shape_cast %135 : vector<1x8x96xf32> to vector<8x96xf32>
    %137 = vector.extract_strided_slice %134 {offsets = [0, 0], sizes = [32, 96], strides = [1, 1]} : vector<32x192xf32> to vector<32x96xf32>
    %138 = vector.extract_strided_slice %134 {offsets = [0, 96], sizes = [32, 32], strides = [1, 1]} : vector<32x192xf32> to vector<32x32xf32>
    %139 = vector.extract_strided_slice %134 {offsets = [0, 128], sizes = [32, 64], strides = [1, 1]} : vector<32x192xf32> to vector<32x64xf32>
    %140 = vector.extract_strided_slice %136 {offsets = [0, 0], sizes = [1, 96], strides = [1, 1]} : vector<8x96xf32> to vector<1x96xf32>
    %141 = vector.extract_strided_slice %136 {offsets = [1, 0], sizes = [1, 32], strides = [1, 1]} : vector<8x96xf32> to vector<1x32xf32>
    %142 = vector.extract_strided_slice %136 {offsets = [2, 0], sizes = [1, 64], strides = [1, 1]} : vector<8x96xf32> to vector<1x64xf32>
    %143 = vector.extract_strided_slice %136 {offsets = [3, 0], sizes = [1, 32], strides = [1, 1]} : vector<8x96xf32> to vector<1x32xf32>
    %144 = vector.extract_strided_slice %136 {offsets = [4, 0], sizes = [1, 32], strides = [1, 1]} : vector<8x96xf32> to vector<1x32xf32>
    %145 = vector.extract_strided_slice %136 {offsets = [5, 0], sizes = [1, 32], strides = [1, 1]} : vector<8x96xf32> to vector<1x32xf32>
    %146 = vector.extract_strided_slice %136 {offsets = [6, 0], sizes = [1, 32], strides = [1, 1]} : vector<8x96xf32> to vector<1x32xf32>
    %147 = vector.extract_strided_slice %136 {offsets = [7, 0], sizes = [1, 32], strides = [1, 1]} : vector<8x96xf32> to vector<1x32xf32>
    %cst_42 = arith.constant dense<0.000000e+00> : vector<16x96xf32>
    %148 = tpu.matmul %132, %137, %cst_42 {dimension_numbers = #tpu.dot_dimension_numbers<[1], [0], [0], [1], [0, 0, 1, 1], [], []>} : vector<16x32xf32>, vector<32x96xf32>, vector<16x96xf32> -> vector<16x96xf32>
    %149 = vector.broadcast %140 : vector<1x96xf32> to vector<16x96xf32>
    %150 = arith.addf %148, %149 : vector<16x96xf32>
    %151 = vector.extract_strided_slice %150 {offsets = [0, 0], sizes = [16, 32], strides = [1, 1]} : vector<16x96xf32> to vector<16x32xf32>
    %152 = vector.shape_cast %151 : vector<16x32xf32> to vector<2x8x32xf32>
    %153 = vector.extract_strided_slice %150 {offsets = [0, 32], sizes = [16, 32], strides = [1, 1]} : vector<16x96xf32> to vector<16x32xf32>
    %154 = vector.shape_cast %153 : vector<16x32xf32> to vector<2x8x32xf32>
    %155 = vector.extract_strided_slice %150 {offsets = [0, 64], sizes = [16, 32], strides = [1, 1]} : vector<16x96xf32> to vector<16x32xf32>
    %156 = vector.shape_cast %155 : vector<16x32xf32> to vector<2x8x32xf32>
    %157 = vector.extract_strided_slice %152 {offsets = [0, 0, 0], sizes = [2, 8, 8], strides = [1, 1, 1]} : vector<2x8x32xf32> to vector<2x8x8xf32>
    %158 = vector.extract_strided_slice %152 {offsets = [0, 0, 8], sizes = [2, 8, 8], strides = [1, 1, 1]} : vector<2x8x32xf32> to vector<2x8x8xf32>
    %159 = vector.extract_strided_slice %152 {offsets = [0, 0, 16], sizes = [2, 8, 8], strides = [1, 1, 1]} : vector<2x8x32xf32> to vector<2x8x8xf32>
    %160 = vector.extract_strided_slice %152 {offsets = [0, 0, 24], sizes = [2, 8, 8], strides = [1, 1, 1]} : vector<2x8x32xf32> to vector<2x8x8xf32>
    %161 = tpu.concatenate %157, %158, %159, %160 in 0 : vector<2x8x8xf32>, vector<2x8x8xf32>, vector<2x8x8xf32>, vector<2x8x8xf32> -> vector<8x8x8xf32>
    %162 = vector.extract_strided_slice %154 {offsets = [0, 0, 0], sizes = [2, 8, 8], strides = [1, 1, 1]} : vector<2x8x32xf32> to vector<2x8x8xf32>
    %163 = vector.extract_strided_slice %154 {offsets = [0, 0, 8], sizes = [2, 8, 8], strides = [1, 1, 1]} : vector<2x8x32xf32> to vector<2x8x8xf32>
    %164 = vector.extract_strided_slice %154 {offsets = [0, 0, 16], sizes = [2, 8, 8], strides = [1, 1, 1]} : vector<2x8x32xf32> to vector<2x8x8xf32>
    %165 = vector.extract_strided_slice %154 {offsets = [0, 0, 24], sizes = [2, 8, 8], strides = [1, 1, 1]} : vector<2x8x32xf32> to vector<2x8x8xf32>
    %166 = tpu.concatenate %162, %163, %164, %165 in 0 : vector<2x8x8xf32>, vector<2x8x8xf32>, vector<2x8x8xf32>, vector<2x8x8xf32> -> vector<8x8x8xf32>
    %167 = vector.extract_strided_slice %156 {offsets = [0, 0, 0], sizes = [2, 8, 8], strides = [1, 1, 1]} : vector<2x8x32xf32> to vector<2x8x8xf32>
    %168 = vector.extract_strided_slice %156 {offsets = [0, 0, 8], sizes = [2, 8, 8], strides = [1, 1, 1]} : vector<2x8x32xf32> to vector<2x8x8xf32>
    %169 = vector.extract_strided_slice %156 {offsets = [0, 0, 16], sizes = [2, 8, 8], strides = [1, 1, 1]} : vector<2x8x32xf32> to vector<2x8x8xf32>
    %170 = vector.extract_strided_slice %156 {offsets = [0, 0, 24], sizes = [2, 8, 8], strides = [1, 1, 1]} : vector<2x8x32xf32> to vector<2x8x8xf32>
    %171 = tpu.concatenate %167, %168, %169, %170 in 0 : vector<2x8x8xf32>, vector<2x8x8xf32>, vector<2x8x8xf32>, vector<2x8x8xf32> -> vector<8x8x8xf32>
    %172 = tpu.concatenate %2, %2, %2, %2 in 0 : vector<2x8x8xf32>, vector<2x8x8xf32>, vector<2x8x8xf32>, vector<2x8x8xf32> -> vector<8x8x8xf32>
    "tpu.trace_start"() <{level = 10 : i32, message = "zqd,zkd->zqk"}> : () -> ()
    %cst_43 = arith.constant dense<0.000000e+00> : vector<8x8x8xf32>
    %173 = tpu.matmul %161, %166, %cst_43 {dimension_numbers = #tpu.dot_dimension_numbers<[2], [2], [1], [1], [0, 0, 0, 1, 1, 1], [0], [0]>} : vector<8x8x8xf32>, vector<8x8x8xf32>, vector<8x8x8xf32> -> vector<8x8x8xf32>
    "tpu.trace_stop"() : () -> ()
    %cst_44 = arith.constant 0.353553385 : f32
    %174 = vector.broadcast %cst_44 : f32 to vector<8x8x8xf32>
    %175 = arith.mulf %173, %174 : vector<8x8x8xf32>
    %cst_45 = arith.constant 0.000000e+00 : f32
    %176 = vector.broadcast %cst_45 : f32 to vector<8x8x8xf32>
    %177 = arith.cmpf one, %172, %176 : vector<8x8x8xf32>
    %cst_46 = arith.constant -1.000000e+10 : f32
    %178 = vector.broadcast %cst_46 : f32 to vector<8x8x8xf32>
    %179 = arith.select %177, %175, %178 : vector<8x8x8xi1>, vector<8x8x8xf32>
    %cst_47 = arith.constant dense<0xFF800000> : vector<8x8xf32>
    %180 = vector.multi_reduction <maximumf>, %179, %cst_47 [2] : vector<8x8x8xf32> to vector<8x8xf32>
    %181 = vector.shape_cast %180 : vector<8x8xf32> to vector<8x8x1xf32>
    %182 = vector.broadcast %181 : vector<8x8x1xf32> to vector<8x8x8xf32>
    %183 = arith.subf %179, %182 : vector<8x8x8xf32>
    %184 = math.exp %183 : vector<8x8x8xf32>
    %cst_48 = arith.constant dense<0.000000e+00> : vector<8x8xf32>
    %185 = vector.multi_reduction <add>, %184, %cst_48 [2] : vector<8x8x8xf32> to vector<8x8xf32>
    %186 = vector.shape_cast %185 : vector<8x8xf32> to vector<8x8x1xf32>
    %187 = vector.broadcast %186 : vector<8x8x1xf32> to vector<8x8x8xf32>
    %188 = arith.divf %184, %187 : vector<8x8x8xf32>
    "tpu.trace_start"() <{level = 10 : i32, message = "zqk,zkd->zqd"}> : () -> ()
    %cst_49 = arith.constant dense<0.000000e+00> : vector<8x8x8xf32>
    %189 = tpu.matmul %188, %171, %cst_49 {dimension_numbers = #tpu.dot_dimension_numbers<[2], [1], [1], [2], [0, 0, 0, 1, 1, 2], [0], [0]>} : vector<8x8x8xf32>, vector<8x8x8xf32>, vector<8x8x8xf32> -> vector<8x8x8xf32>
    "tpu.trace_stop"() : () -> ()
    %190 = vector.extract_strided_slice %189 {offsets = [0, 0, 0], sizes = [2, 8, 8], strides = [1, 1, 1]} : vector<8x8x8xf32> to vector<2x8x8xf32>
    %191 = vector.extract_strided_slice %189 {offsets = [2, 0, 0], sizes = [2, 8, 8], strides = [1, 1, 1]} : vector<8x8x8xf32> to vector<2x8x8xf32>
    %192 = vector.extract_strided_slice %189 {offsets = [4, 0, 0], sizes = [2, 8, 8], strides = [1, 1, 1]} : vector<8x8x8xf32> to vector<2x8x8xf32>
    %193 = vector.extract_strided_slice %189 {offsets = [6, 0, 0], sizes = [2, 8, 8], strides = [1, 1, 1]} : vector<8x8x8xf32> to vector<2x8x8xf32>
    %194 = tpu.concatenate %190, %191, %192, %193 in 2 : vector<2x8x8xf32>, vector<2x8x8xf32>, vector<2x8x8xf32>, vector<2x8x8xf32> -> vector<2x8x32xf32>
    %195 = vector.shape_cast %194 : vector<2x8x32xf32> to vector<16x32xf32>
    %cst_50 = arith.constant dense<0.000000e+00> : vector<16x32xf32>
    %196 = tpu.matmul %195, %138, %cst_50 {dimension_numbers = #tpu.dot_dimension_numbers<[1], [0], [0], [1], [0, 0, 1, 1], [], []>} : vector<16x32xf32>, vector<32x32xf32>, vector<16x32xf32> -> vector<16x32xf32>
    %197 = vector.broadcast %141 : vector<1x32xf32> to vector<16x32xf32>
    %198 = arith.addf %196, %197 : vector<16x32xf32>
    %199 = arith.addf %132, %198 : vector<16x32xf32>
    %cst_51 = arith.constant dense<0.000000e+00> : vector<16xf32>
    %200 = vector.multi_reduction <add>, %199, %cst_51 [1] : vector<16x32xf32> to vector<16xf32>
    %201 = vector.shape_cast %200 : vector<16xf32> to vector<16x1xf32>
    %cst_52 = arith.constant 3.200000e+01 : f32
    %202 = vector.broadcast %cst_52 : f32 to vector<16x1xf32>
    %203 = arith.divf %201, %202 : vector<16x1xf32>
    %204 = vector.broadcast %203 : vector<16x1xf32> to vector<16x32xf32>
    %205 = arith.subf %199, %204 : vector<16x32xf32>
    %206 = vector.broadcast %203 : vector<16x1xf32> to vector<16x32xf32>
    %207 = arith.subf %199, %206 : vector<16x32xf32>
    %208 = arith.mulf %205, %207 : vector<16x32xf32>
    %cst_53 = arith.constant dense<0.000000e+00> : vector<16xf32>
    %209 = vector.multi_reduction <add>, %208, %cst_53 [1] : vector<16x32xf32> to vector<16xf32>
    %210 = vector.shape_cast %209 : vector<16xf32> to vector<16x1xf32>
    %cst_54 = arith.constant 3.200000e+01 : f32
    %211 = vector.broadcast %cst_54 : f32 to vector<16x1xf32>
    %212 = arith.divf %210, %211 : vector<16x1xf32>
    %213 = vector.broadcast %203 : vector<16x1xf32> to vector<16x32xf32>
    %214 = arith.subf %199, %213 : vector<16x32xf32>
    %cst_55 = arith.constant 9.99999974E-6 : f32
    %215 = vector.broadcast %cst_55 : f32 to vector<16x1xf32>
    %216 = arith.addf %212, %215 : vector<16x1xf32>
    %217 = math.rsqrt %216 : vector<16x1xf32>
    %218 = vector.broadcast %217 : vector<16x1xf32> to vector<16x32xf32>
    %219 = arith.mulf %214, %218 : vector<16x32xf32>
    %220 = vector.broadcast %144 : vector<1x32xf32> to vector<16x32xf32>
    %221 = arith.mulf %219, %220 : vector<16x32xf32>
    %222 = vector.broadcast %145 : vector<1x32xf32> to vector<16x32xf32>
    %223 = arith.addf %221, %222 : vector<16x32xf32>
    %cst_56 = arith.constant dense<0.000000e+00> : vector<16x64xf32>
    %224 = tpu.matmul %223, %139, %cst_56 {dimension_numbers = #tpu.dot_dimension_numbers<[1], [0], [0], [1], [0, 0, 1, 1], [], []>} : vector<16x32xf32>, vector<32x64xf32>, vector<16x64xf32> -> vector<16x64xf32>
    %225 = vector.broadcast %142 : vector<1x64xf32> to vector<16x64xf32>
    %226 = arith.addf %224, %225 : vector<16x64xf32>
    %cst_57 = arith.constant 0.000000e+00 : f32
    %227 = vector.broadcast %cst_57 : f32 to vector<16x64xf32>
    %228 = arith.maximumf %226, %227 : vector<16x64xf32>
    %c1_58 = arith.constant 1 : index
    %c0_59 = arith.constant 0 : index
    %c0_60 = arith.constant 0 : index
    %229 = vector.load %arg5[%c1_58, %c0_59, %c0_60] : memref<2x64x32xf32, #tpu.memory_space<vmem>>, vector<1x64x32xf32>
    %230 = vector.shape_cast %229 : vector<1x64x32xf32> to vector<64x32xf32>
    %cst_61 = arith.constant dense<0.000000e+00> : vector<16x32xf32>
    %231 = tpu.matmul %228, %230, %cst_61 {dimension_numbers = #tpu.dot_dimension_numbers<[1], [0], [0], [1], [0, 0, 1, 1], [], []>} : vector<16x64xf32>, vector<64x32xf32>, vector<16x32xf32> -> vector<16x32xf32>
    %232 = vector.broadcast %143 : vector<1x32xf32> to vector<16x32xf32>
    %233 = arith.addf %231, %232 : vector<16x32xf32>
    %234 = arith.addf %223, %233 : vector<16x32xf32>
    %cst_62 = arith.constant dense<0.000000e+00> : vector<16xf32>
    %235 = vector.multi_reduction <add>, %234, %cst_62 [1] : vector<16x32xf32> to vector<16xf32>
    %236 = vector.shape_cast %235 : vector<16xf32> to vector<16x1xf32>
    %cst_63 = arith.constant 3.200000e+01 : f32
    %237 = vector.broadcast %cst_63 : f32 to vector<16x1xf32>
    %238 = arith.divf %236, %237 : vector<16x1xf32>
    %239 = vector.broadcast %238 : vector<16x1xf32> to vector<16x32xf32>
    %240 = arith.subf %234, %239 : vector<16x32xf32>
    %241 = vector.broadcast %238 : vector<16x1xf32> to vector<16x32xf32>
    %242 = arith.subf %234, %241 : vector<16x32xf32>
    %243 = arith.mulf %240, %242 : vector<16x32xf32>
    %cst_64 = arith.constant dense<0.000000e+00> : vector<16xf32>
    %244 = vector.multi_reduction <add>, %243, %cst_64 [1] : vector<16x32xf32> to vector<16xf32>
    %245 = vector.shape_cast %244 : vector<16xf32> to vector<16x1xf32>
    %cst_65 = arith.constant 3.200000e+01 : f32
    %246 = vector.broadcast %cst_65 : f32 to vector<16x1xf32>
    %247 = arith.divf %245, %246 : vector<16x1xf32>
    %248 = vector.broadcast %238 : vector<16x1xf32> to vector<16x32xf32>
    %249 = arith.subf %234, %248 : vector<16x32xf32>
    %cst_66 = arith.constant 9.99999974E-6 : f32
    %250 = vector.broadcast %cst_66 : f32 to vector<16x1xf32>
    %251 = arith.addf %247, %250 : vector<16x1xf32>
    %252 = math.rsqrt %251 : vector<16x1xf32>
    %253 = vector.broadcast %252 : vector<16x1xf32> to vector<16x32xf32>
    %254 = arith.mulf %249, %253 : vector<16x32xf32>
    %255 = vector.broadcast %146 : vector<1x32xf32> to vector<16x32xf32>
    %256 = arith.mulf %254, %255 : vector<16x32xf32>
    %257 = vector.broadcast %147 : vector<1x32xf32> to vector<16x32xf32>
    %258 = arith.addf %256, %257 : vector<16x32xf32>
    %c0_67 = arith.constant 0 : index
    %c0_68 = arith.constant 0 : index
    %259 = vector.load %arg8[%c0_67, %c0_68] : memref<32x128xf32, #tpu.memory_space<vmem>>, vector<32x128xf32>
    %cst_69 = arith.constant dense<0.000000e+00> : vector<16x128xf32>
    %260 = tpu.matmul %258, %259, %cst_69 {dimension_numbers = #tpu.dot_dimension_numbers<[1], [0], [0], [1], [0, 0, 1, 1], [], []>} : vector<16x32xf32>, vector<32x128xf32>, vector<16x128xf32> -> vector<16x128xf32>
    %c0_70 = arith.constant 0 : index
    %c0_71 = arith.constant 0 : index
    %261 = vector.load %arg9[%c0_70, %c0_71] : memref<1x128xf32, #tpu.memory_space<vmem>>, vector<1x128xf32>
    %262 = vector.broadcast %261 : vector<1x128xf32> to vector<16x128xf32>
    %263 = arith.addf %260, %262 : vector<16x128xf32>
    %c0_72 = arith.constant 0 : index
    %c0_73 = arith.constant 0 : index
    %264 = vector.load %arg1[%c0_72, %c0_73] : memref<16x32xf32, #tpu.memory_space<vmem>>, vector<16x32xf32>
    %c0_74 = arith.constant 0 : index
    %c0_75 = arith.constant 0 : index
    %c0_76 = arith.constant 0 : index
    %265 = vector.load %arg7[%c0_74, %c0_75, %c0_76] : memref<2x32x256xf32, #tpu.memory_space<vmem>>, vector<1x32x256xf32>
    %266 = vector.shape_cast %265 : vector<1x32x256xf32> to vector<32x256xf32>
    %c0_77 = arith.constant 0 : index
    %c0_78 = arith.constant 0 : index
    %c0_79 = arith.constant 0 : index
    %267 = vector.load %arg11[%c0_77, %c0_78, %c0_79] : memref<2x16x96xf32, #tpu.memory_space<vmem>>, vector<1x16x96xf32>
    %268 = vector.shape_cast %267 : vector<1x16x96xf32> to vector<16x96xf32>
    %269 = vector.extract_strided_slice %266 {offsets = [0, 0], sizes = [32, 96], strides = [1, 1]} : vector<32x256xf32> to vector<32x96xf32>
    %270 = vector.extract_strided_slice %266 {offsets = [0, 96], sizes = [32, 32], strides = [1, 1]} : vector<32x256xf32> to vector<32x32xf32>
    %271 = vector.extract_strided_slice %266 {offsets = [0, 128], sizes = [32, 32], strides = [1, 1]} : vector<32x256xf32> to vector<32x32xf32>
    %272 = vector.extract_strided_slice %266 {offsets = [0, 160], sizes = [32, 32], strides = [1, 1]} : vector<32x256xf32> to vector<32x32xf32>
    %273 = vector.extract_strided_slice %266 {offsets = [0, 192], sizes = [32, 64], strides = [1, 1]} : vector<32x256xf32> to vector<32x64xf32>
    %274 = vector.extract_strided_slice %268 {offsets = [0, 0], sizes = [1, 96], strides = [1, 1]} : vector<16x96xf32> to vector<1x96xf32>
    %275 = vector.extract_strided_slice %268 {offsets = [1, 0], sizes = [1, 32], strides = [1, 1]} : vector<16x96xf32> to vector<1x32xf32>
    %276 = vector.extract_strided_slice %268 {offsets = [2, 0], sizes = [1, 32], strides = [1, 1]} : vector<16x96xf32> to vector<1x32xf32>
    %277 = vector.extract_strided_slice %268 {offsets = [3, 0], sizes = [1, 32], strides = [1, 1]} : vector<16x96xf32> to vector<1x32xf32>
    %278 = vector.extract_strided_slice %268 {offsets = [4, 0], sizes = [1, 64], strides = [1, 1]} : vector<16x96xf32> to vector<1x64xf32>
    %279 = vector.extract_strided_slice %268 {offsets = [5, 0], sizes = [1, 32], strides = [1, 1]} : vector<16x96xf32> to vector<1x32xf32>
    %280 = vector.extract_strided_slice %268 {offsets = [6, 0], sizes = [1, 32], strides = [1, 1]} : vector<16x96xf32> to vector<1x32xf32>
    %281 = vector.extract_strided_slice %268 {offsets = [7, 0], sizes = [1, 32], strides = [1, 1]} : vector<16x96xf32> to vector<1x32xf32>
    %282 = vector.extract_strided_slice %268 {offsets = [8, 0], sizes = [1, 32], strides = [1, 1]} : vector<16x96xf32> to vector<1x32xf32>
    %283 = vector.extract_strided_slice %268 {offsets = [9, 0], sizes = [1, 32], strides = [1, 1]} : vector<16x96xf32> to vector<1x32xf32>
    %284 = vector.extract_strided_slice %268 {offsets = [10, 0], sizes = [1, 32], strides = [1, 1]} : vector<16x96xf32> to vector<1x32xf32>
    %285 = vector.extract_strided_slice %268 {offsets = [11, 0], sizes = [1, 32], strides = [1, 1]} : vector<16x96xf32> to vector<1x32xf32>
    %cst_80 = arith.constant dense<0.000000e+00> : vector<16x96xf32>
    %286 = tpu.matmul %264, %269, %cst_80 {dimension_numbers = #tpu.dot_dimension_numbers<[1], [0], [0], [1], [0, 0, 1, 1], [], []>} : vector<16x32xf32>, vector<32x96xf32>, vector<16x96xf32> -> vector<16x96xf32>
    %287 = vector.broadcast %274 : vector<1x96xf32> to vector<16x96xf32>
    %288 = arith.addf %286, %287 : vector<16x96xf32>
    %289 = vector.extract_strided_slice %288 {offsets = [0, 0], sizes = [16, 32], strides = [1, 1]} : vector<16x96xf32> to vector<16x32xf32>
    %290 = vector.shape_cast %289 : vector<16x32xf32> to vector<2x8x32xf32>
    %291 = vector.extract_strided_slice %288 {offsets = [0, 32], sizes = [16, 32], strides = [1, 1]} : vector<16x96xf32> to vector<16x32xf32>
    %292 = vector.shape_cast %291 : vector<16x32xf32> to vector<2x8x32xf32>
    %293 = vector.extract_strided_slice %288 {offsets = [0, 64], sizes = [16, 32], strides = [1, 1]} : vector<16x96xf32> to vector<16x32xf32>
    %294 = vector.shape_cast %293 : vector<16x32xf32> to vector<2x8x32xf32>
    %295 = vector.extract_strided_slice %290 {offsets = [0, 0, 0], sizes = [2, 8, 8], strides = [1, 1, 1]} : vector<2x8x32xf32> to vector<2x8x8xf32>
    %296 = vector.extract_strided_slice %290 {offsets = [0, 0, 8], sizes = [2, 8, 8], strides = [1, 1, 1]} : vector<2x8x32xf32> to vector<2x8x8xf32>
    %297 = vector.extract_strided_slice %290 {offsets = [0, 0, 16], sizes = [2, 8, 8], strides = [1, 1, 1]} : vector<2x8x32xf32> to vector<2x8x8xf32>
    %298 = vector.extract_strided_slice %290 {offsets = [0, 0, 24], sizes = [2, 8, 8], strides = [1, 1, 1]} : vector<2x8x32xf32> to vector<2x8x8xf32>
    %299 = tpu.concatenate %295, %296, %297, %298 in 0 : vector<2x8x8xf32>, vector<2x8x8xf32>, vector<2x8x8xf32>, vector<2x8x8xf32> -> vector<8x8x8xf32>
    %300 = vector.extract_strided_slice %292 {offsets = [0, 0, 0], sizes = [2, 8, 8], strides = [1, 1, 1]} : vector<2x8x32xf32> to vector<2x8x8xf32>
    %301 = vector.extract_strided_slice %292 {offsets = [0, 0, 8], sizes = [2, 8, 8], strides = [1, 1, 1]} : vector<2x8x32xf32> to vector<2x8x8xf32>
    %302 = vector.extract_strided_slice %292 {offsets = [0, 0, 16], sizes = [2, 8, 8], strides = [1, 1, 1]} : vector<2x8x32xf32> to vector<2x8x8xf32>
    %303 = vector.extract_strided_slice %292 {offsets = [0, 0, 24], sizes = [2, 8, 8], strides = [1, 1, 1]} : vector<2x8x32xf32> to vector<2x8x8xf32>
    %304 = tpu.concatenate %300, %301, %302, %303 in 0 : vector<2x8x8xf32>, vector<2x8x8xf32>, vector<2x8x8xf32>, vector<2x8x8xf32> -> vector<8x8x8xf32>
    %305 = vector.extract_strided_slice %294 {offsets = [0, 0, 0], sizes = [2, 8, 8], strides = [1, 1, 1]} : vector<2x8x32xf32> to vector<2x8x8xf32>
    %306 = vector.extract_strided_slice %294 {offsets = [0, 0, 8], sizes = [2, 8, 8], strides = [1, 1, 1]} : vector<2x8x32xf32> to vector<2x8x8xf32>
    %307 = vector.extract_strided_slice %294 {offsets = [0, 0, 16], sizes = [2, 8, 8], strides = [1, 1, 1]} : vector<2x8x32xf32> to vector<2x8x8xf32>
    %308 = vector.extract_strided_slice %294 {offsets = [0, 0, 24], sizes = [2, 8, 8], strides = [1, 1, 1]} : vector<2x8x32xf32> to vector<2x8x8xf32>
    %309 = tpu.concatenate %305, %306, %307, %308 in 0 : vector<2x8x8xf32>, vector<2x8x8xf32>, vector<2x8x8xf32>, vector<2x8x8xf32> -> vector<8x8x8xf32>
    %310 = tpu.concatenate %5, %5, %5, %5 in 0 : vector<2x8x8xf32>, vector<2x8x8xf32>, vector<2x8x8xf32>, vector<2x8x8xf32> -> vector<8x8x8xf32>
    "tpu.trace_start"() <{level = 10 : i32, message = "zqd,zkd->zqk"}> : () -> ()
    %cst_81 = arith.constant dense<0.000000e+00> : vector<8x8x8xf32>
    %311 = tpu.matmul %299, %304, %cst_81 {dimension_numbers = #tpu.dot_dimension_numbers<[2], [2], [1], [1], [0, 0, 0, 1, 1, 1], [0], [0]>} : vector<8x8x8xf32>, vector<8x8x8xf32>, vector<8x8x8xf32> -> vector<8x8x8xf32>
    "tpu.trace_stop"() : () -> ()
    %cst_82 = arith.constant 0.353553385 : f32
    %312 = vector.broadcast %cst_82 : f32 to vector<8x8x8xf32>
    %313 = arith.mulf %311, %312 : vector<8x8x8xf32>
    %cst_83 = arith.constant 0.000000e+00 : f32
    %314 = vector.broadcast %cst_83 : f32 to vector<8x8x8xf32>
    %315 = arith.cmpf one, %310, %314 : vector<8x8x8xf32>
    %cst_84 = arith.constant -1.000000e+10 : f32
    %316 = vector.broadcast %cst_84 : f32 to vector<8x8x8xf32>
    %317 = arith.select %315, %313, %316 : vector<8x8x8xi1>, vector<8x8x8xf32>
    %cst_85 = arith.constant dense<0xFF800000> : vector<8x8xf32>
    %318 = vector.multi_reduction <maximumf>, %317, %cst_85 [2] : vector<8x8x8xf32> to vector<8x8xf32>
    %319 = vector.shape_cast %318 : vector<8x8xf32> to vector<8x8x1xf32>
    %320 = vector.broadcast %319 : vector<8x8x1xf32> to vector<8x8x8xf32>
    %321 = arith.subf %317, %320 : vector<8x8x8xf32>
    %322 = math.exp %321 : vector<8x8x8xf32>
    %cst_86 = arith.constant dense<0.000000e+00> : vector<8x8xf32>
    %323 = vector.multi_reduction <add>, %322, %cst_86 [2] : vector<8x8x8xf32> to vector<8x8xf32>
    %324 = vector.shape_cast %323 : vector<8x8xf32> to vector<8x8x1xf32>
    %325 = vector.broadcast %324 : vector<8x8x1xf32> to vector<8x8x8xf32>
    %326 = arith.divf %322, %325 : vector<8x8x8xf32>
    "tpu.trace_start"() <{level = 10 : i32, message = "zqk,zkd->zqd"}> : () -> ()
    %cst_87 = arith.constant dense<0.000000e+00> : vector<8x8x8xf32>
    %327 = tpu.matmul %326, %309, %cst_87 {dimension_numbers = #tpu.dot_dimension_numbers<[2], [1], [1], [2], [0, 0, 0, 1, 1, 2], [0], [0]>} : vector<8x8x8xf32>, vector<8x8x8xf32>, vector<8x8x8xf32> -> vector<8x8x8xf32>
    "tpu.trace_stop"() : () -> ()
    %328 = vector.extract_strided_slice %327 {offsets = [0, 0, 0], sizes = [2, 8, 8], strides = [1, 1, 1]} : vector<8x8x8xf32> to vector<2x8x8xf32>
    %329 = vector.extract_strided_slice %327 {offsets = [2, 0, 0], sizes = [2, 8, 8], strides = [1, 1, 1]} : vector<8x8x8xf32> to vector<2x8x8xf32>
    %330 = vector.extract_strided_slice %327 {offsets = [4, 0, 0], sizes = [2, 8, 8], strides = [1, 1, 1]} : vector<8x8x8xf32> to vector<2x8x8xf32>
    %331 = vector.extract_strided_slice %327 {offsets = [6, 0, 0], sizes = [2, 8, 8], strides = [1, 1, 1]} : vector<8x8x8xf32> to vector<2x8x8xf32>
    %332 = tpu.concatenate %328, %329, %330, %331 in 2 : vector<2x8x8xf32>, vector<2x8x8xf32>, vector<2x8x8xf32>, vector<2x8x8xf32> -> vector<2x8x32xf32>
    %333 = vector.shape_cast %332 : vector<2x8x32xf32> to vector<16x32xf32>
    %cst_88 = arith.constant dense<0.000000e+00> : vector<16x32xf32>
    %334 = tpu.matmul %333, %270, %cst_88 {dimension_numbers = #tpu.dot_dimension_numbers<[1], [0], [0], [1], [0, 0, 1, 1], [], []>} : vector<16x32xf32>, vector<32x32xf32>, vector<16x32xf32> -> vector<16x32xf32>
    %335 = vector.broadcast %275 : vector<1x32xf32> to vector<16x32xf32>
    %336 = arith.addf %334, %335 : vector<16x32xf32>
    %337 = arith.addf %264, %336 : vector<16x32xf32>
    %cst_89 = arith.constant dense<0.000000e+00> : vector<16xf32>
    %338 = vector.multi_reduction <add>, %337, %cst_89 [1] : vector<16x32xf32> to vector<16xf32>
    %339 = vector.shape_cast %338 : vector<16xf32> to vector<16x1xf32>
    %cst_90 = arith.constant 3.200000e+01 : f32
    %340 = vector.broadcast %cst_90 : f32 to vector<16x1xf32>
    %341 = arith.divf %339, %340 : vector<16x1xf32>
    %342 = vector.broadcast %341 : vector<16x1xf32> to vector<16x32xf32>
    %343 = arith.subf %337, %342 : vector<16x32xf32>
    %344 = vector.broadcast %341 : vector<16x1xf32> to vector<16x32xf32>
    %345 = arith.subf %337, %344 : vector<16x32xf32>
    %346 = arith.mulf %343, %345 : vector<16x32xf32>
    %cst_91 = arith.constant dense<0.000000e+00> : vector<16xf32>
    %347 = vector.multi_reduction <add>, %346, %cst_91 [1] : vector<16x32xf32> to vector<16xf32>
    %348 = vector.shape_cast %347 : vector<16xf32> to vector<16x1xf32>
    %cst_92 = arith.constant 3.200000e+01 : f32
    %349 = vector.broadcast %cst_92 : f32 to vector<16x1xf32>
    %350 = arith.divf %348, %349 : vector<16x1xf32>
    %351 = vector.broadcast %341 : vector<16x1xf32> to vector<16x32xf32>
    %352 = arith.subf %337, %351 : vector<16x32xf32>
    %cst_93 = arith.constant 9.99999974E-6 : f32
    %353 = vector.broadcast %cst_93 : f32 to vector<16x1xf32>
    %354 = arith.addf %350, %353 : vector<16x1xf32>
    %355 = math.rsqrt %354 : vector<16x1xf32>
    %356 = vector.broadcast %355 : vector<16x1xf32> to vector<16x32xf32>
    %357 = arith.mulf %352, %356 : vector<16x32xf32>
    %358 = vector.broadcast %280 : vector<1x32xf32> to vector<16x32xf32>
    %359 = arith.mulf %357, %358 : vector<16x32xf32>
    %360 = vector.broadcast %281 : vector<1x32xf32> to vector<16x32xf32>
    %361 = arith.addf %359, %360 : vector<16x32xf32>
    %cst_94 = arith.constant dense<0.000000e+00> : vector<16x32xf32>
    %362 = tpu.matmul %361, %271, %cst_94 {dimension_numbers = #tpu.dot_dimension_numbers<[1], [0], [0], [1], [0, 0, 1, 1], [], []>} : vector<16x32xf32>, vector<32x32xf32>, vector<16x32xf32> -> vector<16x32xf32>
    %363 = vector.broadcast %276 : vector<1x32xf32> to vector<16x32xf32>
    %364 = arith.addf %362, %363 : vector<16x32xf32>
    %365 = vector.shape_cast %364 : vector<16x32xf32> to vector<2x8x32xf32>
    %366 = vector.extract_strided_slice %263 {offsets = [0, 0], sizes = [16, 32], strides = [1, 1]} : vector<16x128xf32> to vector<16x32xf32>
    %367 = vector.shape_cast %366 : vector<16x32xf32> to vector<2x8x32xf32>
    %368 = vector.extract_strided_slice %263 {offsets = [0, 32], sizes = [16, 32], strides = [1, 1]} : vector<16x128xf32> to vector<16x32xf32>
    %369 = vector.shape_cast %368 : vector<16x32xf32> to vector<2x8x32xf32>
    %370 = vector.extract_strided_slice %365 {offsets = [0, 0, 0], sizes = [2, 8, 8], strides = [1, 1, 1]} : vector<2x8x32xf32> to vector<2x8x8xf32>
    %371 = vector.extract_strided_slice %365 {offsets = [0, 0, 8], sizes = [2, 8, 8], strides = [1, 1, 1]} : vector<2x8x32xf32> to vector<2x8x8xf32>
    %372 = vector.extract_strided_slice %365 {offsets = [0, 0, 16], sizes = [2, 8, 8], strides = [1, 1, 1]} : vector<2x8x32xf32> to vector<2x8x8xf32>
    %373 = vector.extract_strided_slice %365 {offsets = [0, 0, 24], sizes = [2, 8, 8], strides = [1, 1, 1]} : vector<2x8x32xf32> to vector<2x8x8xf32>
    %374 = tpu.concatenate %370, %371, %372, %373 in 0 : vector<2x8x8xf32>, vector<2x8x8xf32>, vector<2x8x8xf32>, vector<2x8x8xf32> -> vector<8x8x8xf32>
    %375 = vector.extract_strided_slice %367 {offsets = [0, 0, 0], sizes = [2, 8, 8], strides = [1, 1, 1]} : vector<2x8x32xf32> to vector<2x8x8xf32>
    %376 = vector.extract_strided_slice %367 {offsets = [0, 0, 8], sizes = [2, 8, 8], strides = [1, 1, 1]} : vector<2x8x32xf32> to vector<2x8x8xf32>
    %377 = vector.extract_strided_slice %367 {offsets = [0, 0, 16], sizes = [2, 8, 8], strides = [1, 1, 1]} : vector<2x8x32xf32> to vector<2x8x8xf32>
    %378 = vector.extract_strided_slice %367 {offsets = [0, 0, 24], sizes = [2, 8, 8], strides = [1, 1, 1]} : vector<2x8x32xf32> to vector<2x8x8xf32>
    %379 = tpu.concatenate %375, %376, %377, %378 in 0 : vector<2x8x8xf32>, vector<2x8x8xf32>, vector<2x8x8xf32>, vector<2x8x8xf32> -> vector<8x8x8xf32>
    %380 = vector.extract_strided_slice %369 {offsets = [0, 0, 0], sizes = [2, 8, 8], strides = [1, 1, 1]} : vector<2x8x32xf32> to vector<2x8x8xf32>
    %381 = vector.extract_strided_slice %369 {offsets = [0, 0, 8], sizes = [2, 8, 8], strides = [1, 1, 1]} : vector<2x8x32xf32> to vector<2x8x8xf32>
    %382 = vector.extract_strided_slice %369 {offsets = [0, 0, 16], sizes = [2, 8, 8], strides = [1, 1, 1]} : vector<2x8x32xf32> to vector<2x8x8xf32>
    %383 = vector.extract_strided_slice %369 {offsets = [0, 0, 24], sizes = [2, 8, 8], strides = [1, 1, 1]} : vector<2x8x32xf32> to vector<2x8x8xf32>
    %384 = tpu.concatenate %380, %381, %382, %383 in 0 : vector<2x8x8xf32>, vector<2x8x8xf32>, vector<2x8x8xf32>, vector<2x8x8xf32> -> vector<8x8x8xf32>
    %385 = tpu.concatenate %4, %4, %4, %4 in 0 : vector<2x8x8xf32>, vector<2x8x8xf32>, vector<2x8x8xf32>, vector<2x8x8xf32> -> vector<8x8x8xf32>
    "tpu.trace_start"() <{level = 10 : i32, message = "zqd,zkd->zqk"}> : () -> ()
    %cst_95 = arith.constant dense<0.000000e+00> : vector<8x8x8xf32>
    %386 = tpu.matmul %374, %379, %cst_95 {dimension_numbers = #tpu.dot_dimension_numbers<[2], [2], [1], [1], [0, 0, 0, 1, 1, 1], [0], [0]>} : vector<8x8x8xf32>, vector<8x8x8xf32>, vector<8x8x8xf32> -> vector<8x8x8xf32>
    "tpu.trace_stop"() : () -> ()
    %cst_96 = arith.constant 0.353553385 : f32
    %387 = vector.broadcast %cst_96 : f32 to vector<8x8x8xf32>
    %388 = arith.mulf %386, %387 : vector<8x8x8xf32>
    %cst_97 = arith.constant 0.000000e+00 : f32
    %389 = vector.broadcast %cst_97 : f32 to vector<8x8x8xf32>
    %390 = arith.cmpf one, %385, %389 : vector<8x8x8xf32>
    %cst_98 = arith.constant -1.000000e+10 : f32
    %391 = vector.broadcast %cst_98 : f32 to vector<8x8x8xf32>
    %392 = arith.select %390, %388, %391 : vector<8x8x8xi1>, vector<8x8x8xf32>
    %cst_99 = arith.constant dense<0xFF800000> : vector<8x8xf32>
    %393 = vector.multi_reduction <maximumf>, %392, %cst_99 [2] : vector<8x8x8xf32> to vector<8x8xf32>
    %394 = vector.shape_cast %393 : vector<8x8xf32> to vector<8x8x1xf32>
    %395 = vector.broadcast %394 : vector<8x8x1xf32> to vector<8x8x8xf32>
    %396 = arith.subf %392, %395 : vector<8x8x8xf32>
    %397 = math.exp %396 : vector<8x8x8xf32>
    %cst_100 = arith.constant dense<0.000000e+00> : vector<8x8xf32>
    %398 = vector.multi_reduction <add>, %397, %cst_100 [2] : vector<8x8x8xf32> to vector<8x8xf32>
    %399 = vector.shape_cast %398 : vector<8x8xf32> to vector<8x8x1xf32>
    %400 = vector.broadcast %399 : vector<8x8x1xf32> to vector<8x8x8xf32>
    %401 = arith.divf %397, %400 : vector<8x8x8xf32>
    "tpu.trace_start"() <{level = 10 : i32, message = "zqk,zkd->zqd"}> : () -> ()
    %cst_101 = arith.constant dense<0.000000e+00> : vector<8x8x8xf32>
    %402 = tpu.matmul %401, %384, %cst_101 {dimension_numbers = #tpu.dot_dimension_numbers<[2], [1], [1], [2], [0, 0, 0, 1, 1, 2], [0], [0]>} : vector<8x8x8xf32>, vector<8x8x8xf32>, vector<8x8x8xf32> -> vector<8x8x8xf32>
    "tpu.trace_stop"() : () -> ()
    %403 = vector.extract_strided_slice %402 {offsets = [0, 0, 0], sizes = [2, 8, 8], strides = [1, 1, 1]} : vector<8x8x8xf32> to vector<2x8x8xf32>
    %404 = vector.extract_strided_slice %402 {offsets = [2, 0, 0], sizes = [2, 8, 8], strides = [1, 1, 1]} : vector<8x8x8xf32> to vector<2x8x8xf32>
    %405 = vector.extract_strided_slice %402 {offsets = [4, 0, 0], sizes = [2, 8, 8], strides = [1, 1, 1]} : vector<8x8x8xf32> to vector<2x8x8xf32>
    %406 = vector.extract_strided_slice %402 {offsets = [6, 0, 0], sizes = [2, 8, 8], strides = [1, 1, 1]} : vector<8x8x8xf32> to vector<2x8x8xf32>
    %407 = tpu.concatenate %403, %404, %405, %406 in 2 : vector<2x8x8xf32>, vector<2x8x8xf32>, vector<2x8x8xf32>, vector<2x8x8xf32> -> vector<2x8x32xf32>
    %408 = vector.shape_cast %407 : vector<2x8x32xf32> to vector<16x32xf32>
    %cst_102 = arith.constant dense<0.000000e+00> : vector<16x32xf32>
    %409 = tpu.matmul %408, %272, %cst_102 {dimension_numbers = #tpu.dot_dimension_numbers<[1], [0], [0], [1], [0, 0, 1, 1], [], []>} : vector<16x32xf32>, vector<32x32xf32>, vector<16x32xf32> -> vector<16x32xf32>
    %410 = vector.broadcast %277 : vector<1x32xf32> to vector<16x32xf32>
    %411 = arith.addf %409, %410 : vector<16x32xf32>
    %412 = arith.addf %361, %411 : vector<16x32xf32>
    %cst_103 = arith.constant dense<0.000000e+00> : vector<16xf32>
    %413 = vector.multi_reduction <add>, %412, %cst_103 [1] : vector<16x32xf32> to vector<16xf32>
    %414 = vector.shape_cast %413 : vector<16xf32> to vector<16x1xf32>
    %cst_104 = arith.constant 3.200000e+01 : f32
    %415 = vector.broadcast %cst_104 : f32 to vector<16x1xf32>
    %416 = arith.divf %414, %415 : vector<16x1xf32>
    %417 = vector.broadcast %416 : vector<16x1xf32> to vector<16x32xf32>
    %418 = arith.subf %412, %417 : vector<16x32xf32>
    %419 = vector.broadcast %416 : vector<16x1xf32> to vector<16x32xf32>
    %420 = arith.subf %412, %419 : vector<16x32xf32>
    %421 = arith.mulf %418, %420 : vector<16x32xf32>
    %cst_105 = arith.constant dense<0.000000e+00> : vector<16xf32>
    %422 = vector.multi_reduction <add>, %421, %cst_105 [1] : vector<16x32xf32> to vector<16xf32>
    %423 = vector.shape_cast %422 : vector<16xf32> to vector<16x1xf32>
    %cst_106 = arith.constant 3.200000e+01 : f32
    %424 = vector.broadcast %cst_106 : f32 to vector<16x1xf32>
    %425 = arith.divf %423, %424 : vector<16x1xf32>
    %426 = vector.broadcast %416 : vector<16x1xf32> to vector<16x32xf32>
    %427 = arith.subf %412, %426 : vector<16x32xf32>
    %cst_107 = arith.constant 9.99999974E-6 : f32
    %428 = vector.broadcast %cst_107 : f32 to vector<16x1xf32>
    %429 = arith.addf %425, %428 : vector<16x1xf32>
    %430 = math.rsqrt %429 : vector<16x1xf32>
    %431 = vector.broadcast %430 : vector<16x1xf32> to vector<16x32xf32>
    %432 = arith.mulf %427, %431 : vector<16x32xf32>
    %433 = vector.broadcast %282 : vector<1x32xf32> to vector<16x32xf32>
    %434 = arith.mulf %432, %433 : vector<16x32xf32>
    %435 = vector.broadcast %283 : vector<1x32xf32> to vector<16x32xf32>
    %436 = arith.addf %434, %435 : vector<16x32xf32>
    %cst_108 = arith.constant dense<0.000000e+00> : vector<16x64xf32>
    %437 = tpu.matmul %436, %273, %cst_108 {dimension_numbers = #tpu.dot_dimension_numbers<[1], [0], [0], [1], [0, 0, 1, 1], [], []>} : vector<16x32xf32>, vector<32x64xf32>, vector<16x64xf32> -> vector<16x64xf32>
    %438 = vector.broadcast %278 : vector<1x64xf32> to vector<16x64xf32>
    %439 = arith.addf %437, %438 : vector<16x64xf32>
    %cst_109 = arith.constant 0.000000e+00 : f32
    %440 = vector.broadcast %cst_109 : f32 to vector<16x64xf32>
    %441 = arith.maximumf %439, %440 : vector<16x64xf32>
    %c0_110 = arith.constant 0 : index
    %c0_111 = arith.constant 0 : index
    %c0_112 = arith.constant 0 : index
    %442 = vector.load %arg10[%c0_110, %c0_111, %c0_112] : memref<2x64x32xf32, #tpu.memory_space<vmem>>, vector<1x64x32xf32>
    %443 = vector.shape_cast %442 : vector<1x64x32xf32> to vector<64x32xf32>
    %cst_113 = arith.constant dense<0.000000e+00> : vector<16x32xf32>
    %444 = tpu.matmul %441, %443, %cst_113 {dimension_numbers = #tpu.dot_dimension_numbers<[1], [0], [0], [1], [0, 0, 1, 1], [], []>} : vector<16x64xf32>, vector<64x32xf32>, vector<16x32xf32> -> vector<16x32xf32>
    %445 = vector.broadcast %279 : vector<1x32xf32> to vector<16x32xf32>
    %446 = arith.addf %444, %445 : vector<16x32xf32>
    %447 = arith.addf %436, %446 : vector<16x32xf32>
    %cst_114 = arith.constant dense<0.000000e+00> : vector<16xf32>
    %448 = vector.multi_reduction <add>, %447, %cst_114 [1] : vector<16x32xf32> to vector<16xf32>
    %449 = vector.shape_cast %448 : vector<16xf32> to vector<16x1xf32>
    %cst_115 = arith.constant 3.200000e+01 : f32
    %450 = vector.broadcast %cst_115 : f32 to vector<16x1xf32>
    %451 = arith.divf %449, %450 : vector<16x1xf32>
    %452 = vector.broadcast %451 : vector<16x1xf32> to vector<16x32xf32>
    %453 = arith.subf %447, %452 : vector<16x32xf32>
    %454 = vector.broadcast %451 : vector<16x1xf32> to vector<16x32xf32>
    %455 = arith.subf %447, %454 : vector<16x32xf32>
    %456 = arith.mulf %453, %455 : vector<16x32xf32>
    %cst_116 = arith.constant dense<0.000000e+00> : vector<16xf32>
    %457 = vector.multi_reduction <add>, %456, %cst_116 [1] : vector<16x32xf32> to vector<16xf32>
    %458 = vector.shape_cast %457 : vector<16xf32> to vector<16x1xf32>
    %cst_117 = arith.constant 3.200000e+01 : f32
    %459 = vector.broadcast %cst_117 : f32 to vector<16x1xf32>
    %460 = arith.divf %458, %459 : vector<16x1xf32>
    %461 = vector.broadcast %451 : vector<16x1xf32> to vector<16x32xf32>
    %462 = arith.subf %447, %461 : vector<16x32xf32>
    %cst_118 = arith.constant 9.99999974E-6 : f32
    %463 = vector.broadcast %cst_118 : f32 to vector<16x1xf32>
    %464 = arith.addf %460, %463 : vector<16x1xf32>
    %465 = math.rsqrt %464 : vector<16x1xf32>
    %466 = vector.broadcast %465 : vector<16x1xf32> to vector<16x32xf32>
    %467 = arith.mulf %462, %466 : vector<16x32xf32>
    %468 = vector.broadcast %284 : vector<1x32xf32> to vector<16x32xf32>
    %469 = arith.mulf %467, %468 : vector<16x32xf32>
    %470 = vector.broadcast %285 : vector<1x32xf32> to vector<16x32xf32>
    %471 = arith.addf %469, %470 : vector<16x32xf32>
    %c1_119 = arith.constant 1 : index
    %c0_120 = arith.constant 0 : index
    %c0_121 = arith.constant 0 : index
    %472 = vector.load %arg7[%c1_119, %c0_120, %c0_121] : memref<2x32x256xf32, #tpu.memory_space<vmem>>, vector<1x32x256xf32>
    %473 = vector.shape_cast %472 : vector<1x32x256xf32> to vector<32x256xf32>
    %c1_122 = arith.constant 1 : index
    %c0_123 = arith.constant 0 : index
    %c0_124 = arith.constant 0 : index
    %474 = vector.load %arg11[%c1_122, %c0_123, %c0_124] : memref<2x16x96xf32, #tpu.memory_space<vmem>>, vector<1x16x96xf32>
    %475 = vector.shape_cast %474 : vector<1x16x96xf32> to vector<16x96xf32>
    %476 = vector.extract_strided_slice %473 {offsets = [0, 0], sizes = [32, 96], strides = [1, 1]} : vector<32x256xf32> to vector<32x96xf32>
    %477 = vector.extract_strided_slice %473 {offsets = [0, 96], sizes = [32, 32], strides = [1, 1]} : vector<32x256xf32> to vector<32x32xf32>
    %478 = vector.extract_strided_slice %473 {offsets = [0, 128], sizes = [32, 32], strides = [1, 1]} : vector<32x256xf32> to vector<32x32xf32>
    %479 = vector.extract_strided_slice %473 {offsets = [0, 160], sizes = [32, 32], strides = [1, 1]} : vector<32x256xf32> to vector<32x32xf32>
    %480 = vector.extract_strided_slice %473 {offsets = [0, 192], sizes = [32, 64], strides = [1, 1]} : vector<32x256xf32> to vector<32x64xf32>
    %481 = vector.extract_strided_slice %475 {offsets = [0, 0], sizes = [1, 96], strides = [1, 1]} : vector<16x96xf32> to vector<1x96xf32>
    %482 = vector.extract_strided_slice %475 {offsets = [1, 0], sizes = [1, 32], strides = [1, 1]} : vector<16x96xf32> to vector<1x32xf32>
    %483 = vector.extract_strided_slice %475 {offsets = [2, 0], sizes = [1, 32], strides = [1, 1]} : vector<16x96xf32> to vector<1x32xf32>
    %484 = vector.extract_strided_slice %475 {offsets = [3, 0], sizes = [1, 32], strides = [1, 1]} : vector<16x96xf32> to vector<1x32xf32>
    %485 = vector.extract_strided_slice %475 {offsets = [4, 0], sizes = [1, 64], strides = [1, 1]} : vector<16x96xf32> to vector<1x64xf32>
    %486 = vector.extract_strided_slice %475 {offsets = [5, 0], sizes = [1, 32], strides = [1, 1]} : vector<16x96xf32> to vector<1x32xf32>
    %487 = vector.extract_strided_slice %475 {offsets = [6, 0], sizes = [1, 32], strides = [1, 1]} : vector<16x96xf32> to vector<1x32xf32>
    %488 = vector.extract_strided_slice %475 {offsets = [7, 0], sizes = [1, 32], strides = [1, 1]} : vector<16x96xf32> to vector<1x32xf32>
    %489 = vector.extract_strided_slice %475 {offsets = [8, 0], sizes = [1, 32], strides = [1, 1]} : vector<16x96xf32> to vector<1x32xf32>
    %490 = vector.extract_strided_slice %475 {offsets = [9, 0], sizes = [1, 32], strides = [1, 1]} : vector<16x96xf32> to vector<1x32xf32>
    %491 = vector.extract_strided_slice %475 {offsets = [10, 0], sizes = [1, 32], strides = [1, 1]} : vector<16x96xf32> to vector<1x32xf32>
    %492 = vector.extract_strided_slice %475 {offsets = [11, 0], sizes = [1, 32], strides = [1, 1]} : vector<16x96xf32> to vector<1x32xf32>
    %cst_125 = arith.constant dense<0.000000e+00> : vector<16x96xf32>
    %493 = tpu.matmul %471, %476, %cst_125 {dimension_numbers = #tpu.dot_dimension_numbers<[1], [0], [0], [1], [0, 0, 1, 1], [], []>} : vector<16x32xf32>, vector<32x96xf32>, vector<16x96xf32> -> vector<16x96xf32>
    %494 = vector.broadcast %481 : vector<1x96xf32> to vector<16x96xf32>
    %495 = arith.addf %493, %494 : vector<16x96xf32>
    %496 = vector.extract_strided_slice %495 {offsets = [0, 0], sizes = [16, 32], strides = [1, 1]} : vector<16x96xf32> to vector<16x32xf32>
    %497 = vector.shape_cast %496 : vector<16x32xf32> to vector<2x8x32xf32>
    %498 = vector.extract_strided_slice %495 {offsets = [0, 32], sizes = [16, 32], strides = [1, 1]} : vector<16x96xf32> to vector<16x32xf32>
    %499 = vector.shape_cast %498 : vector<16x32xf32> to vector<2x8x32xf32>
    %500 = vector.extract_strided_slice %495 {offsets = [0, 64], sizes = [16, 32], strides = [1, 1]} : vector<16x96xf32> to vector<16x32xf32>
    %501 = vector.shape_cast %500 : vector<16x32xf32> to vector<2x8x32xf32>
    %502 = vector.extract_strided_slice %497 {offsets = [0, 0, 0], sizes = [2, 8, 8], strides = [1, 1, 1]} : vector<2x8x32xf32> to vector<2x8x8xf32>
    %503 = vector.extract_strided_slice %497 {offsets = [0, 0, 8], sizes = [2, 8, 8], strides = [1, 1, 1]} : vector<2x8x32xf32> to vector<2x8x8xf32>
    %504 = vector.extract_strided_slice %497 {offsets = [0, 0, 16], sizes = [2, 8, 8], strides = [1, 1, 1]} : vector<2x8x32xf32> to vector<2x8x8xf32>
    %505 = vector.extract_strided_slice %497 {offsets = [0, 0, 24], sizes = [2, 8, 8], strides = [1, 1, 1]} : vector<2x8x32xf32> to vector<2x8x8xf32>
    %506 = tpu.concatenate %502, %503, %504, %505 in 0 : vector<2x8x8xf32>, vector<2x8x8xf32>, vector<2x8x8xf32>, vector<2x8x8xf32> -> vector<8x8x8xf32>
    %507 = vector.extract_strided_slice %499 {offsets = [0, 0, 0], sizes = [2, 8, 8], strides = [1, 1, 1]} : vector<2x8x32xf32> to vector<2x8x8xf32>
    %508 = vector.extract_strided_slice %499 {offsets = [0, 0, 8], sizes = [2, 8, 8], strides = [1, 1, 1]} : vector<2x8x32xf32> to vector<2x8x8xf32>
    %509 = vector.extract_strided_slice %499 {offsets = [0, 0, 16], sizes = [2, 8, 8], strides = [1, 1, 1]} : vector<2x8x32xf32> to vector<2x8x8xf32>
    %510 = vector.extract_strided_slice %499 {offsets = [0, 0, 24], sizes = [2, 8, 8], strides = [1, 1, 1]} : vector<2x8x32xf32> to vector<2x8x8xf32>
    %511 = tpu.concatenate %507, %508, %509, %510 in 0 : vector<2x8x8xf32>, vector<2x8x8xf32>, vector<2x8x8xf32>, vector<2x8x8xf32> -> vector<8x8x8xf32>
    %512 = vector.extract_strided_slice %501 {offsets = [0, 0, 0], sizes = [2, 8, 8], strides = [1, 1, 1]} : vector<2x8x32xf32> to vector<2x8x8xf32>
    %513 = vector.extract_strided_slice %501 {offsets = [0, 0, 8], sizes = [2, 8, 8], strides = [1, 1, 1]} : vector<2x8x32xf32> to vector<2x8x8xf32>
    %514 = vector.extract_strided_slice %501 {offsets = [0, 0, 16], sizes = [2, 8, 8], strides = [1, 1, 1]} : vector<2x8x32xf32> to vector<2x8x8xf32>
    %515 = vector.extract_strided_slice %501 {offsets = [0, 0, 24], sizes = [2, 8, 8], strides = [1, 1, 1]} : vector<2x8x32xf32> to vector<2x8x8xf32>
    %516 = tpu.concatenate %512, %513, %514, %515 in 0 : vector<2x8x8xf32>, vector<2x8x8xf32>, vector<2x8x8xf32>, vector<2x8x8xf32> -> vector<8x8x8xf32>
    %517 = tpu.concatenate %5, %5, %5, %5 in 0 : vector<2x8x8xf32>, vector<2x8x8xf32>, vector<2x8x8xf32>, vector<2x8x8xf32> -> vector<8x8x8xf32>
    "tpu.trace_start"() <{level = 10 : i32, message = "zqd,zkd->zqk"}> : () -> ()
    %cst_126 = arith.constant dense<0.000000e+00> : vector<8x8x8xf32>
    %518 = tpu.matmul %506, %511, %cst_126 {dimension_numbers = #tpu.dot_dimension_numbers<[2], [2], [1], [1], [0, 0, 0, 1, 1, 1], [0], [0]>} : vector<8x8x8xf32>, vector<8x8x8xf32>, vector<8x8x8xf32> -> vector<8x8x8xf32>
    "tpu.trace_stop"() : () -> ()
    %cst_127 = arith.constant 0.353553385 : f32
    %519 = vector.broadcast %cst_127 : f32 to vector<8x8x8xf32>
    %520 = arith.mulf %518, %519 : vector<8x8x8xf32>
    %cst_128 = arith.constant 0.000000e+00 : f32
    %521 = vector.broadcast %cst_128 : f32 to vector<8x8x8xf32>
    %522 = arith.cmpf one, %517, %521 : vector<8x8x8xf32>
    %cst_129 = arith.constant -1.000000e+10 : f32
    %523 = vector.broadcast %cst_129 : f32 to vector<8x8x8xf32>
    %524 = arith.select %522, %520, %523 : vector<8x8x8xi1>, vector<8x8x8xf32>
    %cst_130 = arith.constant dense<0xFF800000> : vector<8x8xf32>
    %525 = vector.multi_reduction <maximumf>, %524, %cst_130 [2] : vector<8x8x8xf32> to vector<8x8xf32>
    %526 = vector.shape_cast %525 : vector<8x8xf32> to vector<8x8x1xf32>
    %527 = vector.broadcast %526 : vector<8x8x1xf32> to vector<8x8x8xf32>
    %528 = arith.subf %524, %527 : vector<8x8x8xf32>
    %529 = math.exp %528 : vector<8x8x8xf32>
    %cst_131 = arith.constant dense<0.000000e+00> : vector<8x8xf32>
    %530 = vector.multi_reduction <add>, %529, %cst_131 [2] : vector<8x8x8xf32> to vector<8x8xf32>
    %531 = vector.shape_cast %530 : vector<8x8xf32> to vector<8x8x1xf32>
    %532 = vector.broadcast %531 : vector<8x8x1xf32> to vector<8x8x8xf32>
    %533 = arith.divf %529, %532 : vector<8x8x8xf32>
    "tpu.trace_start"() <{level = 10 : i32, message = "zqk,zkd->zqd"}> : () -> ()
    %cst_132 = arith.constant dense<0.000000e+00> : vector<8x8x8xf32>
    %534 = tpu.matmul %533, %516, %cst_132 {dimension_numbers = #tpu.dot_dimension_numbers<[2], [1], [1], [2], [0, 0, 0, 1, 1, 2], [0], [0]>} : vector<8x8x8xf32>, vector<8x8x8xf32>, vector<8x8x8xf32> -> vector<8x8x8xf32>
    "tpu.trace_stop"() : () -> ()
    %535 = vector.extract_strided_slice %534 {offsets = [0, 0, 0], sizes = [2, 8, 8], strides = [1, 1, 1]} : vector<8x8x8xf32> to vector<2x8x8xf32>
    %536 = vector.extract_strided_slice %534 {offsets = [2, 0, 0], sizes = [2, 8, 8], strides = [1, 1, 1]} : vector<8x8x8xf32> to vector<2x8x8xf32>
    %537 = vector.extract_strided_slice %534 {offsets = [4, 0, 0], sizes = [2, 8, 8], strides = [1, 1, 1]} : vector<8x8x8xf32> to vector<2x8x8xf32>
    %538 = vector.extract_strided_slice %534 {offsets = [6, 0, 0], sizes = [2, 8, 8], strides = [1, 1, 1]} : vector<8x8x8xf32> to vector<2x8x8xf32>
    %539 = tpu.concatenate %535, %536, %537, %538 in 2 : vector<2x8x8xf32>, vector<2x8x8xf32>, vector<2x8x8xf32>, vector<2x8x8xf32> -> vector<2x8x32xf32>
    %540 = vector.shape_cast %539 : vector<2x8x32xf32> to vector<16x32xf32>
    %cst_133 = arith.constant dense<0.000000e+00> : vector<16x32xf32>
    %541 = tpu.matmul %540, %477, %cst_133 {dimension_numbers = #tpu.dot_dimension_numbers<[1], [0], [0], [1], [0, 0, 1, 1], [], []>} : vector<16x32xf32>, vector<32x32xf32>, vector<16x32xf32> -> vector<16x32xf32>
    %542 = vector.broadcast %482 : vector<1x32xf32> to vector<16x32xf32>
    %543 = arith.addf %541, %542 : vector<16x32xf32>
    %544 = arith.addf %471, %543 : vector<16x32xf32>
    %cst_134 = arith.constant dense<0.000000e+00> : vector<16xf32>
    %545 = vector.multi_reduction <add>, %544, %cst_134 [1] : vector<16x32xf32> to vector<16xf32>
    %546 = vector.shape_cast %545 : vector<16xf32> to vector<16x1xf32>
    %cst_135 = arith.constant 3.200000e+01 : f32
    %547 = vector.broadcast %cst_135 : f32 to vector<16x1xf32>
    %548 = arith.divf %546, %547 : vector<16x1xf32>
    %549 = vector.broadcast %548 : vector<16x1xf32> to vector<16x32xf32>
    %550 = arith.subf %544, %549 : vector<16x32xf32>
    %551 = vector.broadcast %548 : vector<16x1xf32> to vector<16x32xf32>
    %552 = arith.subf %544, %551 : vector<16x32xf32>
    %553 = arith.mulf %550, %552 : vector<16x32xf32>
    %cst_136 = arith.constant dense<0.000000e+00> : vector<16xf32>
    %554 = vector.multi_reduction <add>, %553, %cst_136 [1] : vector<16x32xf32> to vector<16xf32>
    %555 = vector.shape_cast %554 : vector<16xf32> to vector<16x1xf32>
    %cst_137 = arith.constant 3.200000e+01 : f32
    %556 = vector.broadcast %cst_137 : f32 to vector<16x1xf32>
    %557 = arith.divf %555, %556 : vector<16x1xf32>
    %558 = vector.broadcast %548 : vector<16x1xf32> to vector<16x32xf32>
    %559 = arith.subf %544, %558 : vector<16x32xf32>
    %cst_138 = arith.constant 9.99999974E-6 : f32
    %560 = vector.broadcast %cst_138 : f32 to vector<16x1xf32>
    %561 = arith.addf %557, %560 : vector<16x1xf32>
    %562 = math.rsqrt %561 : vector<16x1xf32>
    %563 = vector.broadcast %562 : vector<16x1xf32> to vector<16x32xf32>
    %564 = arith.mulf %559, %563 : vector<16x32xf32>
    %565 = vector.broadcast %487 : vector<1x32xf32> to vector<16x32xf32>
    %566 = arith.mulf %564, %565 : vector<16x32xf32>
    %567 = vector.broadcast %488 : vector<1x32xf32> to vector<16x32xf32>
    %568 = arith.addf %566, %567 : vector<16x32xf32>
    %cst_139 = arith.constant dense<0.000000e+00> : vector<16x32xf32>
    %569 = tpu.matmul %568, %478, %cst_139 {dimension_numbers = #tpu.dot_dimension_numbers<[1], [0], [0], [1], [0, 0, 1, 1], [], []>} : vector<16x32xf32>, vector<32x32xf32>, vector<16x32xf32> -> vector<16x32xf32>
    %570 = vector.broadcast %483 : vector<1x32xf32> to vector<16x32xf32>
    %571 = arith.addf %569, %570 : vector<16x32xf32>
    %572 = vector.shape_cast %571 : vector<16x32xf32> to vector<2x8x32xf32>
    %573 = vector.extract_strided_slice %263 {offsets = [0, 64], sizes = [16, 32], strides = [1, 1]} : vector<16x128xf32> to vector<16x32xf32>
    %574 = vector.shape_cast %573 : vector<16x32xf32> to vector<2x8x32xf32>
    %575 = vector.extract_strided_slice %263 {offsets = [0, 96], sizes = [16, 32], strides = [1, 1]} : vector<16x128xf32> to vector<16x32xf32>
    %576 = vector.shape_cast %575 : vector<16x32xf32> to vector<2x8x32xf32>
    %577 = vector.extract_strided_slice %572 {offsets = [0, 0, 0], sizes = [2, 8, 8], strides = [1, 1, 1]} : vector<2x8x32xf32> to vector<2x8x8xf32>
    %578 = vector.extract_strided_slice %572 {offsets = [0, 0, 8], sizes = [2, 8, 8], strides = [1, 1, 1]} : vector<2x8x32xf32> to vector<2x8x8xf32>
    %579 = vector.extract_strided_slice %572 {offsets = [0, 0, 16], sizes = [2, 8, 8], strides = [1, 1, 1]} : vector<2x8x32xf32> to vector<2x8x8xf32>
    %580 = vector.extract_strided_slice %572 {offsets = [0, 0, 24], sizes = [2, 8, 8], strides = [1, 1, 1]} : vector<2x8x32xf32> to vector<2x8x8xf32>
    %581 = tpu.concatenate %577, %578, %579, %580 in 0 : vector<2x8x8xf32>, vector<2x8x8xf32>, vector<2x8x8xf32>, vector<2x8x8xf32> -> vector<8x8x8xf32>
    %582 = vector.extract_strided_slice %574 {offsets = [0, 0, 0], sizes = [2, 8, 8], strides = [1, 1, 1]} : vector<2x8x32xf32> to vector<2x8x8xf32>
    %583 = vector.extract_strided_slice %574 {offsets = [0, 0, 8], sizes = [2, 8, 8], strides = [1, 1, 1]} : vector<2x8x32xf32> to vector<2x8x8xf32>
    %584 = vector.extract_strided_slice %574 {offsets = [0, 0, 16], sizes = [2, 8, 8], strides = [1, 1, 1]} : vector<2x8x32xf32> to vector<2x8x8xf32>
    %585 = vector.extract_strided_slice %574 {offsets = [0, 0, 24], sizes = [2, 8, 8], strides = [1, 1, 1]} : vector<2x8x32xf32> to vector<2x8x8xf32>
    %586 = tpu.concatenate %582, %583, %584, %585 in 0 : vector<2x8x8xf32>, vector<2x8x8xf32>, vector<2x8x8xf32>, vector<2x8x8xf32> -> vector<8x8x8xf32>
    %587 = vector.extract_strided_slice %576 {offsets = [0, 0, 0], sizes = [2, 8, 8], strides = [1, 1, 1]} : vector<2x8x32xf32> to vector<2x8x8xf32>
    %588 = vector.extract_strided_slice %576 {offsets = [0, 0, 8], sizes = [2, 8, 8], strides = [1, 1, 1]} : vector<2x8x32xf32> to vector<2x8x8xf32>
    %589 = vector.extract_strided_slice %576 {offsets = [0, 0, 16], sizes = [2, 8, 8], strides = [1, 1, 1]} : vector<2x8x32xf32> to vector<2x8x8xf32>
    %590 = vector.extract_strided_slice %576 {offsets = [0, 0, 24], sizes = [2, 8, 8], strides = [1, 1, 1]} : vector<2x8x32xf32> to vector<2x8x8xf32>
    %591 = tpu.concatenate %587, %588, %589, %590 in 0 : vector<2x8x8xf32>, vector<2x8x8xf32>, vector<2x8x8xf32>, vector<2x8x8xf32> -> vector<8x8x8xf32>
    %592 = tpu.concatenate %4, %4, %4, %4 in 0 : vector<2x8x8xf32>, vector<2x8x8xf32>, vector<2x8x8xf32>, vector<2x8x8xf32> -> vector<8x8x8xf32>
    "tpu.trace_start"() <{level = 10 : i32, message = "zqd,zkd->zqk"}> : () -> ()
    %cst_140 = arith.constant dense<0.000000e+00> : vector<8x8x8xf32>
    %593 = tpu.matmul %581, %586, %cst_140 {dimension_numbers = #tpu.dot_dimension_numbers<[2], [2], [1], [1], [0, 0, 0, 1, 1, 1], [0], [0]>} : vector<8x8x8xf32>, vector<8x8x8xf32>, vector<8x8x8xf32> -> vector<8x8x8xf32>
    "tpu.trace_stop"() : () -> ()
    %cst_141 = arith.constant 0.353553385 : f32
    %594 = vector.broadcast %cst_141 : f32 to vector<8x8x8xf32>
    %595 = arith.mulf %593, %594 : vector<8x8x8xf32>
    %cst_142 = arith.constant 0.000000e+00 : f32
    %596 = vector.broadcast %cst_142 : f32 to vector<8x8x8xf32>
    %597 = arith.cmpf one, %592, %596 : vector<8x8x8xf32>
    %cst_143 = arith.constant -1.000000e+10 : f32
    %598 = vector.broadcast %cst_143 : f32 to vector<8x8x8xf32>
    %599 = arith.select %597, %595, %598 : vector<8x8x8xi1>, vector<8x8x8xf32>
    %cst_144 = arith.constant dense<0xFF800000> : vector<8x8xf32>
    %600 = vector.multi_reduction <maximumf>, %599, %cst_144 [2] : vector<8x8x8xf32> to vector<8x8xf32>
    %601 = vector.shape_cast %600 : vector<8x8xf32> to vector<8x8x1xf32>
    %602 = vector.broadcast %601 : vector<8x8x1xf32> to vector<8x8x8xf32>
    %603 = arith.subf %599, %602 : vector<8x8x8xf32>
    %604 = math.exp %603 : vector<8x8x8xf32>
    %cst_145 = arith.constant dense<0.000000e+00> : vector<8x8xf32>
    %605 = vector.multi_reduction <add>, %604, %cst_145 [2] : vector<8x8x8xf32> to vector<8x8xf32>
    %606 = vector.shape_cast %605 : vector<8x8xf32> to vector<8x8x1xf32>
    %607 = vector.broadcast %606 : vector<8x8x1xf32> to vector<8x8x8xf32>
    %608 = arith.divf %604, %607 : vector<8x8x8xf32>
    "tpu.trace_start"() <{level = 10 : i32, message = "zqk,zkd->zqd"}> : () -> ()
    %cst_146 = arith.constant dense<0.000000e+00> : vector<8x8x8xf32>
    %609 = tpu.matmul %608, %591, %cst_146 {dimension_numbers = #tpu.dot_dimension_numbers<[2], [1], [1], [2], [0, 0, 0, 1, 1, 2], [0], [0]>} : vector<8x8x8xf32>, vector<8x8x8xf32>, vector<8x8x8xf32> -> vector<8x8x8xf32>
    "tpu.trace_stop"() : () -> ()
    %610 = vector.extract_strided_slice %609 {offsets = [0, 0, 0], sizes = [2, 8, 8], strides = [1, 1, 1]} : vector<8x8x8xf32> to vector<2x8x8xf32>
    %611 = vector.extract_strided_slice %609 {offsets = [2, 0, 0], sizes = [2, 8, 8], strides = [1, 1, 1]} : vector<8x8x8xf32> to vector<2x8x8xf32>
    %612 = vector.extract_strided_slice %609 {offsets = [4, 0, 0], sizes = [2, 8, 8], strides = [1, 1, 1]} : vector<8x8x8xf32> to vector<2x8x8xf32>
    %613 = vector.extract_strided_slice %609 {offsets = [6, 0, 0], sizes = [2, 8, 8], strides = [1, 1, 1]} : vector<8x8x8xf32> to vector<2x8x8xf32>
    %614 = tpu.concatenate %610, %611, %612, %613 in 2 : vector<2x8x8xf32>, vector<2x8x8xf32>, vector<2x8x8xf32>, vector<2x8x8xf32> -> vector<2x8x32xf32>
    %615 = vector.shape_cast %614 : vector<2x8x32xf32> to vector<16x32xf32>
    %cst_147 = arith.constant dense<0.000000e+00> : vector<16x32xf32>
    %616 = tpu.matmul %615, %479, %cst_147 {dimension_numbers = #tpu.dot_dimension_numbers<[1], [0], [0], [1], [0, 0, 1, 1], [], []>} : vector<16x32xf32>, vector<32x32xf32>, vector<16x32xf32> -> vector<16x32xf32>
    %617 = vector.broadcast %484 : vector<1x32xf32> to vector<16x32xf32>
    %618 = arith.addf %616, %617 : vector<16x32xf32>
    %619 = vector.extract_strided_slice %608 {offsets = [0, 0, 0], sizes = [2, 8, 8], strides = [1, 1, 1]} : vector<8x8x8xf32> to vector<2x8x8xf32>
    %620 = vector.shape_cast %619 : vector<2x8x8xf32> to vector<16x8xf32>
    %621 = vector.extract_strided_slice %608 {offsets = [2, 0, 0], sizes = [2, 8, 8], strides = [1, 1, 1]} : vector<8x8x8xf32> to vector<2x8x8xf32>
    %622 = vector.shape_cast %621 : vector<2x8x8xf32> to vector<16x8xf32>
    %623 = vector.extract_strided_slice %608 {offsets = [4, 0, 0], sizes = [2, 8, 8], strides = [1, 1, 1]} : vector<8x8x8xf32> to vector<2x8x8xf32>
    %624 = vector.shape_cast %623 : vector<2x8x8xf32> to vector<16x8xf32>
    %625 = vector.extract_strided_slice %608 {offsets = [6, 0, 0], sizes = [2, 8, 8], strides = [1, 1, 1]} : vector<8x8x8xf32> to vector<2x8x8xf32>
    %626 = vector.shape_cast %625 : vector<2x8x8xf32> to vector<16x8xf32>
    %627 = tpu.concatenate %620, %622, %624, %626 in 1 : vector<16x8xf32>, vector<16x8xf32>, vector<16x8xf32>, vector<16x8xf32> -> vector<16x32xf32>
    %628 = arith.addf %568, %618 : vector<16x32xf32>
    %cst_148 = arith.constant dense<0.000000e+00> : vector<16xf32>
    %629 = vector.multi_reduction <add>, %628, %cst_148 [1] : vector<16x32xf32> to vector<16xf32>
    %630 = vector.shape_cast %629 : vector<16xf32> to vector<16x1xf32>
    %cst_149 = arith.constant 3.200000e+01 : f32
    %631 = vector.broadcast %cst_149 : f32 to vector<16x1xf32>
    %632 = arith.divf %630, %631 : vector<16x1xf32>
    %633 = vector.broadcast %632 : vector<16x1xf32> to vector<16x32xf32>
    %634 = arith.subf %628, %633 : vector<16x32xf32>
    %635 = vector.broadcast %632 : vector<16x1xf32> to vector<16x32xf32>
    %636 = arith.subf %628, %635 : vector<16x32xf32>
    %637 = arith.mulf %634, %636 : vector<16x32xf32>
    %cst_150 = arith.constant dense<0.000000e+00> : vector<16xf32>
    %638 = vector.multi_reduction <add>, %637, %cst_150 [1] : vector<16x32xf32> to vector<16xf32>
    %639 = vector.shape_cast %638 : vector<16xf32> to vector<16x1xf32>
    %cst_151 = arith.constant 3.200000e+01 : f32
    %640 = vector.broadcast %cst_151 : f32 to vector<16x1xf32>
    %641 = arith.divf %639, %640 : vector<16x1xf32>
    %642 = vector.broadcast %632 : vector<16x1xf32> to vector<16x32xf32>
    %643 = arith.subf %628, %642 : vector<16x32xf32>
    %cst_152 = arith.constant 9.99999974E-6 : f32
    %644 = vector.broadcast %cst_152 : f32 to vector<16x1xf32>
    %645 = arith.addf %641, %644 : vector<16x1xf32>
    %646 = math.rsqrt %645 : vector<16x1xf32>
    %647 = vector.broadcast %646 : vector<16x1xf32> to vector<16x32xf32>
    %648 = arith.mulf %643, %647 : vector<16x32xf32>
    %649 = vector.broadcast %489 : vector<1x32xf32> to vector<16x32xf32>
    %650 = arith.mulf %648, %649 : vector<16x32xf32>
    %651 = vector.broadcast %490 : vector<1x32xf32> to vector<16x32xf32>
    %652 = arith.addf %650, %651 : vector<16x32xf32>
    %cst_153 = arith.constant dense<0.000000e+00> : vector<16x64xf32>
    %653 = tpu.matmul %652, %480, %cst_153 {dimension_numbers = #tpu.dot_dimension_numbers<[1], [0], [0], [1], [0, 0, 1, 1], [], []>} : vector<16x32xf32>, vector<32x64xf32>, vector<16x64xf32> -> vector<16x64xf32>
    %654 = vector.broadcast %485 : vector<1x64xf32> to vector<16x64xf32>
    %655 = arith.addf %653, %654 : vector<16x64xf32>
    %cst_154 = arith.constant 0.000000e+00 : f32
    %656 = vector.broadcast %cst_154 : f32 to vector<16x64xf32>
    %657 = arith.maximumf %655, %656 : vector<16x64xf32>
    %c1_155 = arith.constant 1 : index
    %c0_156 = arith.constant 0 : index
    %c0_157 = arith.constant 0 : index
    %658 = vector.load %arg10[%c1_155, %c0_156, %c0_157] : memref<2x64x32xf32, #tpu.memory_space<vmem>>, vector<1x64x32xf32>
    %659 = vector.shape_cast %658 : vector<1x64x32xf32> to vector<64x32xf32>
    %cst_158 = arith.constant dense<0.000000e+00> : vector<16x32xf32>
    %660 = tpu.matmul %657, %659, %cst_158 {dimension_numbers = #tpu.dot_dimension_numbers<[1], [0], [0], [1], [0, 0, 1, 1], [], []>} : vector<16x64xf32>, vector<64x32xf32>, vector<16x32xf32> -> vector<16x32xf32>
    %661 = vector.broadcast %486 : vector<1x32xf32> to vector<16x32xf32>
    %662 = arith.addf %660, %661 : vector<16x32xf32>
    %663 = arith.addf %652, %662 : vector<16x32xf32>
    %cst_159 = arith.constant dense<0.000000e+00> : vector<16xf32>
    %664 = vector.multi_reduction <add>, %663, %cst_159 [1] : vector<16x32xf32> to vector<16xf32>
    %665 = vector.shape_cast %664 : vector<16xf32> to vector<16x1xf32>
    %cst_160 = arith.constant 3.200000e+01 : f32
    %666 = vector.broadcast %cst_160 : f32 to vector<16x1xf32>
    %667 = arith.divf %665, %666 : vector<16x1xf32>
    %668 = vector.broadcast %667 : vector<16x1xf32> to vector<16x32xf32>
    %669 = arith.subf %663, %668 : vector<16x32xf32>
    %670 = vector.broadcast %667 : vector<16x1xf32> to vector<16x32xf32>
    %671 = arith.subf %663, %670 : vector<16x32xf32>
    %672 = arith.mulf %669, %671 : vector<16x32xf32>
    %cst_161 = arith.constant dense<0.000000e+00> : vector<16xf32>
    %673 = vector.multi_reduction <add>, %672, %cst_161 [1] : vector<16x32xf32> to vector<16xf32>
    %674 = vector.shape_cast %673 : vector<16xf32> to vector<16x1xf32>
    %cst_162 = arith.constant 3.200000e+01 : f32
    %675 = vector.broadcast %cst_162 : f32 to vector<16x1xf32>
    %676 = arith.divf %674, %675 : vector<16x1xf32>
    %677 = vector.broadcast %667 : vector<16x1xf32> to vector<16x32xf32>
    %678 = arith.subf %663, %677 : vector<16x32xf32>
    %cst_163 = arith.constant 9.99999974E-6 : f32
    %679 = vector.broadcast %cst_163 : f32 to vector<16x1xf32>
    %680 = arith.addf %676, %679 : vector<16x1xf32>
    %681 = math.rsqrt %680 : vector<16x1xf32>
    %682 = vector.broadcast %681 : vector<16x1xf32> to vector<16x32xf32>
    %683 = arith.mulf %678, %682 : vector<16x32xf32>
    %684 = vector.broadcast %491 : vector<1x32xf32> to vector<16x32xf32>
    %685 = arith.mulf %683, %684 : vector<16x32xf32>
    %686 = vector.broadcast %492 : vector<1x32xf32> to vector<16x32xf32>
    %687 = arith.addf %685, %686 : vector<16x32xf32>
    %c0_164 = arith.constant 0 : index
    %c0_165 = arith.constant 0 : index
    %688 = vector.load %arg12[%c0_164, %c0_165] : memref<32x128xf32, #tpu.memory_space<vmem>>, vector<32x128xf32>
    %cst_166 = arith.constant dense<0.000000e+00> : vector<16x128xf32>
    %689 = tpu.matmul %687, %688, %cst_166 {dimension_numbers = #tpu.dot_dimension_numbers<[1], [0], [0], [1], [0, 0, 1, 1], [], []>} : vector<16x32xf32>, vector<32x128xf32>, vector<16x128xf32> -> vector<16x128xf32>
    %c0_167 = arith.constant 0 : index
    %c0_168 = arith.constant 0 : index
    %690 = vector.load %arg13[%c0_167, %c0_168] : memref<1x128xf32, #tpu.memory_space<vmem>>, vector<1x128xf32>
    %691 = vector.broadcast %690 : vector<1x128xf32> to vector<16x128xf32>
    %692 = arith.addf %689, %691 : vector<16x128xf32>
    %c0_169 = arith.constant 0 : index
    %c0_170 = arith.constant 0 : index
    %693 = vector.load %arg14[%c0_169, %c0_170] : memref<16x128xf32, #tpu.memory_space<vmem>>, vector<16x128xf32>
    tpu.vector_store %arg14[%c0_169, %c0_170], %692 {strides = array<i32>} : memref<16x128xf32, #tpu.memory_space<vmem>>, vector<16x128xf32>,
    %cst_171 = arith.constant 0.000000e+00 : f32
    %694 = vector.broadcast %cst_171 : f32 to vector<16x96xf32>
    %695 = tpu.concatenate %627, %694 in 1 : vector<16x32xf32>, vector<16x96xf32> -> vector<16x128xf32>
    %c0_172 = arith.constant 0 : index
    %c0_173 = arith.constant 0 : index
    %696 = vector.load %arg15[%c0_172, %c0_173] : memref<16x128xf32, #tpu.memory_space<vmem>>, vector<16x128xf32>
    tpu.vector_store %arg15[%c0_172, %c0_173], %695 {strides = array<i32>} : memref<16x128xf32, #tpu.memory_space<vmem>>, vector<16x128xf32>,
    return
  }
}

</mosaic_0001>

<bundles_post_ra>
// kernel: seq2seq_forward.1
= control target key start
LH: loop header
LB: loop body
LE: loop exit
PB: predicated region body
PF: predicated region fallthrough
CT: control target
= control target key end

     0   :  { %vm80_vm0 = vcmask 261120   ;;  %v76_v9 = vlaneseq  ;;  %v12641_v15 = vmov 0.0   ;;  %s12643_s17 = smov 120   ;;  %vm12644_vm1 = vmmov 0   ;;  %s12645_s18 = smov 104   ;;  %s14652_s4 = inlined_call_operand.vmem [shape: f32[2,32,192], index: 4, kind: input, shape index: {}]   ;;  %s14653_s0 = inlined_call_operand.vmem [shape: f32[16,32], index: 0, kind: input, shape index: {}]   ;;  %s14654_s6 = inlined_call_operand.vmem [shape: f32[2,8,96], index: 6, kind: input, shape index: {}]   ;;  %s14655_s2 = inlined_call_operand.vmem [shape: f32[2,1,8], index: 2, kind: input, shape index: {}]   ;;  %s14656_s5 = inlined_call_operand.vmem [shape: f32[2,64,32], index: 5, kind: input, shape index: {}]   ;;  %s14657_s8 = inlined_call_operand.vmem [shape: f32[32,128], index: 8, kind: input, shape index: {}]   ;;  %s14658_s7 = inlined_call_operand.vmem [shape: f32[2,32,256], index: 7, kind: input, shape index: {}]   ;;  %s14659_s1 = inlined_call_operand.vmem [shape: f32[16,32], index: 1, kind: input, shape index: {}]   ;;  %s14660_s9 = inlined_call_operand.vmem [shape: f32[1,128], index: 9, kind: input, shape index: {}]   ;;  %s14661_s11 = inlined_call_operand.vmem [shape: f32[2,16,96], index: 11, kind: input, shape index: {}]   ;;  %s14662_s3 = inlined_call_operand.vmem [shape: f32[2,8,8], index: 3, kind: input, shape index: {}]   ;;  %s14663_s10 = inlined_call_operand.vmem [shape: f32[2,64,32], index: 10, kind: input, shape index: {}]   ;;  %s14664_s12 = inlined_call_operand.vmem [shape: f32[32,128], index: 12, kind: input, shape index: {}]   ;;  %s14665_s15 = inlined_call_operand.vmem [shape: f32[16,128], index: 15, kind: output, shape index: {1}]   ;;  %s14666_s13 = inlined_call_operand.vmem [shape: f32[1,128], index: 13, kind: input, shape index: {}]   ;;  %s14667_s14 = inlined_call_operand.vmem [shape: f32[16,128], index: 14, kind: output, shape index: {0}]  }
   0x1   :  { %v12735_v0 = vld [vmem:[%s14652_s4] sm:$0xff]  ;;  %v12740_v1 = vld [vmem:[%s14652_s4 + $0x10] sm:$0xff]  ;;  %v12768_v8 = vld [vmem:[%s14653_s0 + $0x8] sm:$0xff]  ;;  %11365 = vmatprep.subr.mxu1 %v12641_v15  ;;  %11367 = vmatprep.mubr.msk.f32.mxu1 %vm12644_vm1, %v12641_v15  ;;  %s12646_s19 = smov 96   ;;  %vm178_vm2 = vcmask 64512   ;;  %s12648_s24 = smov 32  }
   0x2   :  { %v12745_v2 = vld [vmem:[%s14652_s4 + $0x20] sm:$0xff]  ;;  %v12327_v3 = vpack.i.bf16 %v12740_v1, %v12735_v0  ;;  %v12108_v4 = vpack.c.bf16 %v12740_v1, %v12735_v0  ;;  %v12754_v5 = vld [vmem:[%s14652_s4 + $0x30] sm:$0xff]  ;;  %v12772_v10 = vshrl.u32 %v76_v9, 7  ;;  %s14672_s25 = smov 8   ;;  %s14670_s26 = smov 16   ;;  %vm1525_vm5 = vcmask 130048  }
   0x3   :  { %v12759_v6 = vld [vmem:[%s14653_s0] sm:$0xff]  ;;  %v12112_v7 = vpack.c.bf16 %v12754_v5, %v12745_v2  ;;  %s12642_s0 = smov 112   ;;  %s14668_s27 = smov 24   ;;  %vm1528_vm6 = vcmask 195584   ;;  %vm1772_vm7 = vcmask 523264  }
   0x4   :  { %11362 = vmatprep.mubr.msk.f32.mxu0 %vm80_vm0, %v12759_v6  ;;  %12109 = vmatprep.subr.bf16.mxu0 %v12108_v4  ;;  %v12775_v11 = vsub.s32 0, %v12772_v10  ;;  %v12780_v12 = vld [vmem:[%s14654_s6] sm:$0xff]  ;;  %s14675_s20 = smov 24  }
   0x5   :  { %12111 = vmatpush3.bf16.msra.mxu0 %v12108_v4  ;;  %v12885_v33 = vld [vmem:[%s14655_s2] ss:$0 sm:$0xff]  ;;  %v12891_v37 = vld [vmem:[%s14655_s2 + $0x1] ss:$0 sm:$0xff]  ;;  %s12647_s2 = smov 64  }
   0x6   :  { %12113 = vmatprep.subr.bf16.mxu0 %v12112_v7  ;;  %v79_v13 = vrot.slane %v12780_v12, %v12775_v11  ;;  %vm793_vm3 = vcmp.ne.f32.partialorder %v12885_v33, 0.0  ;;  %vm794_vm4 = vcmp.ne.f32.partialorder %v12891_v37, 0.0 }
   0x9   :  { %12115 = vmatpush3.bf16.msra.mxu0 %v12112_v7 }
   0xa   :  { %11385 = vmatprep.subr.mxu0 %v12641_v15 }
   0xc   :  { %11363 = vmatmul.mubr.msk.f32.vlgmr.msra.gmra.mrb[0].mxu0 %vm80_vm0, %v12768_v8 }
   0xd   :  { %11387 = vmatprep.mubr.msk.f32.mxu0 %vm12644_vm1, %v12641_v15 }
  0xdf   :  { %v11364_v14 = vpop.f32.mrb[0].mxu0 }
  0xe0   :  { %v153_v16 = vpop.f32.mrb[1].mxu0  ;;  %v12796_v18 = vadd.f32 %v11364_v14, %v79_v13 }
  0xe1   :  { %v12786_v17 = vadd.f32 %v153_v16, %v79_v13 }
  0xe3   :  { %168 = vrot.lane.b32.xlu1 %v12786_v17, %s12642_s0  ;;  %164 = vrot.lane.b32.xlu0 %v12786_v17, %s12643_s17 }
  0xe7   :  { %170 = vrot.lane.b32.xlu1 %v12796_v18, %s12642_s0  ;;  %166 = vrot.lane.b32.xlu0 %v12796_v18, %s12643_s17 }
  0xeb   :  { %174 = vrot.lane.b32.xlu1 %v12796_v18, %s12645_s18  ;;  %172 = vrot.lane.b32.xlu0 %v12786_v17, %s12645_s18 }
  0xef   :  { %253 = vrot.lane.b32.xlu1 %v12796_v18, %s12646_s19  ;;  %176 = vrot.lane.b32.xlu0 %v12786_v17, %s12646_s19 }
 0x155   :  { %v12810_v19 = vpop.permute.xlu1 %168  ;;  %v12812_v20 = vpop.permute.xlu0 %164 }
 0x156   :  { %329 = vrot.lane.b32.xlu0 %v12812_v20, %s12646_s19 }
 0x159   :  { %v12816_v21 = vpop.permute.xlu1 %170  ;;  %v12818_v22 = vpop.permute.xlu0 %166 }
 0x15a   :  { %481 = vrot.lane.b32.xlu0 %v12810_v19, %s12646_s19  ;;  %405 = vrot.lane.b32.xlu1 %v12818_v22, %s12646_s19 }
 0x15d   :  { %v12824_v23 = vpop.permute.xlu0 %172  ;;  %v12830_v24 = vpop.permute.xlu1 %174 }
 0x15e   :  { %557 = vrot.lane.b32.xlu1 %v12816_v21, %s12646_s19  ;;  %633 = vrot.lane.b32.xlu0 %v12824_v23, %s12646_s19 }
 0x161   :  { %v177_v25 = vpop.permute.xlu0 %176  ;;  %v254_v26 = vpop.permute.xlu1 %253 }
 0x162   :  { %709 = vrot.lane.b32.xlu1 %v12830_v24, %s12646_s19  ;;  %11366 = vmatpush3.xpose.msk.msra.mxu1 %vm178_vm2, %v177_v25 }
 0x163   :  { %11370 = vmatprep.subr.mxu1 %v12641_v15 }
 0x165   :  { %11368 = vmatmul.mubr.msk.f32.vlgmr.msra.gmra.mrb[0].mxu1 %vm178_vm2, %v12786_v17 }
 0x166   :  { %11371 = vmatpush3.xpose.msk.msra.mxu1 %vm178_vm2, %v254_v26  ;;  %11372 = vmatprep.mubr.msk.f32.mxu1 %vm12644_vm1, %v12641_v15 }
 0x167   :  { %11375 = vmatprep.subr.mxu1 %v12641_v15 }
 0x169   :  { %11373 = vmatmul.mubr.msk.f32.vlgmr.msra.gmra.mrb[2].mxu1 %vm178_vm2, %v12796_v18 }
 0x16a   :  { %11377 = vmatprep.mubr.msk.f32.mxu1 %vm12644_vm1, %v12641_v15 }
 0x1c8   :  { %v330_v27 = vpop.permute.xlu0 %329 }
 0x1c9   :  { %11376 = vmatpush3.xpose.msk.msra.mxu1 %vm178_vm2, %v330_v27 }
 0x1ca   :  { %11380 = vmatprep.subr.mxu1 %v12641_v15 }
 0x1cc   :  { %v406_v28 = vpop.permute.xlu1 %405  ;;  %11378 = vmatmul.mubr.msk.f32.vlgmr.msra.gmra.mrb[4].mxu1 %vm178_vm2, %v12812_v20  ;;  %v482_v29 = vpop.permute.xlu0 %481 }
 0x1cd   :  { %11381 = vmatpush3.xpose.msk.msra.mxu1 %vm178_vm2, %v406_v28  ;;  %11386 = vmatpush3.xpose.msk.msra.mxu0 %vm178_vm2, %v482_v29 }
 0x1ce   :  { %11382 = vmatprep.mubr.msk.f32.mxu1 %vm12644_vm1, %v12641_v15  ;;  %11390 = vmatprep.subr.mxu1 %v12641_v15 }
 0x1cf   :  { %11395 = vmatprep.subr.mxu0 %v12641_v15 }
 0x1d0   :  { %v558_v30 = vpop.permute.xlu1 %557  ;;  %11383 = vmatmul.mubr.msk.f32.vlgmr.msra.gmra.mrb[6].mxu1 %vm178_vm2, %v12818_v22  ;;  %11388 = vmatmul.mubr.msk.f32.vlgmr.msra.gmra.mrb[2].mxu0 %vm178_vm2, %v12810_v19  ;;  %v634_v31 = vpop.permute.xlu0 %633 }
 0x1d1   :  { %11391 = vmatpush3.xpose.msk.msra.mxu1 %vm178_vm2, %v558_v30  ;;  %11396 = vmatpush3.xpose.msk.msra.mxu0 %vm178_vm2, %v634_v31 }
 0x1d2   :  { %11392 = vmatprep.mubr.msk.f32.mxu1 %vm12644_vm1, %v12641_v15  ;;  %11397 = vmatprep.mubr.msk.f32.mxu0 %vm12644_vm1, %v12641_v15 }
 0x1d3   :  { %11400 = vmatprep.subr.mxu1 %v12641_v15  ;;  %11405 = vmatprep.subr.mxu0 %v12641_v15 }
 0x1d4   :  { %v710_v32 = vpop.permute.xlu1 %709  ;;  %11393 = vmatmul.mubr.msk.f32.vlgmr.msra.gmra.mrb[8].mxu1 %vm178_vm2, %v12816_v21  ;;  %11398 = vmatmul.mubr.msk.f32.vlgmr.msra.gmra.mrb[4].mxu0 %vm178_vm2, %v12824_v23 }
 0x1d5   :  { %11401 = vmatpush3.xpose.msk.msra.mxu1 %vm178_vm2, %v710_v32  ;;  %11402 = vmatprep.mubr.msk.f32.mxu1 %vm12644_vm1, %v12641_v15 }
 0x1d6   :  { %11410 = vmatprep.subr.mxu1 %v12641_v15  ;;  %11407 = vmatprep.mubr.msk.f32.mxu0 %vm12644_vm1, %v12641_v15 }
 0x1d8   :  { %11403 = vmatmul.mubr.msk.f32.vlgmr.msra.gmra.mrb[10].mxu1 %vm178_vm2, %v12830_v24 }
 0x1d9   :  { %11412 = vmatprep.mubr.msk.f32.mxu1 %vm12644_vm1, %v12641_v15 }
 0x238   :  { %v249_v34 = vpop.f32.mrb[0].mxu1 }
 0x239   :  { %v785_v35 = vmul.f32 0.35355338, %v249_v34  ;;  %v11369_v36 = vpop.f32.mrb[1].mxu1 }
 0x23b   :  { %v795_v38 = vsel %vm793_vm3, %v785_v35, -1e+10 }
 0x23c   :  { %v325_v39 = vpop.f32.mrb[2].mxu1  ;;  %v803_v40 = vsel %vm178_vm2, %v795_v38, -inf }
 0x23d   :  { %v786_v41 = vmul.f32 0.35355338, %v325_v39  ;;  %804 = vmax.xlane.f32.xlu0 %v803_v40  ;;  %v11374_v42 = vpop.f32.mrb[3].mxu1 }
 0x23f   :  { %v796_v43 = vsel %vm794_vm4, %v786_v41, -1e+10 }
 0x240   :  { %v806_v44 = vsel %vm178_vm2, %v796_v43, -inf }
 0x241   :  { %807 = vmax.xlane.f32.xlu1 %v806_v44 }
 0x29f   :  { %v401_v45 = vpop.f32.mrb[4].mxu1 }
 0x2a0   :  { %v787_v46 = vmul.f32 0.35355338, %v401_v45  ;;  %v11379_v47 = vpop.f32.mrb[5].mxu1 }
 0x2a2   :  { %v797_v48 = vsel %vm793_vm3, %v787_v46, -1e+10 }
 0x2a3   :  { %v477_v49 = vpop.f32.mrb[6].mxu1  ;;  %v553_v50 = vpop.f32.mrb[2].mxu0  ;;  %v809_v51 = vsel %vm178_vm2, %v797_v48, -inf }
 0x2a4   :  { %v788_v52 = vmul.f32 0.35355338, %v477_v49  ;;  %v789_v53 = vmul.f32 0.35355338, %v553_v50  ;;  %810 = vmax.xlane.f32.xlu0 %v809_v51  ;;  %v11384_v54 = vpop.f32.mrb[7].mxu1  ;;  %v11389_v55 = vpop.f32.mrb[3].mxu0 }
 0x2a6   :  { %v798_v56 = vsel %vm794_vm4, %v788_v52, -1e+10  ;;  %v799_v57 = vsel %vm793_vm3, %v789_v53, -1e+10 }
 0x2a7   :  { %v629_v58 = vpop.f32.mrb[8].mxu1  ;;  %v705_v59 = vpop.f32.mrb[4].mxu0  ;;  %v812_v60 = vsel %vm178_vm2, %v798_v56, -inf  ;;  %v815_v61 = vsel %vm178_vm2, %v799_v57, -inf }
 0x2a8   :  { %v790_v62 = vmul.f32 0.35355338, %v629_v58  ;;  %v791_v63 = vmul.f32 0.35355338, %v705_v59  ;;  %813 = vmax.xlane.f32.xlu0 %v812_v60  ;;  %v11394_v4 = vpop.f32.mrb[9].mxu1  ;;  %816 = vmax.xlane.f32.xlu1 %v815_v61  ;;  %v11399_v7 = vpop.f32.mrb[5].mxu0 }
 0x2aa   :  { %v800_v9 = vsel %vm794_vm4, %v790_v62, -1e+10  ;;  %v801_v13 = vsel %vm793_vm3, %v791_v63, -1e+10 }
 0x2ab   :  { %v781_v14 = vpop.f32.mrb[10].mxu1  ;;  %v818_v16 = vsel %vm178_vm2, %v800_v9, -inf  ;;  %v821_v25 = vsel %vm178_vm2, %v801_v13, -inf }
 0x2ac   :  { %v792_v26 = vmul.f32 0.35355338, %v781_v14  ;;  %819 = vmax.xlane.f32.xlu0 %v818_v16  ;;  %v11404_v27 = vpop.f32.mrb[11].mxu1  ;;  %822 = vmax.xlane.f32.xlu1 %v821_v25 }
 0x2ae   :  { %v802_v28 = vsel %vm794_vm4, %v792_v26, -1e+10 }
 0x2af   :  { %v824_v29 = vsel %vm178_vm2, %v802_v28, -inf }
 0x2b0   :  { %825 = vmax.xlane.f32.xlu0 %v824_v29 }
 0x2bd   :  { %891 = vrot.lane.b32.xlu1 %v12786_v17, %s12647_s2 }
 0x2c1   :  { %1043 = vrot.lane.b32.xlu1 %v12812_v20, %s12647_s2 }
 0x2c5   :  { %1119 = vrot.lane.b32.xlu1 %v12818_v22, %s12647_s2 }
 0x2c6   :  { %967 = vrot.lane.b32.xlu0 %v12796_v18, %s12647_s2 }
 0x2c9   :  { %1271 = vrot.lane.b32.xlu1 %v12816_v21, %s12647_s2 }
 0x2ca   :  { %1195 = vrot.lane.b32.xlu0 %v12810_v19, %s12647_s2  ;;  %v805_v32 = vpop.xlane.xlu0 %804 }
 0x2cb   :  { %v827_v34 = vsub.f32 %v795_v38, %v805_v32 }
 0x2cd   :  { %v835_v35 = vmul.f32 1.442695, %v827_v34 }
 0x2ce   :  { %v808_v30 = vpop.xlane.xlu1 %807 }
 0x2cf   :  { %v828_v31 = vsub.f32 %v796_v43, %v808_v30 }
 0x2d1   :  { %v837_v17 = vmul.f32 1.442695, %v828_v31 }
 0x2d3   :  { %12407 = vpow2.f32 %v837_v17 }
 0x2d4   :  { %12409 = vpow2.f32 %v835_v35 }
 0x2dd   :  { %v12930_v20 = vpop.eup %12407 }
 0x2de   :  { %v854_v22 = vsel %vm178_vm2, %v12930_v20, 0.0  ;;  %v12934_v18 = vpop.eup %12409 }
 0x2df   :  { %v851_v21 = vsel %vm178_vm2, %v12934_v18, 0.0 }
 0x2e9   :  { %855 = vadd.xlane.f32.xlu0 %v854_v22 }
 0x2ed   :  { %852 = vadd.xlane.f32.xlu1 %v851_v21  ;;  %v12332_v21 = vpack.i.bf16 %v12754_v5, %v12745_v2 }
 0x331   :  { %v811_v19 = vpop.xlane.xlu0 %810 }
 0x332   :  { %v829_v36 = vsub.f32 %v797_v48, %v811_v19 }
 0x334   :  { %v839_v39 = vmul.f32 1.442695, %v829_v36 }
 0x335   :  { %v817_v38 = vpop.xlane.xlu1 %816  ;;  %v814_v40 = vpop.xlane.xlu0 %813 }
 0x336   :  { %12411 = vpow2.f32 %v839_v39  ;;  %v831_v41 = vsub.f32 %v799_v57, %v817_v38  ;;  %v830_v42 = vsub.f32 %v798_v56, %v814_v40 }
 0x338   :  { %v843_v43 = vmul.f32 1.442695, %v831_v41  ;;  %v841_v44 = vmul.f32 1.442695, %v830_v42 }
 0x339   :  { %v823_v45 = vpop.xlane.xlu1 %822  ;;  %v820_v46 = vpop.xlane.xlu0 %819 }
 0x33a   :  { %12413 = vpow2.f32 %v843_v43  ;;  %v833_v47 = vsub.f32 %v801_v13, %v823_v45  ;;  %v832_v49 = vsub.f32 %v800_v9, %v820_v46 }
 0x33b   :  { %12415 = vpow2.f32 %v841_v44 }
 0x33c   :  { %v847_v50 = vmul.f32 1.442695, %v833_v47  ;;  %v845_v51 = vmul.f32 1.442695, %v832_v49 }
 0x33d   :  { %v892_v52 = vpop.permute.xlu1 %891  ;;  %v826_v53 = vpop.xlane.xlu0 %825 }
 0x33e   :  { %12417 = vpow2.f32 %v847_v50  ;;  %v834_v48 = vsub.f32 %v802_v28, %v826_v53  ;;  %11406 = vmatpush3.msra.mxu0 %v892_v52 }
 0x33f   :  { %12419 = vpow2.f32 %v845_v51  ;;  %11415 = vmatprep.subr.mxu0 %v12641_v15 }
 0x340   :  { %v12412_v54 = vpop.eup %12411  ;;  %v849_v55 = vmul.f32 1.442695, %v834_v48 }
 0x341   :  { %v968_v56 = vpop.permute.xlu0 %967  ;;  %v857_v57 = vsel %vm178_vm2, %v12412_v54, 0.0  ;;  %v1044_v14 = vpop.permute.xlu1 %1043 }
 0x342   :  { %12421 = vpow2.f32 %v849_v55  ;;  %858 = vadd.xlane.f32.xlu1 %v857_v57  ;;  %11411 = vmatpush3.msra.mxu1 %v968_v56 }
 0x343   :  { %11420 = vmatprep.subr.mxu1 %v12641_v15 }
 0x344   :  { %v12414_v58 = vpop.eup %12413 }
 0x345   :  { %v12416_v59 = vpop.eup %12415  ;;  %v863_v60 = vsel %vm178_vm2, %v12414_v58, 0.0  ;;  %v1120_v16 = vpop.permute.xlu1 %1119 }
 0x346   :  { %864 = vadd.xlane.f32.xlu1 %v863_v60  ;;  %v860_v61 = vsel %vm178_vm2, %v12416_v59, 0.0  ;;  %v1196_v25 = vpop.permute.xlu0 %1195 }
 0x347   :  { %861 = vadd.xlane.f32.xlu0 %v860_v61 }
 0x348   :  { %v12943_v62 = vpop.eup %12417 }
 0x349   :  { %v12945_v63 = vpop.eup %12419  ;;  %v869_v4 = vsel %vm178_vm2, %v12943_v62, 0.0  ;;  %v1272_v26 = vpop.permute.xlu1 %1271 }
 0x34a   :  { %870 = vadd.xlane.f32.xlu1 %v869_v4  ;;  %v866_v7 = vsel %vm178_vm2, %v12945_v63, 0.0 }
 0x34b   :  { %867 = vadd.xlane.f32.xlu0 %v866_v7 }
 0x34c   :  { %v12951_v9 = vpop.eup %12421 }
 0x34d   :  { %v872_v13 = vsel %vm178_vm2, %v12951_v9, 0.0 }
 0x34f   :  { %873 = vadd.xlane.f32.xlu0 %v872_v13 }
 0x35b   :  { %1423 = vrot.lane.b32.xlu1 %v12830_v24, %s12647_s2 }
 0x35f   :  { %12333 = vrot.lane.b32.xlu1 %v12332_v21, %s12648_s24 }
 0x365   :  { %1347 = vrot.lane.b32.xlu0 %v12824_v23, %s12647_s2 }
 0x369   :  { %12328 = vrot.lane.b32.xlu0 %v12327_v3, %s12648_s24 }
 0x376   :  { %v856_v27 = vpop.xlane.xlu0 %855 }
 0x377   :  { %12423 = vrcp.f32 %v856_v27 }
 0x37a   :  { %v853_v28 = vpop.xlane.xlu1 %852 }
 0x37b   :  { %12425 = vrcp.f32 %v853_v28 }
 0x381   :  { %v12424_v29 = vpop.eup %12423 }
 0x382   :  { %v878_v30 = vmul.f32 %v12424_v29, %v12930_v20 }
 0x384   :  { %11413 = vmatmul.mubr.msk.f32.vlgmr.msra.gmra.mrb[12].mxu1 %vm178_vm2, %v878_v30 }
 0x385   :  { %v12426_v31 = vpop.eup %12425  ;;  %11421 = vmatpush3.msra.mxu1 %v1120_v16  ;;  %11422 = vmatprep.mubr.msk.f32.mxu1 %vm12644_vm1, %v12641_v15 }
 0x386   :  { %v876_v23 = vmul.f32 %v12426_v31, %v12934_v18  ;;  %11430 = vmatprep.subr.mxu1 %v12641_v15 }
 0x388   :  { %11408 = vmatmul.mubr.msk.f32.vlgmr.msra.gmra.mrb[6].mxu0 %vm178_vm2, %v876_v23 }
 0x389   :  { %11416 = vmatpush3.msra.mxu0 %v1044_v14  ;;  %11417 = vmatprep.mubr.msk.f32.mxu0 %vm12644_vm1, %v12641_v15 }
 0x38a   :  { %11425 = vmatprep.subr.mxu0 %v12641_v15 }
 0x3cf   :  { %v859_v24 = vpop.xlane.xlu1 %858 }
 0x3d0   :  { %12427 = vrcp.f32 %v859_v24 }
 0x3d3   :  { %v865_v32 = vpop.xlane.xlu1 %864 }
 0x3d4   :  { %12429 = vrcp.f32 %v865_v32  ;;  %v862_v34 = vpop.xlane.xlu0 %861  ;;  %v13010_v32 = vsub.s32 1, %v12772_v10 }
 0x3d5   :  { %12431 = vrcp.f32 %v862_v34 }
 0x3d6   :  { %v1534_v34 = vrot.slane %v12780_v12, %v13010_v32 }
 0x3d7   :  { %v871_v17 = vpop.xlane.xlu1 %870 }
 0x3d8   :  { %12433 = vrcp.f32 %v871_v17  ;;  %v868_v35 = vpop.xlane.xlu0 %867 }
 0x3d9   :  { %12435 = vrcp.f32 %v868_v35 }
 0x3da   :  { %v12428_v20 = vpop.eup %12427 }
 0x3db   :  { %v880_v22 = vmul.f32 %v12428_v20, %v12412_v54  ;;  %v1424_v40 = vpop.permute.xlu1 %1423 }
 0x3dc   :  { %v874_v18 = vpop.xlane.xlu0 %873 }
 0x3dd   :  { %12437 = vrcp.f32 %v874_v18  ;;  %11418 = vmatmul.mubr.msk.f32.vlgmr.msra.gmra.mrb[8].mxu0 %vm178_vm2, %v880_v22 }
 0x3de   :  { %v12430_v19 = vpop.eup %12429  ;;  %11426 = vmatpush3.msra.mxu0 %v1196_v25  ;;  %11427 = vmatprep.mubr.msk.f32.mxu0 %vm12644_vm1, %v12641_v15 }
 0x3df   :  { %v12432_v36 = vpop.eup %12431  ;;  %11435 = vmatprep.subr.mxu0 %v12641_v15  ;;  %v884_v39 = vmul.f32 %v12430_v19, %v12414_v58  ;;  %v12334_v51 = vpop.permute.xlu1 %12333 }
 0x3e0   :  { %v1348_v2 = vpop.permute.xlu0 %1347  ;;  %v882_v5 = vmul.f32 %v12432_v36, %v12416_v59  ;;  %v12336_v52 = vunpack.i.h.bf16 %v12334_v51  ;;  %v12335_v53 = vunpack.i.l.bf16 %v12334_v51 }
 0x3e1   :  { %11428 = vmatmul.mubr.msk.f32.vlgmr.msra.gmra.mrb[10].mxu0 %vm178_vm2, %v884_v39 }
 0x3e2   :  { %v12434_v38 = vpop.eup %12433  ;;  %11423 = vmatmul.mubr.msk.f32.vlgmr.msra.gmra.mrb[14].mxu1 %vm178_vm2, %v882_v5  ;;  %11436 = vmatpush3.msra.mxu0 %v1348_v2  ;;  %v12120_v54 = vpack.c.bf16 %v12336_v52, %v12335_v53  ;;  %v1763_v52 = vld [vmem:[%s14656_s5 + $0x18] sm:$0xff] }
 0x3e3   :  { %v12436_v0 = vpop.eup %12435  ;;  %11431 = vmatpush3.msra.mxu1 %v1272_v26  ;;  %11432 = vmatprep.mubr.msk.f32.mxu1 %vm12644_vm1, %v12641_v15  ;;  %v888_v1 = vmul.f32 %v12434_v38, %v12943_v62 }
 0x3e4   :  { %11437 = vmatprep.mubr.msk.f32.mxu0 %vm12644_vm1, %v12641_v15  ;;  %11440 = vmatprep.subr.mxu1 %v12641_v15  ;;  %v886_v3 = vmul.f32 %v12436_v0, %v12945_v63  ;;  %v12329_v47 = vpop.permute.xlu0 %12328 }
 0x3e5   :  { %11438 = vmatmul.mubr.msk.f32.vlgmr.msra.gmra.mrb[12].mxu0 %vm178_vm2, %v888_v1  ;;  %v12331_v49 = vunpack.i.h.bf16 %v12329_v47  ;;  %v12330_v50 = vunpack.i.l.bf16 %v12329_v47  ;;  %v1760_v47 = vld [vmem:[%s14656_s5] sm:$0xff] }
 0x3e6   :  { %11433 = vmatmul.mubr.msk.f32.vlgmr.msra.gmra.mrb[16].mxu1 %vm178_vm2, %v886_v3 }
 0x3e7   :  { %v12438_v41 = vpop.eup %12437  ;;  %11441 = vmatpush3.msra.mxu1 %v1424_v40  ;;  %11442 = vmatprep.mubr.msk.f32.mxu1 %vm12644_vm1, %v12641_v15  ;;  %v12116_v48 = vpack.c.bf16 %v12331_v49, %v12330_v50  ;;  %v1761_v49 = vld [vmem:[%s14656_s5 + $0x8] sm:$0xff]  ;;  %v1762_v50 = vld [vmem:[%s14656_s5 + $0x10] sm:$0xff] }
 0x3e8   :  { %v890_v42 = vmul.f32 %v12438_v41, %v12951_v9  ;;  %v12132_v51 = vpack.c.bf16 %v1761_v49, %v1760_v47  ;;  %v12136_v53 = vpack.c.bf16 %v1763_v52, %v1762_v50  ;;  %v13090_v49 = vld [vmem:[%s14652_s4 + $0x40] sm:$0xff]  ;;  %v13095_v50 = vld [vmem:[%s14652_s4 + $0x50] sm:$0xff] }
 0x3e9   :  { %12117 = vmatprep.subr.bf16.mxu0 %v12116_v48  ;;  %v13102_v52 = vld [vmem:[%s14652_s4 + $0x60] sm:$0xff] }
 0x3ea   :  { %11443 = vmatmul.mubr.msk.f32.vlgmr.msra.gmra.mrb[18].mxu1 %vm178_vm2, %v890_v42  ;;  %12119 = vmatpush3.bf16.msra.mxu0 %v12116_v48  ;;  %v70_v42 = vld [vmem:[%s14652_s4 + $0x18] sm:$0xff]  ;;  %v1764_v48 = vld [vmem:[%s14656_s5 + $0x20] sm:$0xff] }
 0x3eb   :  { %12121 = vmatprep.subr.bf16.mxu0 %v12120_v54 }
 0x3ee   :  { %12123 = vmatpush3.bf16.msra.mxu0 %v12120_v54  ;;  %v1765_v54 = vld [vmem:[%s14656_s5 + $0x28] sm:$0xff] }
 0x3ef   :  { %12133 = vmatprep.subr.bf16.mxu0 %v12132_v51 }
 0x457   :  { %v1039_v43 = vpop.f32.mrb[12].mxu1 }
 0x458   :  { %v11414_v44 = vpop.f32.mrb[13].mxu1 }
 0x459   :  { %v72_v44 = vld [vmem:[%s14652_s4 + $0x28] sm:$0xff] }
 0x45b   :  { %v963_v45 = vpop.f32.mrb[6].mxu0 }
 0x45c   :  { %v11409_v46 = vpop.f32.mrb[7].mxu0 }
 0x4b0   :  { %v1115_v55 = vpop.f32.mrb[8].mxu0 }
 0x4b1   :  { %v11419_v56 = vpop.f32.mrb[9].mxu0  ;;  %1501 = vrot.lane.b32.xlu0 %v1115_v55, %s14672_s25  ;;  %v12140_v55 = vpack.c.bf16 %v1765_v54, %v1764_v48 }
 0x4b4   :  { %v1267_v57 = vpop.f32.mrb[10].mxu0 }
 0x4b5   :  { %v1191_v58 = vpop.f32.mrb[14].mxu1  ;;  %1509 = vrot.lane.b32.xlu0 %v1267_v57, %s14670_s26  ;;  %v11429_v59 = vpop.f32.mrb[11].mxu0 }
 0x4b6   :  { %1503 = vrot.lane.b32.xlu1 %v1191_v58, %s14672_s25  ;;  %v11424_v60 = vpop.f32.mrb[15].mxu1 }
 0x4b8   :  { %v1419_v61 = vpop.f32.mrb[12].mxu0 }
 0x4b9   :  { %v1343_v62 = vpop.f32.mrb[16].mxu1  ;;  %1517 = vrot.lane.b32.xlu0 %v1419_v61, %s14668_s27  ;;  %v11439_v63 = vpop.f32.mrb[13].mxu0 }
 0x4ba   :  { %1511 = vrot.lane.b32.xlu1 %v1343_v62, %s14670_s26  ;;  %v11434_v4 = vpop.f32.mrb[17].mxu1  ;;  %v13051_v62 = vsub.s32 4, %v12772_v10  ;;  %v13054_v63 = vsub.s32 5, %v12772_v10 }
 0x4bc   :  { %v1664_v4 = vrot.slane %v12780_v12, %v13051_v62 }
 0x4bd   :  { %v1495_v7 = vpop.f32.mrb[18].mxu1 }
 0x4be   :  { %1519 = vrot.lane.b32.xlu1 %v1495_v7, %s14668_s27  ;;  %v11444_v9 = vpop.f32.mrb[19].mxu1 }
 0x523   :  { %v1502_v13 = vpop.permute.xlu0 %1501 }
 0x524   :  { %v1523_v25 = vsel %vm178_vm2, %v963_v45, %v1502_v13  ;;  %v74_v45 = vld [vmem:[%s14652_s4 + $0x38] sm:$0xff]  ;;  %v1670_v13 = vrot.slane %v12780_v12, %v13054_v63 }
 0x525   :  { %v12128_v46 = vpack.c.bf16 %v74_v45, %v72_v44 }
 0x527   :  { %v1510_v14 = vpop.permute.xlu0 %1509 }
 0x528   :  { %v1504_v16 = vpop.permute.xlu1 %1503  ;;  %v1526_v26 = vsel %vm1525_vm5, %v1523_v25, %v1510_v14 }
 0x529   :  { %v1524_v30 = vsel %vm178_vm2, %v1039_v43, %v1504_v16 }
 0x52b   :  { %v1518_v27 = vpop.permute.xlu0 %1517 }
 0x52c   :  { %v1512_v28 = vpop.permute.xlu1 %1511  ;;  %v1529_v29 = vsel %vm1528_vm6, %v1526_v26, %v1518_v27 }
 0x52d   :  { %11453 = vmatprep.mubr.msk.f32.mxu0 %vm80_vm0, %v1529_v29  ;;  %v1527_v31 = vsel %vm1525_vm5, %v1524_v30, %v1512_v28  ;;  %v1766_v29 = vld [vmem:[%s14656_s5 + $0x30] sm:$0xff]  ;;  %v1767_v30 = vld [vmem:[%s14656_s5 + $0x38] sm:$0xff] }
 0x530   :  { %v1520_v23 = vpop.permute.xlu1 %1519 }
 0x531   :  { %v1530_v24 = vsel %vm1528_vm6, %v1527_v31, %v1520_v23  ;;  %v12144_v31 = vpack.c.bf16 %v1767_v30, %v1766_v29  ;;  %v13070_v23 = vsub.s32 2, %v12772_v10 }
 0x532   :  { %11454 = vmatmul.mubr.msk.f32.vlgmr.msra.gmra.mrb[14].mxu0 %vm80_vm0, %v1530_v24 }
 0x533   :  { %12135 = vmatpush3.bf16.msra.mxu0 %v12132_v51  ;;  %v1676_v24 = vrot.slane %v12780_v12, %v13070_v23  ;;  %v12148_v51 = vpack.c.bf16 %v13095_v50, %v13090_v49 }
 0x534   :  { %12137 = vmatprep.subr.bf16.mxu0 %v12136_v53 }
 0x537   :  { %12139 = vmatpush3.bf16.msra.mxu0 %v12136_v53  ;;  %v13107_v53 = vld [vmem:[%s14652_s4 + $0x70] sm:$0xff] }
 0x538   :  { %12141 = vmatprep.subr.bf16.mxu0 %v12140_v55  ;;  %v12152_v48 = vpack.c.bf16 %v13107_v53, %v13102_v52 }
 0x53b   :  { %12143 = vmatpush3.bf16.msra.mxu0 %v12140_v55 }
 0x53c   :  { %12145 = vmatprep.subr.bf16.mxu0 %v12144_v31 }
 0x53f   :  { %12147 = vmatpush3.bf16.msra.mxu0 %v12144_v31 }
 0x540   :  { %11507 = vmatprep.subr.mxu0 %v12641_v15 }
 0x605   :  { %v11455_v17 = vpop.f32.mrb[14].mxu0 }
 0x606   :  { %v1629_v35 = vadd.f32 %v11455_v17, %v1534_v34  ;;  %v1623_v20 = vpop.f32.mrb[15].mxu0 }
 0x607   :  { %v1624_v22 = vadd.f32 %v1623_v20, %v1534_v34 }
 0x608   :  { %v1633_v18 = vadd.f32 %v1629_v35, %v12768_v8 }
 0x609   :  { %v1632_v21 = vadd.f32 %v1624_v22, %v12759_v6  ;;  %v68_v6 = vld [vmem:[%s14652_s4 + $0x8] sm:$0xff] }
 0x60a   :  { %v1637_v19 = vsel %vm80_vm0, %v1633_v18, 0.0  ;;  %v12124_v43 = vpack.c.bf16 %v70_v42, %v68_v6 }
 0x60b   :  { %1638 = vadd.xlane.f32.xlu1 %v1637_v19  ;;  %v1634_v36 = vsel %vm80_vm0, %v1632_v21, 0.0 }
 0x60c   :  { %1635 = vadd.xlane.f32.xlu0 %v1634_v36  ;;  %12125 = vmatprep.subr.bf16.mxu1 %v12124_v43 }
 0x60d   :  { %12127 = vmatpush3.bf16.msra.mxu1 %v12124_v43 }
 0x60e   :  { %12129 = vmatprep.subr.bf16.mxu1 %v12128_v46 }
 0x611   :  { %12131 = vmatpush3.bf16.msra.mxu1 %v12128_v46 }
 0x612   :  { %12149 = vmatprep.subr.bf16.mxu1 %v12148_v51 }
 0x698   :  { %v1639_v39 = vpop.xlane.xlu1 %1638 }
 0x699   :  { %v1642_v2 = vmul.f32 0.03125, %v1639_v39  ;;  %v1636_v5 = vpop.xlane.xlu0 %1635 }
 0x69a   :  { %v1641_v38 = vmul.f32 0.03125, %v1636_v5 }
 0x69b   :  { %v1644_v0 = vsub.f32 %v1633_v18, %v1642_v2 }
 0x69c   :  { %v1643_v1 = vsub.f32 %v1632_v21, %v1641_v38  ;;  %v13079_v21 = vsub.s32 3, %v12772_v10 }
 0x69d   :  { %v1646_v41 = vmul.f32 %v1644_v0, %v1644_v0 }
 0x69e   :  { %v1645_v3 = vmul.f32 %v1643_v1, %v1643_v1  ;;  %v1771_v19 = vrot.slane %v12780_v12, %v13079_v21 }
 0x69f   :  { %v1650_v8 = vsel %vm80_vm0, %v1646_v41, 0.0 }
 0x6a0   :  { %v1647_v40 = vsel %vm80_vm0, %v1645_v3, 0.0 }
 0x6a1   :  { %1648 = vadd.xlane.f32.xlu0 %v1647_v40 }
 0x6a5   :  { %1651 = vadd.xlane.f32.xlu0 %v1650_v8 }
 0x72e   :  { %v1649_v56 = vpop.xlane.xlu0 %1648 }
 0x72f   :  { %v1653_v57 = vmul.f32 0.03125, %v1649_v56 }
 0x731   :  { %v1655_v58 = vadd.f32 1e-05, %v1653_v57 }
 0x732   :  { %v1652_v59 = vpop.xlane.xlu0 %1651 }
 0x733   :  { %12439 = vrsqrt.f32 %v1655_v58  ;;  %v1654_v60 = vmul.f32 0.03125, %v1652_v59 }
 0x735   :  { %v1656_v61 = vadd.f32 1e-05, %v1654_v60  ;;  %v13113_v60 = vsub.s32 6, %v12772_v10 }
 0x737   :  { %12441 = vrsqrt.f32 %v1656_v61  ;;  %v13116_v61 = vsub.s32 7, %v12772_v10  ;;  %v13135_v10 = vld [vmem:[%s14654_s6 + $0x8] sm:$0xff]  ;;  %s14674_s6 = smov 16  }
 0x73d   :  { %v12440_v7 = vpop.eup %12439 }
 0x73e   :  { %v1659_v9 = vmul.f32 %v12440_v7, %v1643_v1 }
 0x740   :  { %v1665_v14 = vmul.f32 %v1664_v4, %v1659_v9 }
 0x741   :  { %v12442_v16 = vpop.eup %12441 }
 0x742   :  { %v1660_v25 = vmul.f32 %v12442_v16, %v1644_v0  ;;  %v1671_v26 = vadd.f32 %v1670_v13, %v1665_v14  ;;  %v1891_v16 = vrot.slane %v12780_v12, %v13116_v61 }
 0x744   :  { %v1666_v27 = vmul.f32 %v1664_v4, %v1660_v25  ;;  %11464 = vmatprep.mubr.msk.f32.mxu1 %vm80_vm0, %v1671_v26  ;;  %v1885_v4 = vrot.slane %v12780_v12, %v13113_v60  ;;  %v1908_v12 = vrot.slane %v13135_v10, %v12775_v11 }
 0x746   :  { %v1672_v28 = vadd.f32 %v1670_v13, %v1666_v27 }
 0x748   :  { %11465 = vmatmul.mubr.msk.f32.vlgmr.msra.gmra.mrb[20].mxu1 %vm80_vm0, %v1672_v28 }
 0x749   :  { %12151 = vmatpush3.bf16.msra.mxu1 %v12148_v51 }
 0x74a   :  { %12153 = vmatprep.subr.bf16.mxu1 %v12152_v48 }
 0x74d   :  { %12155 = vmatpush3.bf16.msra.mxu1 %v12152_v48 }
 0x74e   :  { %11497 = vmatprep.subr.mxu1 %v12641_v15 }
 0x81b   :  { %v11466_v34 = vpop.f32.mrb[20].mxu1 }
 0x81c   :  { %v1755_v17 = vadd.f32 %v11466_v34, %v1676_v24  ;;  %v1749_v35 = vpop.f32.mrb[21].mxu1 }
 0x81d   :  { %v1750_v20 = vadd.f32 %v1749_v35, %v1676_v24 }
 0x81e   :  { %v1759_v18 = vmax.f32 %v1755_v17, 0.0 }
 0x81f   :  { %v1758_v22 = vmax.f32 %v1750_v20, 0.0 }
 0x821   :  { %11483 = vmatprep.mubr.msk.f32.mxu0 %vm1772_vm7, %v1758_v22 }
 0x822   :  { %11484 = vmatmul.mubr.msk.f32.vlgmr.msra.gmra.mrb[16].mxu0 %vm1772_vm7, %v1759_v18 }
 0x823   :  { %11509 = vmatprep.mubr.msk.f32.mxu0 %vm12644_vm1, %v12641_v15 }
 0x8f5   :  { %v11485_v36 = vpop.f32.mrb[16].mxu0 }
 0x8f6   :  { %v1851_v39 = vadd.f32 %v11485_v36, %v1771_v19  ;;  %v1845_v2 = vpop.f32.mrb[17].mxu0 }
 0x8f7   :  { %v1846_v5 = vadd.f32 %v1845_v2, %v1771_v19 }
 0x8f8   :  { %v1855_v38 = vadd.f32 %v1851_v39, %v1672_v28 }
 0x8f9   :  { %v1854_v0 = vadd.f32 %v1846_v5, %v1671_v26 }
 0x8fa   :  { %v1859_v1 = vsel %vm80_vm0, %v1855_v38, 0.0 }
 0x8fb   :  { %1860 = vadd.xlane.f32.xlu0 %v1859_v1  ;;  %v1856_v3 = vsel %vm80_vm0, %v1854_v0, 0.0 }
 0x8fc   :  { %1857 = vadd.xlane.f32.xlu1 %v1856_v3 }
 0x988   :  { %v1861_v40 = vpop.xlane.xlu0 %1860 }
 0x989   :  { %v1863_v41 = vmul.f32 0.03125, %v1861_v40  ;;  %v1858_v8 = vpop.xlane.xlu1 %1857 }
 0x98a   :  { %v1862_v6 = vmul.f32 0.03125, %v1858_v8 }
 0x98b   :  { %v1865_v42 = vsub.f32 %v1855_v38, %v1863_v41 }
 0x98c   :  { %v1864_v43 = vsub.f32 %v1854_v0, %v1862_v6 }
 0x98d   :  { %v1867_v44 = vmul.f32 %v1865_v42, %v1865_v42 }
 0x98e   :  { %v1866_v45 = vmul.f32 %v1864_v43, %v1864_v43 }
 0x98f   :  { %v1871_v46 = vsel %vm80_vm0, %v1867_v44, 0.0 }
 0x990   :  { %1872 = vadd.xlane.f32.xlu0 %v1871_v46  ;;  %v1868_v47 = vsel %vm80_vm0, %v1866_v45, 0.0 }
 0x991   :  { %1869 = vadd.xlane.f32.xlu1 %v1868_v47 }
 0xa1d   :  { %v1873_v54 = vpop.xlane.xlu0 %1872 }
 0xa1e   :  { %v1875_v55 = vmul.f32 0.03125, %v1873_v54  ;;  %v1870_v56 = vpop.xlane.xlu1 %1869 }
 0xa1f   :  { %v1874_v57 = vmul.f32 0.03125, %v1870_v56 }
 0xa20   :  { %v1877_v58 = vadd.f32 1e-05, %v1875_v55 }
 0xa21   :  { %v1876_v59 = vadd.f32 1e-05, %v1874_v57 }
 0xa22   :  { %12443 = vrsqrt.f32 %v1877_v58 }
 0xa23   :  { %12445 = vrsqrt.f32 %v1876_v59 }
 0xa2c   :  { %v12444_v7 = vpop.eup %12443 }
 0xa2d   :  { %v12446_v9 = vpop.eup %12445  ;;  %v1881_v13 = vmul.f32 %v12444_v7, %v1865_v42 }
 0xa2e   :  { %v1880_v14 = vmul.f32 %v12446_v9, %v1864_v43 }
 0xa2f   :  { %v1887_v25 = vmul.f32 %v1885_v4, %v1881_v13 }
 0xa30   :  { %v1886_v26 = vmul.f32 %v1885_v4, %v1880_v14 }
 0xa31   :  { %v13124_v28 = vadd.f32 %v1891_v16, %v1887_v25 }
 0xa32   :  { %v13122_v27 = vadd.f32 %v1891_v16, %v1886_v26 }
 0xa34   :  { %11494 = vmatprep.mubr.msk.f32.mxu1 %vm80_vm0, %v13122_v27 }
 0xa35   :  { %11495 = vmatmul.mubr.msk.f32.vlgmr.msra.gmra.mrb[22].mxu1 %vm80_vm0, %v13124_v28 }
 0xa36   :  { %11499 = vmatprep.mubr.msk.f32.mxu1 %vm12644_vm1, %v12641_v15 }
 0xb08   :  { %v11496_v29 = vpop.f32.mrb[22].mxu1 }
 0xb09   :  { %v13139_v30 = vadd.f32 %v11496_v29, %v1908_v12  ;;  %v1981_v31 = vpop.f32.mrb[23].mxu1 }
 0xb0a   :  { %v13141_v24 = vadd.f32 %v1981_v31, %v1908_v12 }
 0xb0b   :  { %1994 = vrot.lane.b32.xlu0 %v13139_v30, %s12643_s17 }
 0xb0c   :  { %1992 = vrot.lane.b32.xlu1 %v13141_v24, %s12643_s17 }
 0xb0f   :  { %2000 = vrot.lane.b32.xlu0 %v13141_v24, %s12645_s18 }
 0xb10   :  { %1996 = vrot.lane.b32.xlu1 %v13141_v24, %s12642_s0 }
 0xb13   :  { %2004 = vrot.lane.b32.xlu0 %v13141_v24, %s12646_s19 }
 0xb14   :  { %1998 = vrot.lane.b32.xlu1 %v13139_v30, %s12642_s0 }
 0xb18   :  { %2002 = vrot.lane.b32.xlu1 %v13139_v30, %s12645_s18 }
 0xb1c   :  { %2080 = vrot.lane.b32.xlu1 %v13139_v30, %s12646_s19 }
 0xb7d   :  { %v13159_v34 = vpop.permute.xlu0 %1994 }
 0xb7e   :  { %2232 = vrot.lane.b32.xlu1 %v13159_v34, %s12646_s19  ;;  %v13163_v17 = vpop.permute.xlu1 %1992 }
 0xb7f   :  { %2156 = vrot.lane.b32.xlu0 %v13163_v17, %s12646_s19 }
 0xb81   :  { %v13167_v35 = vpop.permute.xlu0 %2000 }
 0xb82   :  { %v13169_v20 = vpop.permute.xlu1 %1996 }
 0xb83   :  { %2308 = vrot.lane.b32.xlu0 %v13169_v20, %s12646_s19 }
 0xb85   :  { %v2005_v22 = vpop.permute.xlu0 %2004 }
 0xb86   :  { %11498 = vmatpush3.xpose.msk.msra.mxu1 %vm178_vm2, %v2005_v22  ;;  %v13174_v18 = vpop.permute.xlu1 %1998 }
 0xb87   :  { %2460 = vrot.lane.b32.xlu0 %v13167_v35, %s12646_s19  ;;  %2384 = vrot.lane.b32.xlu1 %v13174_v18, %s12646_s19 }
 0xb88   :  { %11502 = vmatprep.subr.mxu1 %v12641_v15 }
 0xb89   :  { %11500 = vmatmul.mubr.msk.f32.vlgmr.msra.gmra.mrb[24].mxu1 %vm178_vm2, %v13141_v24 }
 0xb8a   :  { %v13183_v19 = vpop.permute.xlu1 %2002  ;;  %11504 = vmatprep.mubr.msk.f32.mxu1 %vm12644_vm1, %v12641_v15 }
 0xb8b   :  { %2536 = vrot.lane.b32.xlu1 %v13183_v19, %s12646_s19 }
 0xb8e   :  { %v2081_v36 = vpop.permute.xlu1 %2080 }
 0xb8f   :  { %11503 = vmatpush3.xpose.msk.msra.mxu1 %vm178_vm2, %v2081_v36 }
 0xb90   :  { %11512 = vmatprep.subr.mxu1 %v12641_v15 }
 0xb92   :  { %11505 = vmatmul.mubr.msk.f32.vlgmr.msra.gmra.mrb[26].mxu1 %vm178_vm2, %v13139_v30 }
 0xb93   :  { %11514 = vmatprep.mubr.msk.f32.mxu1 %vm12644_vm1, %v12641_v15 }
 0xbf0   :  { %v2233_v39 = vpop.permute.xlu1 %2232 }
 0xbf1   :  { %v2157_v2 = vpop.permute.xlu0 %2156  ;;  %11513 = vmatpush3.xpose.msk.msra.mxu1 %vm178_vm2, %v2233_v39 }
 0xbf2   :  { %11508 = vmatpush3.xpose.msk.msra.mxu0 %vm178_vm2, %v2157_v2  ;;  %11522 = vmatprep.subr.mxu1 %v12641_v15 }
 0xbf3   :  { %11517 = vmatprep.subr.mxu0 %v12641_v15 }
 0xbf4   :  { %11515 = vmatmul.mubr.msk.f32.vlgmr.msra.gmra.mrb[28].mxu1 %vm178_vm2, %v13159_v34 }
 0xbf5   :  { %11510 = vmatmul.mubr.msk.f32.vlgmr.msra.gmra.mrb[18].mxu0 %vm178_vm2, %v13163_v17  ;;  %v2309_v5 = vpop.permute.xlu0 %2308  ;;  %11524 = vmatprep.mubr.msk.f32.mxu1 %vm12644_vm1, %v12641_v15 }
 0xbf6   :  { %11518 = vmatpush3.xpose.msk.msra.mxu0 %vm178_vm2, %v2309_v5  ;;  %11519 = vmatprep.mubr.msk.f32.mxu0 %vm12644_vm1, %v12641_v15 }
 0xbf7   :  { %11527 = vmatprep.subr.mxu0 %v12641_v15 }
 0xbf9   :  { %11520 = vmatmul.mubr.msk.f32.vlgmr.msra.gmra.mrb[20].mxu0 %vm178_vm2, %v13169_v20  ;;  %v2461_v38 = vpop.permute.xlu0 %2460  ;;  %v2385_v0 = vpop.permute.xlu1 %2384 }
 0xbfa   :  { %11523 = vmatpush3.xpose.msk.msra.mxu1 %vm178_vm2, %v2385_v0  ;;  %11528 = vmatpush3.xpose.msk.msra.mxu0 %vm178_vm2, %v2461_v38 }
 0xbfb   :  { %11529 = vmatprep.mubr.msk.f32.mxu0 %vm12644_vm1, %v12641_v15  ;;  %11532 = vmatprep.subr.mxu1 %v12641_v15 }
 0xbfc   :  { %11537 = vmatprep.subr.mxu0 %v12641_v15 }
 0xbfd   :  { %11525 = vmatmul.mubr.msk.f32.vlgmr.msra.gmra.mrb[30].mxu1 %vm178_vm2, %v13174_v18  ;;  %11530 = vmatmul.mubr.msk.f32.vlgmr.msra.gmra.mrb[22].mxu0 %vm178_vm2, %v13167_v35  ;;  %v2537_v1 = vpop.permute.xlu1 %2536 }
 0xbfe   :  { %11533 = vmatpush3.xpose.msk.msra.mxu1 %vm178_vm2, %v2537_v1  ;;  %11534 = vmatprep.mubr.msk.f32.mxu1 %vm12644_vm1, %v12641_v15 }
 0xbff   :  { %11542 = vmatprep.subr.mxu1 %v12641_v15  ;;  %11539 = vmatprep.mubr.msk.f32.mxu0 %vm12644_vm1, %v12641_v15 }
 0xc01   :  { %11535 = vmatmul.mubr.msk.f32.vlgmr.msra.gmra.mrb[32].mxu1 %vm178_vm2, %v13183_v19 }
 0xc02   :  { %11544 = vmatprep.mubr.msk.f32.mxu1 %vm12644_vm1, %v12641_v15 }
 0xc5c   :  { %v2076_v3 = vpop.f32.mrb[24].mxu1 }
 0xc5d   :  { %v2612_v40 = vmul.f32 0.35355338, %v2076_v3  ;;  %v11501_v41 = vpop.f32.mrb[25].mxu1 }
 0xc5f   :  { %v2620_v8 = vsel %vm793_vm3, %v2612_v40, -1e+10 }
 0xc60   :  { %v2628_v6 = vsel %vm178_vm2, %v2620_v8, -inf }
 0xc61   :  { %2629 = vmax.xlane.f32.xlu0 %v2628_v6 }
 0xc65   :  { %v2152_v42 = vpop.f32.mrb[26].mxu1 }
 0xc66   :  { %v2613_v43 = vmul.f32 0.35355338, %v2152_v42  ;;  %v11506_v44 = vpop.f32.mrb[27].mxu1 }
 0xc68   :  { %v2621_v45 = vsel %vm794_vm4, %v2613_v43, -1e+10 }
 0xc69   :  { %v2631_v46 = vsel %vm178_vm2, %v2621_v45, -inf }
 0xc6a   :  { %2632 = vmax.xlane.f32.xlu1 %v2631_v46 }
 0xcc7   :  { %v2304_v47 = vpop.f32.mrb[28].mxu1 }
 0xcc8   :  { %v2228_v51 = vpop.f32.mrb[18].mxu0  ;;  %v11516_v48 = vpop.f32.mrb[29].mxu1  ;;  %v2615_v54 = vmul.f32 0.35355338, %v2304_v47 }
 0xcc9   :  { %v2614_v55 = vmul.f32 0.35355338, %v2228_v51  ;;  %v11511_v56 = vpop.f32.mrb[19].mxu0 }
 0xcca   :  { %v2623_v9 = vsel %vm794_vm4, %v2615_v54, -1e+10 }
 0xccb   :  { %v2622_v57 = vsel %vm793_vm3, %v2614_v55, -1e+10  ;;  %v2637_v26 = vsel %vm178_vm2, %v2623_v9, -inf }
 0xccc   :  { %v2380_v58 = vpop.f32.mrb[20].mxu0  ;;  %v2634_v59 = vsel %vm178_vm2, %v2622_v57, -inf }
 0xccd   :  { %v2616_v4 = vmul.f32 0.35355338, %v2380_v58  ;;  %2635 = vmax.xlane.f32.xlu0 %v2634_v59  ;;  %v11521_v7 = vpop.f32.mrb[21].mxu0 }
 0xccf   :  { %v2624_v13 = vsel %vm793_vm3, %v2616_v4, -1e+10 }
 0xcd0   :  { %v2456_v14 = vpop.f32.mrb[30].mxu1  ;;  %v2532_v16 = vpop.f32.mrb[22].mxu0  ;;  %v2640_v25 = vsel %vm178_vm2, %v2624_v13, -inf }
 0xcd1   :  { %v2617_v12 = vmul.f32 0.35355338, %v2456_v14  ;;  %v2618_v29 = vmul.f32 0.35355338, %v2532_v16  ;;  %v11531_v31 = vpop.f32.mrb[23].mxu0  ;;  %2641 = vmax.xlane.f32.xlu1 %v2640_v25  ;;  %2638 = vmax.xlane.f32.xlu0 %v2637_v26  ;;  %v11526_v22 = vpop.f32.mrb[31].mxu1 }
 0xcd3   :  { %v2626_v36 = vsel %vm793_vm3, %v2618_v29, -1e+10  ;;  %v2625_v39 = vsel %vm794_vm4, %v2617_v12, -1e+10 }
 0xcd4   :  { %v2608_v2 = vpop.f32.mrb[32].mxu1  ;;  %v2646_v5 = vsel %vm178_vm2, %v2626_v36, -inf  ;;  %v2643_v38 = vsel %vm178_vm2, %v2625_v39, -inf }
 0xcd5   :  { %v2619_v0 = vmul.f32 0.35355338, %v2608_v2  ;;  %2647 = vmax.xlane.f32.xlu1 %v2646_v5  ;;  %2644 = vmax.xlane.f32.xlu0 %v2643_v38  ;;  %v11536_v1 = vpop.f32.mrb[33].mxu1 }
 0xcd7   :  { %v2627_v3 = vsel %vm794_vm4, %v2619_v0, -1e+10 }
 0xcd8   :  { %v2649_v40 = vsel %vm178_vm2, %v2627_v3, -inf }
 0xcd9   :  { %2650 = vmax.xlane.f32.xlu0 %v2649_v40 }
 0xce6   :  { %2716 = vrot.lane.b32.xlu1 %v13141_v24, %s12647_s2 }
 0xcea   :  { %2868 = vrot.lane.b32.xlu1 %v13163_v17, %s12647_s2 }
 0xcee   :  { %2944 = vrot.lane.b32.xlu1 %v13159_v34, %s12647_s2  ;;  %v2630_v42 = vpop.xlane.xlu0 %2629 }
 0xcef   :  { %2792 = vrot.lane.b32.xlu0 %v13139_v30, %s12647_s2  ;;  %v2652_v43 = vsub.f32 %v2620_v8, %v2630_v42 }
 0xcf1   :  { %v2660_v44 = vmul.f32 1.442695, %v2652_v43 }
 0xcf2   :  { %3096 = vrot.lane.b32.xlu1 %v13174_v18, %s12647_s2 }
 0xcf3   :  { %3020 = vrot.lane.b32.xlu0 %v13169_v20, %s12647_s2 }
 0xcf7   :  { %v2633_v41 = vpop.xlane.xlu1 %2632 }
 0xcf8   :  { %v2653_v6 = vsub.f32 %v2621_v45, %v2633_v41 }
 0xcfa   :  { %v2662_v24 = vmul.f32 1.442695, %v2653_v6 }
 0xcfc   :  { %12447 = vpow2.f32 %v2662_v24 }
 0xcfd   :  { %12449 = vpow2.f32 %v2660_v44 }
 0xd06   :  { %v13267_v17 = vpop.eup %12447 }
 0xd07   :  { %v2679_v34 = vsel %vm178_vm2, %v13267_v17, 0.0  ;;  %v13271_v30 = vpop.eup %12449 }
 0xd08   :  { %v2676_v18 = vsel %vm178_vm2, %v13271_v30, 0.0 }
 0xd12   :  { %2680 = vadd.xlane.f32.xlu0 %v2679_v34 }
 0xd16   :  { %2677 = vadd.xlane.f32.xlu1 %v2676_v18 }
 0xd5a   :  { %v2636_v20 = vpop.xlane.xlu0 %2635 }
 0xd5b   :  { %v2654_v45 = vsub.f32 %v2622_v57, %v2636_v20 }
 0xd5d   :  { %v2664_v46 = vmul.f32 1.442695, %v2654_v45 }
 0xd5e   :  { %v2639_v8 = vpop.xlane.xlu0 %2638  ;;  %v2642_v47 = vpop.xlane.xlu1 %2641 }
 0xd5f   :  { %12451 = vpow2.f32 %v2664_v46  ;;  %v2655_v51 = vsub.f32 %v2623_v9, %v2639_v8  ;;  %v2656_v48 = vsub.f32 %v2624_v13, %v2642_v47  ;;  %v12337_v47 = vpack.i.bf16 %v13095_v50, %v13090_v49 }
 0xd61   :  { %v2666_v54 = vmul.f32 1.442695, %v2655_v51  ;;  %v2668_v55 = vmul.f32 1.442695, %v2656_v48  ;;  %v12342_v51 = vpack.i.bf16 %v13107_v53, %v13102_v52 }
 0xd62   :  { %v2645_v56 = vpop.xlane.xlu0 %2644  ;;  %v2648_v58 = vpop.xlane.xlu1 %2647 }
 0xd63   :  { %12453 = vpow2.f32 %v2666_v54  ;;  %v2657_v59 = vsub.f32 %v2625_v39, %v2645_v56  ;;  %v2658_v4 = vsub.f32 %v2626_v36, %v2648_v58 }
 0xd64   :  { %12455 = vpow2.f32 %v2668_v55 }
 0xd65   :  { %v2670_v7 = vmul.f32 1.442695, %v2657_v59  ;;  %v2672_v14 = vmul.f32 1.442695, %v2658_v4 }
 0xd66   :  { %v2651_v16 = vpop.xlane.xlu0 %2650  ;;  %v2717_v25 = vpop.permute.xlu1 %2716 }
 0xd67   :  { %12457 = vpow2.f32 %v2670_v7  ;;  %v2659_v57 = vsub.f32 %v2627_v3, %v2651_v16  ;;  %11538 = vmatpush3.msra.mxu0 %v2717_v25 }
 0xd68   :  { %12459 = vpow2.f32 %v2672_v14  ;;  %11547 = vmatprep.subr.mxu0 %v12641_v15 }
 0xd69   :  { %v12452_v9 = vpop.eup %12451  ;;  %v2674_v13 = vmul.f32 1.442695, %v2659_v57 }
 0xd6a   :  { %v2793_v26 = vpop.permute.xlu0 %2792  ;;  %v2682_v12 = vsel %vm178_vm2, %v12452_v9, 0.0  ;;  %v2869_v3 = vpop.permute.xlu1 %2868 }
 0xd6b   :  { %12461 = vpow2.f32 %v2674_v13  ;;  %2683 = vadd.xlane.f32.xlu1 %v2682_v12  ;;  %11543 = vmatpush3.msra.mxu1 %v2793_v26 }
 0xd6c   :  { %11552 = vmatprep.subr.mxu1 %v12641_v15 }
 0xd6d   :  { %v12454_v29 = vpop.eup %12453 }
 0xd6e   :  { %v12456_v31 = vpop.eup %12455  ;;  %v2685_v22 = vsel %vm178_vm2, %v12454_v29, 0.0  ;;  %v2945_v40 = vpop.permute.xlu1 %2944 }
 0xd6f   :  { %2686 = vadd.xlane.f32.xlu0 %v2685_v22  ;;  %v2688_v36 = vsel %vm178_vm2, %v12456_v31, 0.0  ;;  %v3021_v41 = vpop.permute.xlu0 %3020 }
 0xd70   :  { %2689 = vadd.xlane.f32.xlu1 %v2688_v36 }
 0xd71   :  { %v13280_v39 = vpop.eup %12457 }
 0xd72   :  { %v13282_v2 = vpop.eup %12459  ;;  %v2691_v5 = vsel %vm178_vm2, %v13280_v39, 0.0  ;;  %v3097_v6 = vpop.permute.xlu1 %3096 }
 0xd73   :  { %2692 = vadd.xlane.f32.xlu0 %v2691_v5  ;;  %v2694_v38 = vsel %vm178_vm2, %v13282_v2, 0.0 }
 0xd74   :  { %2695 = vadd.xlane.f32.xlu1 %v2694_v38 }
 0xd75   :  { %v13288_v0 = vpop.eup %12461 }
 0xd76   :  { %v2697_v1 = vsel %vm178_vm2, %v13288_v0, 0.0 }
 0xd77   :  { %2698 = vadd.xlane.f32.xlu0 %v2697_v1 }
 0xd85   :  { %3248 = vrot.lane.b32.xlu1 %v13183_v19, %s12647_s2 }
 0xd89   :  { %12343 = vrot.lane.b32.xlu1 %v12342_v51, %s12648_s24 }
 0xd8d   :  { %3172 = vrot.lane.b32.xlu0 %v13167_v35, %s12647_s2 }
 0xd91   :  { %12338 = vrot.lane.b32.xlu0 %v12337_v47, %s12648_s24  ;;  %v3357_v47 = vrot.slane %v13135_v10, %v13010_v32 }
 0xd9f   :  { %v2681_v42 = vpop.xlane.xlu0 %2680 }
 0xda0   :  { %12463 = vrcp.f32 %v2681_v42 }
 0xda3   :  { %v2678_v43 = vpop.xlane.xlu1 %2677 }
 0xda4   :  { %12465 = vrcp.f32 %v2678_v43 }
 0xdaa   :  { %v12464_v24 = vpop.eup %12463 }
 0xdab   :  { %v2703_v44 = vmul.f32 %v12464_v24, %v13267_v17 }
 0xdad   :  { %11545 = vmatmul.mubr.msk.f32.vlgmr.msra.gmra.mrb[34].mxu1 %vm178_vm2, %v2703_v44 }
 0xdae   :  { %v12466_v34 = vpop.eup %12465  ;;  %11553 = vmatpush3.msra.mxu1 %v2945_v40  ;;  %11554 = vmatprep.mubr.msk.f32.mxu1 %vm12644_vm1, %v12641_v15 }
 0xdaf   :  { %v2701_v35 = vmul.f32 %v12466_v34, %v13271_v30  ;;  %11562 = vmatprep.subr.mxu1 %v12641_v15 }
 0xdb1   :  { %11540 = vmatmul.mubr.msk.f32.vlgmr.msra.gmra.mrb[24].mxu0 %vm178_vm2, %v2701_v35 }
 0xdb2   :  { %11548 = vmatpush3.msra.mxu0 %v2869_v3  ;;  %11549 = vmatprep.mubr.msk.f32.mxu0 %vm12644_vm1, %v12641_v15 }
 0xdb3   :  { %11557 = vmatprep.subr.mxu0 %v12641_v15 }
 0xdf8   :  { %v2684_v19 = vpop.xlane.xlu1 %2683 }
 0xdf9   :  { %12467 = vrcp.f32 %v2684_v19 }
 0xdfc   :  { %v2687_v17 = vpop.xlane.xlu0 %2686 }
 0xdfd   :  { %12469 = vrcp.f32 %v2687_v17  ;;  %v2690_v18 = vpop.xlane.xlu1 %2689 }
 0xdfe   :  { %12471 = vrcp.f32 %v2690_v18 }
 0xe00   :  { %v2693_v20 = vpop.xlane.xlu0 %2692 }
 0xe01   :  { %12473 = vrcp.f32 %v2693_v20  ;;  %v2696_v45 = vpop.xlane.xlu1 %2695 }
 0xe02   :  { %12475 = vrcp.f32 %v2696_v45 }
 0xe03   :  { %v12468_v30 = vpop.eup %12467 }
 0xe04   :  { %v2699_v46 = vpop.xlane.xlu0 %2698  ;;  %v2705_v8 = vmul.f32 %v12468_v30, %v12452_v9 }
 0xe05   :  { %12477 = vrcp.f32 %v2699_v46  ;;  %v3249_v59 = vpop.permute.xlu1 %3248 }
 0xe06   :  { %11550 = vmatmul.mubr.msk.f32.vlgmr.msra.gmra.mrb[26].mxu0 %vm178_vm2, %v2705_v8 }
 0xe07   :  { %v12470_v48 = vpop.eup %12469  ;;  %11558 = vmatpush3.msra.mxu0 %v3021_v41  ;;  %11559 = vmatprep.mubr.msk.f32.mxu0 %vm12644_vm1, %v12641_v15 }
 0xe08   :  { %v12472_v54 = vpop.eup %12471  ;;  %11567 = vmatprep.subr.mxu0 %v12641_v15  ;;  %v2707_v55 = vmul.f32 %v12470_v48, %v12454_v29  ;;  %v3173_v56 = vpop.permute.xlu0 %3172 }
 0xe09   :  { %v2709_v58 = vmul.f32 %v12472_v54, %v12456_v31  ;;  %v12344_v12 = vpop.permute.xlu1 %12343 }
 0xe0a   :  { %11555 = vmatmul.mubr.msk.f32.vlgmr.msra.gmra.mrb[36].mxu1 %vm178_vm2, %v2707_v55  ;;  %v12346_v29 = vunpack.i.h.bf16 %v12344_v12  ;;  %v12345_v31 = vunpack.i.l.bf16 %v12344_v12  ;;  %v10828_v12 = vld [vmem:[%s14652_s4 + $0x78] sm:$0xff] }
 0xe0b   :  { %v12474_v49 = vpop.eup %12473  ;;  %11560 = vmatmul.mubr.msk.f32.vlgmr.msra.gmra.mrb[28].mxu0 %vm178_vm2, %v2709_v58  ;;  %11563 = vmatpush3.msra.mxu1 %v3097_v6 }
 0xe0c   :  { %v12476_v50 = vpop.eup %12475  ;;  %11568 = vmatpush3.msra.mxu0 %v3173_v56  ;;  %11564 = vmatprep.mubr.msk.f32.mxu1 %vm12644_vm1, %v12641_v15  ;;  %v2711_v52 = vmul.f32 %v12474_v49, %v13280_v39  ;;  %v12339_v9 = vpop.permute.xlu0 %12338  ;;  %v12160_v36 = vpack.c.bf16 %v12346_v29, %v12345_v31  ;;  %v10860_v31 = vld [vmem:[%s14656_s5 + $0x40] sm:$0xff] }
 0xe0d   :  { %11569 = vmatprep.mubr.msk.f32.mxu0 %vm12644_vm1, %v12641_v15  ;;  %11572 = vmatprep.subr.mxu1 %v12641_v15  ;;  %v2713_v53 = vmul.f32 %v12476_v50, %v13282_v2  ;;  %v12341_v13 = vunpack.i.h.bf16 %v12339_v9  ;;  %v12340_v26 = vunpack.i.l.bf16 %v12339_v9  ;;  %v10824_v9 = vld [vmem:[%s14652_s4 + $0x58] sm:$0xff] }
 0xe0e   :  { %11565 = vmatmul.mubr.msk.f32.vlgmr.msra.gmra.mrb[38].mxu1 %vm178_vm2, %v2711_v52 }
 0xe0f   :  { %v12478_v4 = vpop.eup %12477  ;;  %11570 = vmatmul.mubr.msk.f32.vlgmr.msra.gmra.mrb[30].mxu0 %vm178_vm2, %v2713_v53  ;;  %11573 = vmatpush3.msra.mxu1 %v3249_v59  ;;  %v12156_v22 = vpack.c.bf16 %v12341_v13, %v12340_v26  ;;  %v10826_v26 = vld [vmem:[%s14652_s4 + $0x68] sm:$0xff] }
 0xe10   :  { %11574 = vmatprep.mubr.msk.f32.mxu1 %vm12644_vm1, %v12641_v15  ;;  %v2715_v7 = vmul.f32 %v12478_v4, %v13288_v0  ;;  %v12168_v29 = vpack.c.bf16 %v10828_v12, %v10826_v26 }
 0xe11   :  { %12157 = vmatprep.subr.bf16.mxu0 %v12156_v22 }
 0xe12   :  { %11575 = vmatmul.mubr.msk.f32.vlgmr.msra.gmra.mrb[40].mxu1 %vm178_vm2, %v2715_v7  ;;  %12159 = vmatpush3.bf16.msra.mxu0 %v12156_v22  ;;  %v10861_v22 = vld [vmem:[%s14656_s5 + $0x48] sm:$0xff] }
 0xe13   :  { %12161 = vmatprep.subr.bf16.mxu0 %v12160_v36 }
 0xe16   :  { %12163 = vmatpush3.bf16.msra.mxu0 %v12160_v36  ;;  %v10862_v36 = vld [vmem:[%s14656_s5 + $0x50] sm:$0xff] }
 0xe80   :  { %v2864_v14 = vpop.f32.mrb[34].mxu1 }
 0xe81   :  { %v11546_v16 = vpop.f32.mrb[35].mxu1 }
 0xe84   :  { %v2788_v25 = vpop.f32.mrb[24].mxu0 }
 0xe85   :  { %v11541_v57 = vpop.f32.mrb[25].mxu0 }
 0xed9   :  { %v2940_v39 = vpop.f32.mrb[26].mxu0 }
 0xeda   :  { %3326 = vrot.lane.b32.xlu0 %v2940_v39, %s14672_s25  ;;  %v11551_v2 = vpop.f32.mrb[27].mxu0  ;;  %v12172_v39 = vpack.c.bf16 %v10861_v22, %v10860_v31 }
 0xedb   :  { %v10863_v2 = vld [vmem:[%s14656_s5 + $0x58] sm:$0xff] }
 0xedc   :  { %12173 = vmatprep.subr.bf16.mxu0 %v12172_v39 }
 0xedd   :  { %v3016_v5 = vpop.f32.mrb[36].mxu1 }
 0xede   :  { %v3092_v38 = vpop.f32.mrb[28].mxu0  ;;  %3328 = vrot.lane.b32.xlu1 %v3016_v5, %s14672_s25  ;;  %v11556_v0 = vpop.f32.mrb[37].mxu1  ;;  %v12176_v5 = vpack.c.bf16 %v10863_v2, %v10862_v36  ;;  %v3716_v36 = vld [vmem:[%s14657_s8] sm:$0xff] }
 0xedf   :  { %3334 = vrot.lane.b32.xlu0 %v3092_v38, %s14674_s6  ;;  %v11561_v1 = vpop.f32.mrb[29].mxu0  ;;  %v10864_v38 = vld [vmem:[%s14656_s5 + $0x60] sm:$0xff]  ;;  %v10865_v0 = vld [vmem:[%s14656_s5 + $0x68] sm:$0xff] }
 0xee0   :  { %v12180_v1 = vpack.c.bf16 %v10865_v0, %v10864_v38  ;;  %v3719_v38 = vld [vmem:[%s14657_s8 + $0x18] sm:$0xff] }
 0xee1   :  { %v3168_v3 = vpop.f32.mrb[38].mxu1 }
 0xee2   :  { %v3244_v40 = vpop.f32.mrb[30].mxu0  ;;  %3336 = vrot.lane.b32.xlu1 %v3168_v3, %s14674_s6  ;;  %v11566_v41 = vpop.f32.mrb[39].mxu1 }
 0xee3   :  { %3342 = vrot.lane.b32.xlu0 %v3244_v40, %s14675_s20  ;;  %v11571_v6 = vpop.f32.mrb[31].mxu0 }
 0xee5   :  { %v3320_v42 = vpop.f32.mrb[40].mxu1 }
 0xee6   :  { %3344 = vrot.lane.b32.xlu1 %v3320_v42, %s14675_s20  ;;  %v11576_v43 = vpop.f32.mrb[41].mxu1 }
 0xf4c   :  { %v3327_v24 = vpop.permute.xlu0 %3326 }
 0xf4d   :  { %v3348_v35 = vsel %vm178_vm2, %v2788_v25, %v3327_v24  ;;  %v3486_v24 = vrot.slane %v13135_v10, %v13051_v62 }
 0xf50   :  { %v3329_v44 = vpop.permute.xlu1 %3328 }
 0xf51   :  { %v3335_v34 = vpop.permute.xlu0 %3334  ;;  %v3349_v45 = vsel %vm178_vm2, %v2864_v14, %v3329_v44 }
 0xf52   :  { %v3350_v17 = vsel %vm1525_vm5, %v3348_v35, %v3335_v34  ;;  %v3492_v35 = vrot.slane %v13135_v10, %v13054_v63 }
 0xf54   :  { %v3337_v19 = vpop.permute.xlu1 %3336 }
 0xf55   :  { %v3343_v18 = vpop.permute.xlu0 %3342  ;;  %v3351_v30 = vsel %vm1525_vm5, %v3349_v45, %v3337_v19 }
 0xf56   :  { %v3352_v20 = vsel %vm1528_vm6, %v3350_v17, %v3343_v18 }
 0xf57   :  { %11585 = vmatprep.mubr.msk.f32.mxu0 %vm80_vm0, %v3352_v20 }
 0xf58   :  { %v3345_v46 = vpop.permute.xlu1 %3344 }
 0xf59   :  { %v3353_v8 = vsel %vm1528_vm6, %v3351_v30, %v3345_v46  ;;  %v10866_v46 = vld [vmem:[%s14656_s5 + $0x70] sm:$0xff] }
 0xf5a   :  { %11586 = vmatmul.mubr.msk.f32.vlgmr.msra.gmra.mrb[32].mxu0 %vm80_vm0, %v3353_v8  ;;  %v10867_v8 = vld [vmem:[%s14656_s5 + $0x78] sm:$0xff] }
 0xf5b   :  { %12175 = vmatpush3.bf16.msra.mxu0 %v12172_v39  ;;  %v3717_v39 = vld [vmem:[%s14657_s8 + $0x8] sm:$0xff] }
 0xf5c   :  { %12177 = vmatprep.subr.bf16.mxu0 %v12176_v5  ;;  %v12188_v2 = vpack.c.bf16 %v3717_v39, %v3716_v36 }
 0xf5f   :  { %12179 = vmatpush3.bf16.msra.mxu0 %v12176_v5  ;;  %v3718_v5 = vld [vmem:[%s14657_s8 + $0x10] sm:$0xff] }
 0xf60   :  { %12181 = vmatprep.subr.bf16.mxu0 %v12180_v1  ;;  %v12192_v0 = vpack.c.bf16 %v3719_v38, %v3718_v5  ;;  %v13583_v5 = vld [vmem:[%s14662_s3] sm:$0xff] }
 0xf61   :  { %vm4535_vm8 = vcmp.ne.f32.partialorder %v13583_v5, 0.0 }
 0xf63   :  { %12183 = vmatpush3.bf16.msra.mxu0 %v12180_v1  ;;  %v13423_v1 = vld [vmem:[%s14658_s7] sm:$0xff] }
0x102d   :  { %v11587_v51 = vpop.f32.mrb[32].mxu0 }
0x102e   :  { %v3452_v48 = vadd.f32 %v11587_v51, %v3357_v47  ;;  %v3446_v54 = vpop.f32.mrb[33].mxu0  ;;  %v3498_v51 = vrot.slane %v13135_v10, %v13070_v23 }
0x102f   :  { %v3447_v55 = vadd.f32 %v3446_v54, %v3357_v47  ;;  %v12184_v47 = vpack.c.bf16 %v10867_v8, %v10866_v46  ;;  %v3713_v8 = vrot.slane %v13135_v10, %v13116_v61 }
0x1030   :  { %v3456_v56 = vadd.f32 %v3452_v48, %v13124_v28 }
0x1031   :  { %v3455_v58 = vadd.f32 %v3447_v55, %v13122_v27  ;;  %v10822_v27 = vld [vmem:[%s14652_s4 + $0x48] sm:$0xff]  ;;  %12185 = vmatprep.subr.bf16.mxu0 %v12184_v47 }
0x1032   :  { %v3460_v49 = vsel %vm80_vm0, %v3456_v56, 0.0  ;;  %v12164_v13 = vpack.c.bf16 %v10824_v9, %v10822_v27  ;;  %12187 = vmatpush3.bf16.msra.mxu0 %v12184_v47 }
0x1033   :  { %3461 = vadd.xlane.f32.xlu1 %v3460_v49  ;;  %v3457_v50 = vsel %vm80_vm0, %v3455_v58, 0.0  ;;  %11640 = vmatprep.subr.mxu0 %v12641_v15 }
0x1034   :  { %3458 = vadd.xlane.f32.xlu0 %v3457_v50  ;;  %12165 = vmatprep.subr.bf16.mxu1 %v12164_v13  ;;  %v3594_v50 = vrot.slane %v13135_v10, %v13079_v21 }
0x1035   :  { %12167 = vmatpush3.bf16.msra.mxu1 %v12164_v13 }
0x1036   :  { %12169 = vmatprep.subr.bf16.mxu1 %v12168_v29 }
0x1039   :  { %12171 = vmatpush3.bf16.msra.mxu1 %v12168_v29 }
0x103a   :  { %12189 = vmatprep.subr.bf16.mxu1 %v12188_v2 }
0x10c0   :  { %v3462_v52 = vpop.xlane.xlu1 %3461 }
0x10c1   :  { %v3464_v53 = vmul.f32 0.03125, %v3462_v52  ;;  %v3459_v59 = vpop.xlane.xlu0 %3458 }
0x10c2   :  { %v3463_v4 = vmul.f32 0.03125, %v3459_v59 }
0x10c3   :  { %v3466_v7 = vsub.f32 %v3456_v56, %v3464_v53 }
0x10c4   :  { %v3465_v14 = vsub.f32 %v3455_v58, %v3463_v4 }
0x10c5   :  { %v3468_v57 = vmul.f32 %v3466_v7, %v3466_v7 }
0x10c6   :  { %v3467_v16 = vmul.f32 %v3465_v14, %v3465_v14 }
0x10c7   :  { %v3472_v28 = vsel %vm80_vm0, %v3468_v57, 0.0 }
0x10c8   :  { %v3469_v25 = vsel %vm80_vm0, %v3467_v16, 0.0 }
0x10c9   :  { %3470 = vadd.xlane.f32.xlu0 %v3469_v25 }
0x10cd   :  { %3473 = vadd.xlane.f32.xlu0 %v3472_v28 }
0x1156   :  { %v3471_v3 = vpop.xlane.xlu0 %3470 }
0x1157   :  { %v3475_v40 = vmul.f32 0.03125, %v3471_v3  ;;  %v13428_v3 = vld [vmem:[%s14658_s7 + $0x10] sm:$0xff] }
0x1159   :  { %v3477_v41 = vadd.f32 1e-05, %v3475_v40  ;;  %v12347_v40 = vpack.i.bf16 %v13428_v3, %v13423_v1 }
0x115a   :  { %v3474_v6 = vpop.xlane.xlu0 %3473 }
0x115b   :  { %12479 = vrsqrt.f32 %v3477_v41  ;;  %v3476_v42 = vmul.f32 0.03125, %v3474_v6  ;;  %v12196_v41 = vpack.c.bf16 %v13428_v3, %v13423_v1  ;;  %v13437_v6 = vld [vmem:[%s14658_s7 + $0x20] sm:$0xff] }
0x115d   :  { %v3478_v43 = vadd.f32 1e-05, %v3476_v42  ;;  %v13442_v42 = vld [vmem:[%s14658_s7 + $0x30] sm:$0xff] }
0x115f   :  { %12481 = vrsqrt.f32 %v3478_v43  ;;  %v12352_v43 = vpack.i.bf16 %v13442_v42, %v13437_v6 }
0x1165   :  { %v12480_v44 = vpop.eup %12479 }
0x1166   :  { %v3481_v34 = vmul.f32 %v12480_v44, %v3465_v14 }
0x1168   :  { %v3487_v19 = vmul.f32 %v3486_v24, %v3481_v34 }
0x1169   :  { %v12482_v17 = vpop.eup %12481 }
0x116a   :  { %v3482_v18 = vmul.f32 %v12482_v17, %v3466_v7  ;;  %v3493_v20 = vadd.f32 %v3492_v35, %v3487_v19 }
0x116c   :  { %v3488_v45 = vmul.f32 %v3486_v24, %v3482_v18  ;;  %11596 = vmatprep.mubr.msk.f32.mxu1 %vm80_vm0, %v3493_v20  ;;  %v3707_v18 = vrot.slane %v13135_v10, %v13113_v60  ;;  %v13464_v10 = vld [vmem:[%s14659_s1 + $0x8] sm:$0xff] }
0x116e   :  { %v3494_v30 = vadd.f32 %v3492_v35, %v3488_v45 }
0x1170   :  { %11597 = vmatmul.mubr.msk.f32.vlgmr.msra.gmra.mrb[42].mxu1 %vm80_vm0, %v3494_v30 }
0x1171   :  { %12191 = vmatpush3.bf16.msra.mxu1 %v12188_v2 }
0x1172   :  { %12193 = vmatprep.subr.bf16.mxu1 %v12192_v0 }
0x1175   :  { %12195 = vmatpush3.bf16.msra.mxu1 %v12192_v0 }
0x1176   :  { %12197 = vmatprep.subr.bf16.mxu1 %v12196_v41 }
0x1243   :  { %v11598_v48 = vpop.f32.mrb[42].mxu1 }
0x1244   :  { %v3577_v54 = vadd.f32 %v11598_v48, %v3498_v51  ;;  %v3571_v55 = vpop.f32.mrb[43].mxu1 }
0x1245   :  { %v3572_v56 = vadd.f32 %v3571_v55, %v3498_v51  ;;  %v12200_v55 = vpack.c.bf16 %v13442_v42, %v13437_v6 }
0x1246   :  { %v3581_v49 = vmax.f32 %v3577_v54, 0.0 }
0x1247   :  { %v3580_v58 = vmax.f32 %v3572_v56, 0.0  ;;  %v13455_v56 = vld [vmem:[%s14659_s1] sm:$0xff] }
0x1249   :  { %11615 = vmatprep.mubr.msk.f32.mxu0 %vm1772_vm7, %v3580_v58  ;;  %v13474_v58 = vld [vmem:[%s14660_s9] ss:$0 sm:$0xff] }
0x124a   :  { %11616 = vmatmul.mubr.msk.f32.vlgmr.msra.gmra.mrb[34].mxu0 %vm1772_vm7, %v3581_v49 }
0x124b   :  { %11642 = vmatprep.mubr.msk.f32.mxu0 %vm12644_vm1, %v12641_v15 }
0x131d   :  { %v11617_v52 = vpop.f32.mrb[34].mxu0 }
0x131e   :  { %v3673_v53 = vadd.f32 %v11617_v52, %v3594_v50  ;;  %v3667_v59 = vpop.f32.mrb[35].mxu0 }
0x131f   :  { %v3668_v4 = vadd.f32 %v3667_v59, %v3594_v50 }
0x1320   :  { %v3677_v7 = vadd.f32 %v3673_v53, %v3494_v30  ;;  %v13484_v53 = vld [vmem:[%s14661_s11] sm:$0xff] }
0x1321   :  { %v3676_v14 = vadd.f32 %v3668_v4, %v3493_v20  ;;  %v3823_v59 = vrot.slane %v13484_v53, %v12775_v11 }
0x1322   :  { %v3681_v16 = vsel %vm80_vm0, %v3677_v7, 0.0 }
0x1323   :  { %3682 = vadd.xlane.f32.xlu0 %v3681_v16  ;;  %v3678_v25 = vsel %vm80_vm0, %v3676_v14, 0.0 }
0x1324   :  { %3679 = vadd.xlane.f32.xlu1 %v3678_v25 }
0x13b0   :  { %v3683_v57 = vpop.xlane.xlu0 %3682 }
0x13b1   :  { %v3685_v28 = vmul.f32 0.03125, %v3683_v57  ;;  %v3680_v27 = vpop.xlane.xlu1 %3679 }
0x13b2   :  { %v3684_v9 = vmul.f32 0.03125, %v3680_v27 }
0x13b3   :  { %v3687_v13 = vsub.f32 %v3677_v7, %v3685_v28 }
0x13b4   :  { %v3686_v26 = vsub.f32 %v3676_v14, %v3684_v9 }
0x13b5   :  { %v3689_v12 = vmul.f32 %v3687_v13, %v3687_v13 }
0x13b6   :  { %v3688_v29 = vmul.f32 %v3686_v26, %v3686_v26 }
0x13b7   :  { %v3693_v31 = vsel %vm80_vm0, %v3689_v12, 0.0 }
0x13b8   :  { %3694 = vadd.xlane.f32.xlu0 %v3693_v31  ;;  %v3690_v22 = vsel %vm80_vm0, %v3688_v29, 0.0 }
0x13b9   :  { %3691 = vadd.xlane.f32.xlu1 %v3690_v22 }
0x1445   :  { %v3695_v24 = vpop.xlane.xlu0 %3694 }
0x1446   :  { %v3697_v44 = vmul.f32 0.03125, %v3695_v24  ;;  %v3692_v34 = vpop.xlane.xlu1 %3691 }
0x1447   :  { %v3696_v35 = vmul.f32 0.03125, %v3692_v34  ;;  %v13592_v34 = vld [vmem:[%s14662_s3 + $0x8] sm:$0xff]  ;;  %s14676_s3 = smov 8  }
0x1448   :  { %v3699_v19 = vadd.f32 1e-05, %v3697_v44  ;;  %vm4536_vm9 = vcmp.ne.f32.partialorder %v13592_v34, 0.0 }
0x1449   :  { %v3698_v17 = vadd.f32 1e-05, %v3696_v35 }
0x144a   :  { %12483 = vrsqrt.f32 %v3699_v19 }
0x144b   :  { %12485 = vrsqrt.f32 %v3698_v17 }
0x1454   :  { %v12484_v20 = vpop.eup %12483 }
0x1455   :  { %v12486_v45 = vpop.eup %12485  ;;  %v3703_v30 = vmul.f32 %v12484_v20, %v3687_v13 }
0x1456   :  { %v3702_v46 = vmul.f32 %v12486_v45, %v3686_v26 }
0x1457   :  { %v3709_v47 = vmul.f32 %v3707_v18, %v3703_v30 }
0x1458   :  { %v3708_v51 = vmul.f32 %v3707_v18, %v3702_v46 }
0x1459   :  { %v3715_v54 = vadd.f32 %v3713_v8, %v3709_v47 }
0x145a   :  { %v3714_v48 = vadd.f32 %v3713_v8, %v3708_v51 }
0x145c   :  { %11626 = vmatprep.mubr.msk.f32.mxu1 %vm80_vm0, %v3714_v48 }
0x145d   :  { %11627 = vmatmul.mubr.msk.f32.vlgmr.msra.gmra.mrb[44].mxu1 %vm80_vm0, %v3715_v54 }
0x145e   :  { %12199 = vmatpush3.bf16.msra.mxu1 %v12196_v41  ;;  %11637 = vmatprep.mubr.msk.f32.mxu1 %vm80_vm0, %v13455_v56 }
0x145f   :  { %12201 = vmatprep.subr.bf16.mxu1 %v12200_v55 }
0x1462   :  { %12203 = vmatpush3.bf16.msra.mxu1 %v12200_v55 }
0x1463   :  { %11645 = vmatprep.subr.mxu1 %v12641_v15 }
0x1465   :  { %11638 = vmatmul.mubr.msk.f32.vlgmr.msra.gmra.mrb[46].mxu1 %vm80_vm0, %v13464_v10 }
0x1466   :  { %11647 = vmatprep.mubr.msk.f32.mxu1 %vm12644_vm1, %v12641_v15 }
0x1530   :  { %v11628_v49 = vpop.f32.mrb[44].mxu1 }
0x1531   :  { %v13477_v50 = vadd.f32 %v11628_v49, %v13474_v58  ;;  %v13479_v52 = vpop.f32.mrb[45].mxu1 }
0x1538   :  { %v11639_v4 = vpop.f32.mrb[46].mxu1 }
0x1539   :  { %v13488_v7 = vadd.f32 %v11639_v4, %v3823_v59  ;;  %v3896_v14 = vpop.f32.mrb[47].mxu1 }
0x153a   :  { %v13490_v16 = vadd.f32 %v3896_v14, %v3823_v59 }
0x153b   :  { %3909 = vrot.lane.b32.xlu0 %v13488_v7, %s12643_s17 }
0x153c   :  { %3907 = vrot.lane.b32.xlu1 %v13490_v16, %s12643_s17 }
0x153f   :  { %3915 = vrot.lane.b32.xlu0 %v13490_v16, %s12645_s18 }
0x1540   :  { %3911 = vrot.lane.b32.xlu1 %v13490_v16, %s12642_s0 }
0x1543   :  { %3919 = vrot.lane.b32.xlu0 %v13490_v16, %s12646_s19 }
0x1544   :  { %3913 = vrot.lane.b32.xlu1 %v13488_v7, %s12642_s0 }
0x1548   :  { %3917 = vrot.lane.b32.xlu1 %v13488_v7, %s12645_s18 }
0x154c   :  { %3995 = vrot.lane.b32.xlu1 %v13488_v7, %s12646_s19 }
0x15ad   :  { %v13508_v25 = vpop.permute.xlu0 %3909 }
0x15ae   :  { %4147 = vrot.lane.b32.xlu1 %v13508_v25, %s12646_s19  ;;  %v13512_v57 = vpop.permute.xlu1 %3907 }
0x15af   :  { %4071 = vrot.lane.b32.xlu0 %v13512_v57, %s12646_s19 }
0x15b1   :  { %v13516_v28 = vpop.permute.xlu0 %3915 }
0x15b2   :  { %v13518_v27 = vpop.permute.xlu1 %3911 }
0x15b3   :  { %4223 = vrot.lane.b32.xlu0 %v13518_v27, %s12646_s19 }
0x15b5   :  { %v3920_v9 = vpop.permute.xlu0 %3919 }
0x15b6   :  { %11641 = vmatpush3.xpose.msk.msra.mxu0 %vm178_vm2, %v3920_v9  ;;  %v13523_v13 = vpop.permute.xlu1 %3913 }
0x15b7   :  { %4375 = vrot.lane.b32.xlu0 %v13516_v28, %s12646_s19  ;;  %4299 = vrot.lane.b32.xlu1 %v13523_v13, %s12646_s19 }
0x15b8   :  { %11650 = vmatprep.subr.mxu0 %v12641_v15 }
0x15b9   :  { %11643 = vmatmul.mubr.msk.f32.vlgmr.msra.gmra.mrb[36].mxu0 %vm178_vm2, %v13490_v16 }
0x15ba   :  { %v13532_v26 = vpop.permute.xlu1 %3917  ;;  %11652 = vmatprep.mubr.msk.f32.mxu0 %vm12644_vm1, %v12641_v15 }
0x15bb   :  { %4451 = vrot.lane.b32.xlu1 %v13532_v26, %s12646_s19 }
0x15be   :  { %v3996_v12 = vpop.permute.xlu1 %3995 }
0x15bf   :  { %11646 = vmatpush3.xpose.msk.msra.mxu1 %vm178_vm2, %v3996_v12 }
0x15c0   :  { %11655 = vmatprep.subr.mxu1 %v12641_v15 }
0x15c2   :  { %11648 = vmatmul.mubr.msk.f32.vlgmr.msra.gmra.mrb[48].mxu1 %vm178_vm2, %v13488_v7 }
0x15c3   :  { %11657 = vmatprep.mubr.msk.f32.mxu1 %vm12644_vm1, %v12641_v15 }
0x1620   :  { %v4148_v29 = vpop.permute.xlu1 %4147 }
0x1621   :  { %v4072_v31 = vpop.permute.xlu0 %4071  ;;  %11656 = vmatpush3.xpose.msk.msra.mxu1 %vm178_vm2, %v4148_v29 }
0x1622   :  { %11651 = vmatpush3.xpose.msk.msra.mxu0 %vm178_vm2, %v4072_v31  ;;  %11665 = vmatprep.subr.mxu1 %v12641_v15 }
0x1623   :  { %11660 = vmatprep.subr.mxu0 %v12641_v15 }
0x1624   :  { %11658 = vmatmul.mubr.msk.f32.vlgmr.msra.gmra.mrb[50].mxu1 %vm178_vm2, %v13508_v25 }
0x1625   :  { %11653 = vmatmul.mubr.msk.f32.vlgmr.msra.gmra.mrb[38].mxu0 %vm178_vm2, %v13512_v57  ;;  %v4224_v22 = vpop.permute.xlu0 %4223  ;;  %11667 = vmatprep.mubr.msk.f32.mxu1 %vm12644_vm1, %v12641_v15 }
0x1626   :  { %11661 = vmatpush3.xpose.msk.msra.mxu0 %vm178_vm2, %v4224_v22  ;;  %11662 = vmatprep.mubr.msk.f32.mxu0 %vm12644_vm1, %v12641_v15 }
0x1627   :  { %11670 = vmatprep.subr.mxu0 %v12641_v15 }
0x1629   :  { %11663 = vmatmul.mubr.msk.f32.vlgmr.msra.gmra.mrb[40].mxu0 %vm178_vm2, %v13518_v27  ;;  %v4376_v36 = vpop.permute.xlu0 %4375  ;;  %v4300_v39 = vpop.permute.xlu1 %4299 }
0x162a   :  { %11666 = vmatpush3.xpose.msk.msra.mxu1 %vm178_vm2, %v4300_v39  ;;  %11671 = vmatpush3.xpose.msk.msra.mxu0 %vm178_vm2, %v4376_v36 }
0x162b   :  { %11672 = vmatprep.mubr.msk.f32.mxu0 %vm12644_vm1, %v12641_v15  ;;  %11675 = vmatprep.subr.mxu1 %v12641_v15 }
0x162c   :  { %11680 = vmatprep.subr.mxu0 %v12641_v15 }
0x162d   :  { %11668 = vmatmul.mubr.msk.f32.vlgmr.msra.gmra.mrb[52].mxu1 %vm178_vm2, %v13523_v13  ;;  %11673 = vmatmul.mubr.msk.f32.vlgmr.msra.gmra.mrb[42].mxu0 %vm178_vm2, %v13516_v28  ;;  %v4452_v2 = vpop.permute.xlu1 %4451 }
0x162e   :  { %11676 = vmatpush3.xpose.msk.msra.mxu1 %vm178_vm2, %v4452_v2  ;;  %11677 = vmatprep.mubr.msk.f32.mxu1 %vm12644_vm1, %v12641_v15 }
0x162f   :  { %11685 = vmatprep.subr.mxu1 %v12641_v15  ;;  %11682 = vmatprep.mubr.msk.f32.mxu0 %vm12644_vm1, %v12641_v15 }
0x1631   :  { %11678 = vmatmul.mubr.msk.f32.vlgmr.msra.gmra.mrb[54].mxu1 %vm178_vm2, %v13532_v26 }
0x1632   :  { %11687 = vmatprep.mubr.msk.f32.mxu1 %vm12644_vm1, %v12641_v15 }
0x168c   :  { %v3991_v38 = vpop.f32.mrb[36].mxu0 }
0x168d   :  { %v4527_v0 = vmul.f32 0.35355338, %v3991_v38  ;;  %v11644_v41 = vpop.f32.mrb[37].mxu0 }
0x168f   :  { %v4537_v24 = vsel %vm4535_vm8, %v4527_v0, -1e+10 }
0x1690   :  { %v4545_v44 = vsel %vm178_vm2, %v4537_v24, -inf }
0x1691   :  { %4546 = vmax.xlane.f32.xlu0 %v4545_v44 }
0x1695   :  { %v4067_v35 = vpop.f32.mrb[48].mxu1 }
0x1696   :  { %v4528_v19 = vmul.f32 0.35355338, %v4067_v35  ;;  %v11649_v17 = vpop.f32.mrb[49].mxu1 }
0x1698   :  { %v4538_v18 = vsel %vm4536_vm9, %v4528_v19, -1e+10 }
0x1699   :  { %v4548_v20 = vsel %vm178_vm2, %v4538_v18, -inf }
0x169a   :  { %4549 = vmax.xlane.f32.xlu1 %v4548_v20 }
0x16f7   :  { %v4219_v45 = vpop.f32.mrb[50].mxu1 }
0x16f8   :  { %v4143_v30 = vpop.f32.mrb[38].mxu0  ;;  %v11659_v46 = vpop.f32.mrb[51].mxu1  ;;  %v4530_v8 = vmul.f32 0.35355338, %v4219_v45 }
0x16f9   :  { %v4529_v47 = vmul.f32 0.35355338, %v4143_v30  ;;  %v11654_v51 = vpop.f32.mrb[39].mxu0 }
0x16fa   :  { %v4540_v49 = vsel %vm4536_vm9, %v4530_v8, -1e+10 }
0x16fb   :  { %v4539_v48 = vsel %vm4535_vm8, %v4529_v47, -1e+10  ;;  %v4554_v31 = vsel %vm178_vm2, %v4540_v49, -inf }
0x16fc   :  { %v4295_v54 = vpop.f32.mrb[40].mxu0  ;;  %v4551_v55 = vsel %vm178_vm2, %v4539_v48, -inf }
0x16fd   :  { %v4531_v59 = vmul.f32 0.35355338, %v4295_v54  ;;  %4552 = vmax.xlane.f32.xlu0 %v4551_v55  ;;  %v11664_v4 = vpop.f32.mrb[41].mxu0 }
0x16ff   :  { %v4541_v14 = vsel %vm4535_vm8, %v4531_v59, -1e+10 }
0x1700   :  { %v4371_v9 = vpop.f32.mrb[52].mxu1  ;;  %v4447_v12 = vpop.f32.mrb[42].mxu0  ;;  %v4557_v29 = vsel %vm178_vm2, %v4541_v14, -inf }
0x1701   :  { %v4532_v22 = vmul.f32 0.35355338, %v4371_v9  ;;  %v4533_v36 = vmul.f32 0.35355338, %v4447_v12  ;;  %v11674_v39 = vpop.f32.mrb[43].mxu0  ;;  %4558 = vmax.xlane.f32.xlu1 %v4557_v29  ;;  %4555 = vmax.xlane.f32.xlu0 %v4554_v31  ;;  %v11669_v2 = vpop.f32.mrb[53].mxu1 }
0x1703   :  { %v4542_v38 = vsel %vm4536_vm9, %v4532_v22, -1e+10  ;;  %v4543_v0 = vsel %vm4535_vm8, %v4533_v36, -1e+10 }
0x1704   :  { %v4523_v41 = vpop.f32.mrb[54].mxu1  ;;  %v4563_v44 = vsel %vm178_vm2, %v4543_v0, -inf  ;;  %v4560_v35 = vsel %vm178_vm2, %v4542_v38, -inf }
0x1705   :  { %v4534_v19 = vmul.f32 0.35355338, %v4523_v41  ;;  %4564 = vmax.xlane.f32.xlu1 %v4563_v44  ;;  %4561 = vmax.xlane.f32.xlu0 %v4560_v35  ;;  %v11679_v17 = vpop.f32.mrb[55].mxu1 }
0x1707   :  { %v4544_v20 = vsel %vm4536_vm9, %v4534_v19, -1e+10 }
0x1708   :  { %v4566_v45 = vsel %vm178_vm2, %v4544_v20, -inf }
0x1709   :  { %4567 = vmax.xlane.f32.xlu0 %v4566_v45 }
0x1716   :  { %4633 = vrot.lane.b32.xlu1 %v13490_v16, %s12647_s2 }
0x171a   :  { %4785 = vrot.lane.b32.xlu1 %v13512_v57, %s12647_s2 }
0x171e   :  { %4861 = vrot.lane.b32.xlu1 %v13508_v25, %s12647_s2  ;;  %v4547_v8 = vpop.xlane.xlu0 %4546 }
0x171f   :  { %4709 = vrot.lane.b32.xlu0 %v13488_v7, %s12647_s2  ;;  %v4569_v47 = vsub.f32 %v4537_v24, %v4547_v8 }
0x1721   :  { %v4577_v51 = vmul.f32 1.442695, %v4569_v47 }
0x1722   :  { %5013 = vrot.lane.b32.xlu1 %v13523_v13, %s12647_s2 }
0x1723   :  { %4937 = vrot.lane.b32.xlu0 %v13518_v27, %s12647_s2 }
0x1727   :  { %v4550_v30 = vpop.xlane.xlu1 %4549 }
0x1728   :  { %v4570_v46 = vsub.f32 %v4538_v18, %v4550_v30 }
0x172a   :  { %v4579_v16 = vmul.f32 1.442695, %v4570_v46 }
0x172c   :  { %12487 = vpow2.f32 %v4579_v16 }
0x172d   :  { %12489 = vpow2.f32 %v4577_v51 }
0x1736   :  { %v13628_v57 = vpop.eup %12487 }
0x1737   :  { %v4596_v25 = vsel %vm178_vm2, %v13628_v57, 0.0  ;;  %v13632_v7 = vpop.eup %12489 }
0x1738   :  { %v4593_v13 = vsel %vm178_vm2, %v13632_v7, 0.0 }
0x1742   :  { %4597 = vadd.xlane.f32.xlu0 %v4596_v25 }
0x1746   :  { %4594 = vadd.xlane.f32.xlu1 %v4593_v13 }
0x178a   :  { %v4553_v27 = vpop.xlane.xlu0 %4552 }
0x178b   :  { %v4571_v18 = vsub.f32 %v4539_v48, %v4553_v27 }
0x178d   :  { %v4581_v54 = vmul.f32 1.442695, %v4571_v18 }
0x178e   :  { %v4556_v24 = vpop.xlane.xlu0 %4555  ;;  %v4559_v55 = vpop.xlane.xlu1 %4558 }
0x178f   :  { %12491 = vpow2.f32 %v4581_v54  ;;  %v4572_v59 = vsub.f32 %v4540_v49, %v4556_v24  ;;  %v4573_v4 = vsub.f32 %v4541_v14, %v4559_v55 }
0x1791   :  { %v4583_v9 = vmul.f32 1.442695, %v4572_v59  ;;  %v4585_v12 = vmul.f32 1.442695, %v4573_v4 }
0x1792   :  { %v4562_v29 = vpop.xlane.xlu0 %4561  ;;  %v4565_v31 = vpop.xlane.xlu1 %4564 }
0x1793   :  { %12493 = vpow2.f32 %v4583_v9  ;;  %v4574_v22 = vsub.f32 %v4542_v38, %v4562_v29  ;;  %v4575_v36 = vsub.f32 %v4543_v0, %v4565_v31 }
0x1794   :  { %12495 = vpow2.f32 %v4585_v12 }
0x1795   :  { %v4587_v39 = vmul.f32 1.442695, %v4574_v22  ;;  %v4589_v2 = vmul.f32 1.442695, %v4575_v36 }
0x1796   :  { %v4568_v41 = vpop.xlane.xlu0 %4567  ;;  %v4634_v44 = vpop.permute.xlu1 %4633 }
0x1797   :  { %12497 = vpow2.f32 %v4587_v39  ;;  %v4576_v48 = vsub.f32 %v4544_v20, %v4568_v41  ;;  %11681 = vmatpush3.msra.mxu0 %v4634_v44 }
0x1798   :  { %12499 = vpow2.f32 %v4589_v2  ;;  %11690 = vmatprep.subr.mxu0 %v12641_v15 }
0x1799   :  { %v12492_v49 = vpop.eup %12491  ;;  %v4591_v14 = vmul.f32 1.442695, %v4576_v48 }
0x179a   :  { %v4710_v35 = vpop.permute.xlu0 %4709  ;;  %v4599_v19 = vsel %vm178_vm2, %v12492_v49, 0.0  ;;  %v4786_v51 = vpop.permute.xlu1 %4785 }
0x179b   :  { %12501 = vpow2.f32 %v4591_v14  ;;  %4600 = vadd.xlane.f32.xlu1 %v4599_v19  ;;  %11686 = vmatpush3.msra.mxu1 %v4710_v35 }
0x179c   :  { %11695 = vmatprep.subr.mxu1 %v12641_v15 }
0x179d   :  { %v12494_v38 = vpop.eup %12493 }
0x179e   :  { %v12496_v0 = vpop.eup %12495  ;;  %v4602_v17 = vsel %vm178_vm2, %v12494_v38, 0.0  ;;  %v4862_v25 = vpop.permute.xlu1 %4861 }
0x179f   :  { %4603 = vadd.xlane.f32.xlu0 %v4602_v17  ;;  %v4605_v20 = vsel %vm178_vm2, %v12496_v0, 0.0  ;;  %v4938_v13 = vpop.permute.xlu0 %4937 }
0x17a0   :  { %4606 = vadd.xlane.f32.xlu1 %v4605_v20 }
0x17a1   :  { %v13641_v45 = vpop.eup %12497 }
0x17a2   :  { %v13643_v30 = vpop.eup %12499  ;;  %v4608_v46 = vsel %vm178_vm2, %v13641_v45, 0.0  ;;  %v5014_v27 = vpop.permute.xlu1 %5013 }
0x17a3   :  { %4609 = vadd.xlane.f32.xlu0 %v4608_v46  ;;  %v4611_v8 = vsel %vm178_vm2, %v13643_v30, 0.0 }
0x17a4   :  { %4612 = vadd.xlane.f32.xlu1 %v4611_v8 }
0x17a5   :  { %v13649_v47 = vpop.eup %12501 }
0x17a6   :  { %v4614_v16 = vsel %vm178_vm2, %v13649_v47, 0.0 }
0x17a7   :  { %4615 = vadd.xlane.f32.xlu0 %v4614_v16 }
0x17b5   :  { %5165 = vrot.lane.b32.xlu1 %v13532_v26, %s12647_s2 }
0x17b9   :  { %12353 = vrot.lane.b32.xlu1 %v12352_v43, %s12648_s24 }
0x17bd   :  { %5089 = vrot.lane.b32.xlu0 %v13516_v28, %s12647_s2 }
0x17c1   :  { %12348 = vrot.lane.b32.xlu0 %v12347_v40, %s12648_s24 }
0x17cf   :  { %v4598_v18 = vpop.xlane.xlu0 %4597 }
0x17d0   :  { %12503 = vrcp.f32 %v4598_v18 }
0x17d3   :  { %v4595_v26 = vpop.xlane.xlu1 %4594 }
0x17d4   :  { %12505 = vrcp.f32 %v4595_v26 }
0x17da   :  { %v12504_v54 = vpop.eup %12503 }
0x17db   :  { %v4620_v6 = vmul.f32 %v12504_v54, %v13628_v57 }
0x17dd   :  { %11688 = vmatmul.mubr.msk.f32.vlgmr.msra.gmra.mrb[56].mxu1 %vm178_vm2, %v4620_v6 }
0x17de   :  { %v12506_v42 = vpop.eup %12505  ;;  %11696 = vmatpush3.msra.mxu1 %v4862_v25  ;;  %11697 = vmatprep.mubr.msk.f32.mxu1 %vm12644_vm1, %v12641_v15 }
0x17df   :  { %v4618_v1 = vmul.f32 %v12506_v42, %v13632_v7  ;;  %11705 = vmatprep.subr.mxu1 %v12641_v15 }
0x17e1   :  { %11683 = vmatmul.mubr.msk.f32.vlgmr.msra.gmra.mrb[44].mxu0 %vm178_vm2, %v4618_v1 }
0x17e2   :  { %11691 = vmatpush3.msra.mxu0 %v4786_v51  ;;  %11692 = vmatprep.mubr.msk.f32.mxu0 %vm12644_vm1, %v12641_v15 }
0x17e3   :  { %11700 = vmatprep.subr.mxu0 %v12641_v15 }
0x1828   :  { %v4601_v3 = vpop.xlane.xlu1 %4600 }
0x1829   :  { %12507 = vrcp.f32 %v4601_v3 }
0x182c   :  { %v4604_v40 = vpop.xlane.xlu0 %4603 }
0x182d   :  { %12509 = vrcp.f32 %v4604_v40  ;;  %v4607_v43 = vpop.xlane.xlu1 %4606 }
0x182e   :  { %12511 = vrcp.f32 %v4607_v43 }
0x1830   :  { %v4610_v28 = vpop.xlane.xlu0 %4609 }
0x1831   :  { %12513 = vrcp.f32 %v4610_v28  ;;  %v4613_v57 = vpop.xlane.xlu1 %4612 }
0x1832   :  { %12515 = vrcp.f32 %v4613_v57 }
0x1833   :  { %v12508_v7 = vpop.eup %12507 }
0x1834   :  { %v4616_v24 = vpop.xlane.xlu0 %4615  ;;  %v4622_v55 = vmul.f32 %v12508_v7, %v12492_v49 }
0x1835   :  { %12517 = vrcp.f32 %v4616_v24  ;;  %v5166_v2 = vpop.permute.xlu1 %5165 }
0x1836   :  { %11693 = vmatmul.mubr.msk.f32.vlgmr.msra.gmra.mrb[46].mxu0 %vm178_vm2, %v4622_v55 }
0x1837   :  { %v12510_v59 = vpop.eup %12509  ;;  %11701 = vmatpush3.msra.mxu0 %v4938_v13  ;;  %11702 = vmatprep.mubr.msk.f32.mxu0 %vm12644_vm1, %v12641_v15 }
0x1838   :  { %v12512_v4 = vpop.eup %12511  ;;  %11710 = vmatprep.subr.mxu0 %v12641_v15  ;;  %v4624_v9 = vmul.f32 %v12510_v59, %v12494_v38  ;;  %v5090_v12 = vpop.permute.xlu0 %5089 }
0x1839   :  { %v4626_v29 = vmul.f32 %v12512_v4, %v12496_v0  ;;  %v12354_v17 = vpop.permute.xlu1 %12353 }
0x183a   :  { %11698 = vmatmul.mubr.msk.f32.vlgmr.msra.gmra.mrb[58].mxu1 %vm178_vm2, %v4624_v9  ;;  %v12356_v20 = vunpack.i.h.bf16 %v12354_v17  ;;  %v13709_v9 = vadd.f32 %v13474_v58, %v13479_v52 }
0x183b   :  { %v12514_v31 = vpop.eup %12513  ;;  %11703 = vmatmul.mubr.msk.f32.vlgmr.msra.gmra.mrb[48].mxu0 %vm178_vm2, %v4626_v29  ;;  %11706 = vmatpush3.msra.mxu1 %v5014_v27  ;;  %v5274_v29 = vrot.slane %v13484_v53, %v13010_v32 }
0x183c   :  { %v12516_v22 = vpop.eup %12515  ;;  %11711 = vmatpush3.msra.mxu0 %v5090_v12  ;;  %11707 = vmatprep.mubr.msk.f32.mxu1 %vm12644_vm1, %v12641_v15  ;;  %v4628_v36 = vmul.f32 %v12514_v31, %v13641_v45  ;;  %v12349_v19 = vpop.permute.xlu0 %12348  ;;  %v12355_v45 = vunpack.i.l.bf16 %v12354_v17  ;;  %v13733_v17 = vld [vmem:[%s14658_s7 + $0x8] sm:$0xff] }
0x183d   :  { %11712 = vmatprep.mubr.msk.f32.mxu0 %vm12644_vm1, %v12641_v15  ;;  %11715 = vmatprep.subr.mxu1 %v12641_v15  ;;  %v4630_v39 = vmul.f32 %v12516_v22, %v13643_v30  ;;  %v12351_v38 = vunpack.i.h.bf16 %v12349_v19  ;;  %v12350_v0 = vunpack.i.l.bf16 %v12349_v19 }
0x183e   :  { %11708 = vmatmul.mubr.msk.f32.vlgmr.msra.gmra.mrb[60].mxu1 %vm178_vm2, %v4628_v36  ;;  %v12208_v46 = vpack.c.bf16 %v12356_v20, %v12355_v45  ;;  %v13738_v20 = vld [vmem:[%s14658_s7 + $0x18] sm:$0xff] }
0x183f   :  { %v12518_v41 = vpop.eup %12517  ;;  %11713 = vmatmul.mubr.msk.f32.vlgmr.msra.gmra.mrb[50].mxu0 %vm178_vm2, %v4630_v39  ;;  %11716 = vmatpush3.msra.mxu1 %v5166_v2  ;;  %v12204_v30 = vpack.c.bf16 %v12351_v38, %v12350_v0  ;;  %v12212_v45 = vpack.c.bf16 %v13738_v20, %v13733_v17 }
0x1840   :  { %11717 = vmatprep.mubr.msk.f32.mxu1 %vm12644_vm1, %v12641_v15  ;;  %v4632_v44 = vmul.f32 %v12518_v41, %v13649_v47 }
0x1841   :  { %12205 = vmatprep.subr.bf16.mxu0 %v12204_v30  ;;  %12213 = vmatprep.subr.bf16.mxu1 %v12212_v45 }
0x1842   :  { %11718 = vmatmul.mubr.msk.f32.vlgmr.msra.gmra.mrb[62].mxu1 %vm178_vm2, %v4632_v44  ;;  %12207 = vmatpush3.bf16.msra.mxu0 %v12204_v30  ;;  %v13747_v30 = vld [vmem:[%s14658_s7 + $0x28] sm:$0xff] }
0x1843   :  { %12209 = vmatprep.subr.bf16.mxu0 %v12208_v46  ;;  %12215 = vmatpush3.bf16.msra.mxu1 %v12212_v45 }
0x1846   :  { %12211 = vmatpush3.bf16.msra.mxu0 %v12208_v46  ;;  %v13752_v46 = vld [vmem:[%s14658_s7 + $0x38] sm:$0xff] }
0x1847   :  { %11742 = vmatprep.subr.mxu0 %v12641_v15 }
0x18b0   :  { %v4781_v48 = vpop.f32.mrb[56].mxu1 }
0x18b1   :  { %v11689_v49 = vpop.f32.mrb[57].mxu1 }
0x18b4   :  { %v4705_v14 = vpop.f32.mrb[44].mxu0 }
0x18b5   :  { %v11684_v35 = vpop.f32.mrb[45].mxu0 }
0x1909   :  { %v4857_v8 = vpop.f32.mrb[46].mxu0 }
0x190a   :  { %5243 = vrot.lane.b32.xlu0 %v4857_v8, %s14676_s3  ;;  %v11694_v47 = vpop.f32.mrb[47].mxu0  ;;  %v12216_v8 = vpack.c.bf16 %v13752_v46, %v13747_v30 }
0x190c   :  { %12217 = vmatprep.subr.bf16.mxu1 %v12216_v8 }
0x190d   :  { %v4933_v16 = vpop.f32.mrb[58].mxu1  ;;  %12219 = vmatpush3.bf16.msra.mxu1 %v12216_v8 }
0x190e   :  { %v5009_v51 = vpop.f32.mrb[48].mxu0  ;;  %5245 = vrot.lane.b32.xlu1 %v4933_v16, %s14676_s3  ;;  %v11699_v25 = vpop.f32.mrb[59].mxu1  ;;  %11747 = vmatprep.subr.mxu1 %v12641_v15 }
0x190f   :  { %5251 = vrot.lane.b32.xlu0 %v5009_v51, %s14674_s6  ;;  %v11704_v13 = vpop.f32.mrb[49].mxu0 }
0x1911   :  { %v5085_v27 = vpop.f32.mrb[60].mxu1 }
0x1912   :  { %v5161_v18 = vpop.f32.mrb[50].mxu0  ;;  %5253 = vrot.lane.b32.xlu1 %v5085_v27, %s14674_s6  ;;  %v11709_v26 = vpop.f32.mrb[61].mxu1 }
0x1913   :  { %5259 = vrot.lane.b32.xlu0 %v5161_v18, %s14675_s20  ;;  %v11714_v54 = vpop.f32.mrb[51].mxu0  ;;  %v5403_v18 = vrot.slane %v13484_v53, %v13113_v60 }
0x1915   :  { %v5237_v6 = vpop.f32.mrb[62].mxu1 }
0x1916   :  { %5261 = vrot.lane.b32.xlu1 %v5237_v6, %s14675_s20  ;;  %v11719_v42 = vpop.f32.mrb[63].mxu1  ;;  %v5409_v6 = vrot.slane %v13484_v53, %v13116_v61 }
0x197c   :  { %v5244_v1 = vpop.permute.xlu0 %5243 }
0x197d   :  { %v5265_v43 = vsel %vm178_vm2, %v4705_v14, %v5244_v1 }
0x1980   :  { %v5246_v3 = vpop.permute.xlu1 %5245 }
0x1981   :  { %v5252_v40 = vpop.permute.xlu0 %5251  ;;  %v5266_v55 = vsel %vm178_vm2, %v4781_v48, %v5246_v3 }
0x1982   :  { %v5267_v57 = vsel %vm1525_vm5, %v5265_v43, %v5252_v40 }
0x1984   :  { %v5254_v28 = vpop.permute.xlu1 %5253 }
0x1985   :  { %v5260_v7 = vpop.permute.xlu0 %5259  ;;  %v5268_v59 = vsel %vm1525_vm5, %v5266_v55, %v5254_v28 }
0x1986   :  { %v5269_v24 = vsel %vm1528_vm6, %v5267_v57, %v5260_v7  ;;  %v5415_v57 = vrot.slane %v13484_v53, %v13070_v23 }
0x1987   :  { %11728 = vmatprep.mubr.msk.f32.mxu0 %vm80_vm0, %v5269_v24 }
0x1988   :  { %v5262_v4 = vpop.permute.xlu1 %5261 }
0x1989   :  { %v5270_v12 = vsel %vm1528_vm6, %v5268_v59, %v5262_v4 }
0x198a   :  { %11729 = vmatmul.mubr.msk.f32.vlgmr.msra.gmra.mrb[52].mxu0 %vm80_vm0, %v5270_v12 }
0x198b   :  { %11743 = vmatpush3.xpose.msk.msra.mxu0 %vm178_vm2, %v13709_v9  ;;  %11744 = vmatprep.mubr.msk.f32.mxu0 %vm12644_vm1, %v12641_v15 }
0x198c   :  { %11752 = vmatprep.subr.mxu0 %v12641_v15 }
0x1a5d   :  { %v11730_v31 = vpop.f32.mrb[52].mxu0 }
0x1a5e   :  { %v5369_v22 = vadd.f32 %v11730_v31, %v5274_v29  ;;  %v5363_v36 = vpop.f32.mrb[53].mxu0 }
0x1a5f   :  { %v5364_v58 = vadd.f32 %v5363_v36, %v5274_v29 }
0x1a60   :  { %v5373_v52 = vadd.f32 %v5369_v22, %v13464_v10 }
0x1a61   :  { %v5372_v39 = vadd.f32 %v5364_v58, %v13455_v56 }
0x1a62   :  { %v5377_v2 = vsel %vm80_vm0, %v5373_v52, 0.0 }
0x1a63   :  { %5378 = vadd.xlane.f32.xlu1 %v5377_v2  ;;  %v5374_v41 = vsel %vm80_vm0, %v5372_v39, 0.0 }
0x1a64   :  { %5375 = vadd.xlane.f32.xlu0 %v5374_v41 }
0x1a74   :  { %5513 = vrot.lane.b32.xlu1 %v13709_v9, %s12643_s17 }
0x1a78   :  { %5519 = vrot.lane.b32.xlu1 %v13477_v50, %s12642_s0 }
0x1af0   :  { %v5379_v44 = vpop.xlane.xlu1 %5378 }
0x1af1   :  { %v5381_v48 = vmul.f32 0.03125, %v5379_v44  ;;  %v5376_v49 = vpop.xlane.xlu0 %5375 }
0x1af2   :  { %v5380_v14 = vmul.f32 0.03125, %v5376_v49 }
0x1af3   :  { %v5383_v35 = vsub.f32 %v5373_v52, %v5381_v48 }
0x1af4   :  { %v5382_v10 = vsub.f32 %v5372_v39, %v5380_v14  ;;  %v13787_v12 = vpop.permute.xlu1 %5513 }
0x1af5   :  { %v5385_v38 = vmul.f32 %v5383_v35, %v5383_v35 }
0x1af6   :  { %v5384_v19 = vmul.f32 %v5382_v10, %v5382_v10 }
0x1af7   :  { %v5389_v0 = vsel %vm80_vm0, %v5385_v38, 0.0 }
0x1af8   :  { %v5386_v56 = vsel %vm80_vm0, %v5384_v19, 0.0  ;;  %v13804_v53 = vpop.permute.xlu1 %5519 }
0x1af9   :  { %5387 = vadd.xlane.f32.xlu0 %v5386_v56 }
0x1afd   :  { %5390 = vadd.xlane.f32.xlu0 %v5389_v0 }
0x1b13   :  { %5515 = vrot.lane.b32.xlu0 %v13477_v50, %s12643_s17 }
0x1b17   :  { %5517 = vrot.lane.b32.xlu0 %v13709_v9, %s12642_s0 }
0x1b1b   :  { %5521 = vrot.lane.b32.xlu0 %v13709_v9, %s12645_s18 }
0x1b86   :  { %v5388_v47 = vpop.xlane.xlu0 %5387 }
0x1b87   :  { %v5392_v16 = vmul.f32 0.03125, %v5388_v47 }
0x1b89   :  { %v5394_v51 = vadd.f32 1e-05, %v5392_v16 }
0x1b8a   :  { %v5391_v25 = vpop.xlane.xlu0 %5390 }
0x1b8b   :  { %12519 = vrsqrt.f32 %v5394_v51  ;;  %v5393_v13 = vmul.f32 0.03125, %v5391_v25 }
0x1b8d   :  { %v5395_v27 = vadd.f32 1e-05, %v5393_v13 }
0x1b8e   :  { %v13780_v4 = vpop.permute.xlu0 %5515 }
0x1b8f   :  { %12521 = vrsqrt.f32 %v5395_v27 }
0x1b92   :  { %v13806_v29 = vpop.permute.xlu0 %5517 }
0x1b95   :  { %v12520_v26 = vpop.eup %12519 }
0x1b96   :  { %v5398_v54 = vmul.f32 %v12520_v26, %v5382_v10  ;;  %v13809_v22 = vpop.permute.xlu0 %5521 }
0x1b98   :  { %v5404_v42 = vmul.f32 %v5403_v18, %v5398_v54 }
0x1b99   :  { %v12522_v1 = vpop.eup %12521 }
0x1b9a   :  { %v5399_v3 = vmul.f32 %v12522_v1, %v5383_v35  ;;  %v13765_v40 = vadd.f32 %v5409_v6, %v5404_v42 }
0x1b9c   :  { %v5405_v43 = vmul.f32 %v5403_v18, %v5399_v3  ;;  %11739 = vmatprep.mubr.msk.f32.mxu1 %vm80_vm0, %v13765_v40 }
0x1b9e   :  { %v13769_v28 = vadd.f32 %v5409_v6, %v5405_v43 }
0x1ba0   :  { %11740 = vmatmul.mubr.msk.f32.vlgmr.msra.gmra.mrb[64].mxu1 %vm80_vm0, %v13769_v28 }
0x1ba1   :  { %11748 = vmatpush3.xpose.msk.msra.mxu1 %vm178_vm2, %v13477_v50  ;;  %11749 = vmatprep.mubr.msk.f32.mxu1 %vm12644_vm1, %v12641_v15 }
0x1ba2   :  { %11757 = vmatprep.subr.mxu1 %v12641_v15 }
0x1c73   :  { %v11741_v7 = vpop.f32.mrb[64].mxu1 }
0x1c74   :  { %v5494_v24 = vadd.f32 %v11741_v7, %v5415_v57  ;;  %v5488_v55 = vpop.f32.mrb[65].mxu1 }
0x1c75   :  { %v5489_v59 = vadd.f32 %v5488_v55, %v5415_v57 }
0x1c76   :  { %11750 = vmatmul.mubr.msk.f32.vlgmr.msra.gmra.mrb[66].mxu1 %vm178_vm2, %v5494_v24  ;;  %5501 = vrot.lane.b32.xlu1 %v5494_v24, %s12643_s17 }
0x1c77   :  { %11758 = vmatpush3.xpose.msk.msra.mxu1 %vm178_vm2, %v13780_v4  ;;  %5503 = vrot.lane.b32.xlu0 %v5489_v59, %s12642_s0 }
0x1c78   :  { %11745 = vmatmul.mubr.msk.f32.vlgmr.msra.gmra.mrb[54].mxu0 %vm178_vm2, %v5489_v59  ;;  %11759 = vmatprep.mubr.msk.f32.mxu1 %vm12644_vm1, %v12641_v15 }
0x1c79   :  { %11753 = vmatpush3.xpose.msk.msra.mxu0 %vm178_vm2, %v13787_v12  ;;  %11767 = vmatprep.subr.mxu1 %v12641_v15 }
0x1c7a   :  { %5499 = vrot.lane.b32.xlu1 %v5489_v59, %s12643_s17  ;;  %11754 = vmatprep.mubr.msk.f32.mxu0 %vm12644_vm1, %v12641_v15 }
0x1c7b   :  { %5507 = vrot.lane.b32.xlu0 %v5489_v59, %s12645_s18  ;;  %11762 = vmatprep.subr.mxu0 %v12641_v15 }
0x1c7e   :  { %5505 = vrot.lane.b32.xlu1 %v5494_v24, %s12642_s0 }
0x1c82   :  { %5523 = vrot.lane.b32.xlu1 %v13477_v50, %s12645_s18 }
0x1c86   :  { %5509 = vrot.lane.b32.xlu1 %v5494_v24, %s12645_s18 }
0x1ce8   :  { %v5502_v31 = vpop.permute.xlu1 %5501 }
0x1ce9   :  { %11760 = vmatmul.mubr.msk.f32.vlgmr.msra.gmra.mrb[68].mxu1 %vm178_vm2, %v5502_v31  ;;  %v5504_v58 = vpop.permute.xlu0 %5503 }
0x1cea   :  { %11768 = vmatpush3.xpose.msk.msra.mxu1 %vm178_vm2, %v13804_v53  ;;  %11769 = vmatprep.mubr.msk.f32.mxu1 %vm12644_vm1, %v12641_v15 }
0x1ceb   :  { %11777 = vmatprep.subr.mxu1 %v12641_v15 }
0x1cec   :  { %v5500_v36 = vpop.permute.xlu1 %5499 }
0x1ced   :  { %11755 = vmatmul.mubr.msk.f32.vlgmr.msra.gmra.mrb[56].mxu0 %vm178_vm2, %v5500_v36  ;;  %v5508_v39 = vpop.permute.xlu0 %5507 }
0x1cee   :  { %11763 = vmatpush3.xpose.msk.msra.mxu0 %vm178_vm2, %v13806_v29  ;;  %11764 = vmatprep.mubr.msk.f32.mxu0 %vm12644_vm1, %v12641_v15 }
0x1cef   :  { %11772 = vmatprep.subr.mxu0 %v12641_v15 }
0x1cf0   :  { %v5506_v52 = vpop.permute.xlu1 %5505 }
0x1cf1   :  { %11765 = vmatmul.mubr.msk.f32.vlgmr.msra.gmra.mrb[58].mxu0 %vm178_vm2, %v5504_v58  ;;  %11770 = vmatmul.mubr.msk.f32.vlgmr.msra.gmra.mrb[70].mxu1 %vm178_vm2, %v5506_v52 }
0x1cf2   :  { %11773 = vmatpush3.xpose.msk.msra.mxu0 %vm178_vm2, %v13809_v22  ;;  %11774 = vmatprep.mubr.msk.f32.mxu0 %vm12644_vm1, %v12641_v15 }
0x1cf3   :  { %11779 = vmatprep.mubr.msk.f32.mxu1 %vm12644_vm1, %v12641_v15  ;;  %11782 = vmatprep.subr.mxu0 %v12641_v15 }
0x1cf4   :  { %v13831_v2 = vpop.permute.xlu1 %5523 }
0x1cf5   :  { %11775 = vmatmul.mubr.msk.f32.vlgmr.msra.gmra.mrb[60].mxu0 %vm178_vm2, %v5508_v39  ;;  %11778 = vmatpush3.xpose.msk.msra.mxu1 %vm178_vm2, %v13831_v2 }
0x1cf6   :  { %11787 = vmatprep.subr.mxu1 %v12641_v15  ;;  %11784 = vmatprep.mubr.msk.f32.mxu0 %vm12644_vm1, %v12641_v15 }
0x1cf8   :  { %v5510_v41 = vpop.permute.xlu1 %5509 }
0x1cf9   :  { %11780 = vmatmul.mubr.msk.f32.vlgmr.msra.gmra.mrb[72].mxu1 %vm178_vm2, %v5510_v41 }
0x1cfa   :  { %11789 = vmatprep.mubr.msk.f32.mxu1 %vm12644_vm1, %v12641_v15 }
0x1d49   :  { %v5669_v44 = vpop.f32.mrb[66].mxu1 }
0x1d4a   :  { %v6118_v48 = vmul.f32 0.35355338, %v5669_v44  ;;  %v11751_v49 = vpop.f32.mrb[67].mxu1 }
0x1d4b   :  { %v5595_v14 = vpop.f32.mrb[54].mxu0 }
0x1d4c   :  { %v6126_v35 = vsel %vm794_vm4, %v6118_v48, -1e+10  ;;  %v6117_v10 = vmul.f32 0.35355338, %v5595_v14  ;;  %v11746_v19 = vpop.f32.mrb[55].mxu0 }
0x1d4d   :  { %v6136_v56 = vsel %vm178_vm2, %v6126_v35, -inf }
0x1d4e   :  { %v6125_v38 = vsel %vm793_vm3, %v6117_v10, -1e+10  ;;  %6137 = vmax.xlane.f32.xlu1 %v6136_v56 }
0x1d4f   :  { %v6133_v0 = vsel %vm178_vm2, %v6125_v38, -inf }
0x1d50   :  { %6134 = vmax.xlane.f32.xlu0 %v6133_v0 }
0x1dbc   :  { %v5817_v45 = vpop.f32.mrb[68].mxu1 }
0x1dbd   :  { %v11761_v8 = vpop.f32.mrb[69].mxu1  ;;  %v6120_v47 = vmul.f32 0.35355338, %v5817_v45 }
0x1dbf   :  { %v6128_v27 = vsel %vm794_vm4, %v6120_v47, -1e+10 }
0x1dc0   :  { %v5743_v16 = vpop.f32.mrb[56].mxu0  ;;  %v6142_v7 = vsel %vm178_vm2, %v6128_v27, -inf }
0x1dc1   :  { %v6119_v51 = vmul.f32 0.35355338, %v5743_v16  ;;  %v11756_v25 = vpop.f32.mrb[57].mxu0 }
0x1dc3   :  { %v6127_v13 = vsel %vm793_vm3, %v6119_v51, -1e+10 }
0x1dc4   :  { %v5891_v18 = vpop.f32.mrb[58].mxu0  ;;  %v5965_v26 = vpop.f32.mrb[70].mxu1  ;;  %v6139_v54 = vsel %vm178_vm2, %v6127_v13, -inf }
0x1dc5   :  { %v6121_v6 = vmul.f32 0.35355338, %v5891_v18  ;;  %v6122_v42 = vmul.f32 0.35355338, %v5965_v26  ;;  %v11771_v1 = vpop.f32.mrb[71].mxu1  ;;  %6140 = vmax.xlane.f32.xlu0 %v6139_v54  ;;  %v11766_v3 = vpop.f32.mrb[59].mxu0 }
0x1dc7   :  { %v6129_v43 = vsel %vm793_vm3, %v6121_v6, -1e+10  ;;  %v6130_v55 = vsel %vm794_vm4, %v6122_v42, -1e+10 }
0x1dc8   :  { %v6039_v57 = vpop.f32.mrb[60].mxu0  ;;  %v6145_v24 = vsel %vm178_vm2, %v6129_v43, -inf  ;;  %v6148_v52 = vsel %vm178_vm2, %v6130_v55, -inf }
0x1dc9   :  { %v6123_v59 = vmul.f32 0.35355338, %v6039_v57  ;;  %6143 = vmax.xlane.f32.xlu0 %v6142_v7  ;;  %6146 = vmax.xlane.f32.xlu1 %v6145_v24  ;;  %v11776_v31 = vpop.f32.mrb[61].mxu0 }
0x1dcb   :  { %v6131_v36 = vsel %vm793_vm3, %v6123_v59, -1e+10 }
0x1dcc   :  { %v6113_v58 = vpop.f32.mrb[72].mxu1  ;;  %v6151_v39 = vsel %vm178_vm2, %v6131_v36, -inf }
0x1dcd   :  { %v6124_v41 = vmul.f32 0.35355338, %v6113_v58  ;;  %v11781_v44 = vpop.f32.mrb[73].mxu1  ;;  %6149 = vmax.xlane.f32.xlu0 %v6148_v52  ;;  %6152 = vmax.xlane.f32.xlu1 %v6151_v39 }
0x1dcf   :  { %v6132_v48 = vsel %vm794_vm4, %v6124_v41, -1e+10 }
0x1dd0   :  { %v6154_v49 = vsel %vm178_vm2, %v6132_v48, -inf }
0x1dd1   :  { %6155 = vmax.xlane.f32.xlu0 %v6154_v49 }
0x1ddb   :  { %v6138_v14 = vpop.xlane.xlu1 %6137 }
0x1ddc   :  { %v6158_v10 = vsub.f32 %v6126_v35, %v6138_v14 }
0x1ddd   :  { %v6135_v19 = vpop.xlane.xlu0 %6134 }
0x1dde   :  { %6221 = vrot.lane.b32.xlu1 %v13709_v9, %s12646_s19  ;;  %v6167_v56 = vmul.f32 1.442695, %v6158_v10  ;;  %v6157_v0 = vsub.f32 %v6125_v38, %v6135_v19 }
0x1de0   :  { %12523 = vpow2.f32 %v6167_v56  ;;  %v6165_v45 = vmul.f32 1.442695, %v6157_v0 }
0x1de2   :  { %6373 = vrot.lane.b32.xlu1 %v13787_v12, %s12646_s19  ;;  %12525 = vpow2.f32 %v6165_v45 }
0x1de6   :  { %6449 = vrot.lane.b32.xlu1 %v13780_v4, %s12646_s19 }
0x1de7   :  { %6297 = vrot.lane.b32.xlu0 %v13477_v50, %s12646_s19 }
0x1dea   :  { %6601 = vrot.lane.b32.xlu1 %v13804_v53, %s12646_s19  ;;  %v13878_v8 = vpop.eup %12523 }
0x1deb   :  { %6525 = vrot.lane.b32.xlu0 %v13806_v29, %s12646_s19  ;;  %v6184_v47 = vsel %vm178_vm2, %v13878_v8, 0.0 }
0x1dec   :  { %v13882_v16 = vpop.eup %12525 }
0x1ded   :  { %v6181_v51 = vsel %vm178_vm2, %v13882_v16, 0.0 }
0x1e0a   :  { %6185 = vadd.xlane.f32.xlu0 %v6184_v47 }
0x1e0e   :  { %6182 = vadd.xlane.f32.xlu1 %v6181_v51 }
0x1e52   :  { %v6141_v25 = vpop.xlane.xlu0 %6140 }
0x1e53   :  { %v6159_v35 = vsub.f32 %v6127_v13, %v6141_v25 }
0x1e55   :  { %v6169_v18 = vmul.f32 1.442695, %v6159_v35 }
0x1e56   :  { %v6144_v26 = vpop.xlane.xlu0 %6143  ;;  %v6147_v38 = vpop.xlane.xlu1 %6146 }
0x1e57   :  { %12527 = vpow2.f32 %v6169_v18  ;;  %v6160_v54 = vsub.f32 %v6128_v27, %v6144_v26  ;;  %v6161_v6 = vsub.f32 %v6129_v43, %v6147_v38 }
0x1e59   :  { %v6171_v42 = vmul.f32 1.442695, %v6160_v54  ;;  %v6173_v1 = vmul.f32 1.442695, %v6161_v6 }
0x1e5a   :  { %v6150_v3 = vpop.xlane.xlu0 %6149  ;;  %v6153_v57 = vpop.xlane.xlu1 %6152 }
0x1e5b   :  { %12529 = vpow2.f32 %v6171_v42  ;;  %v6162_v7 = vsub.f32 %v6130_v55, %v6150_v3  ;;  %v6163_v24 = vsub.f32 %v6131_v36, %v6153_v57 }
0x1e5c   :  { %12531 = vpow2.f32 %v6173_v1 }
0x1e5d   :  { %v6175_v59 = vmul.f32 1.442695, %v6162_v7  ;;  %v6177_v31 = vmul.f32 1.442695, %v6163_v24 }
0x1e5e   :  { %v6156_v58 = vpop.xlane.xlu0 %6155  ;;  %v6222_v52 = vpop.permute.xlu1 %6221 }
0x1e5f   :  { %12533 = vpow2.f32 %v6175_v59  ;;  %v6164_v13 = vsub.f32 %v6132_v48, %v6156_v58  ;;  %11783 = vmatpush3.msra.mxu0 %v6222_v52  ;;  %v13919_v59 = vpack.i.bf16 %v13738_v20, %v13733_v17 }
0x1e60   :  { %12535 = vpow2.f32 %v6177_v31  ;;  %11792 = vmatprep.subr.mxu0 %v12641_v15  ;;  %v13923_v31 = vpack.i.bf16 %v13752_v46, %v13747_v30 }
0x1e61   :  { %v12528_v27 = vpop.eup %12527  ;;  %v6179_v43 = vmul.f32 1.442695, %v6164_v13 }
0x1e62   :  { %v6298_v39 = vpop.permute.xlu0 %6297  ;;  %v6187_v41 = vsel %vm178_vm2, %v12528_v27, 0.0  ;;  %v6374_v45 = vpop.permute.xlu1 %6373 }
0x1e63   :  { %12537 = vpow2.f32 %v6179_v43  ;;  %11788 = vmatpush3.msra.mxu1 %v6298_v39  ;;  %6188 = vadd.xlane.f32.xlu1 %v6187_v41 }
0x1e64   :  { %11797 = vmatprep.subr.mxu1 %v12641_v15 }
0x1e65   :  { %v12530_v55 = vpop.eup %12529 }
0x1e66   :  { %v12532_v36 = vpop.eup %12531  ;;  %v6190_v44 = vsel %vm178_vm2, %v12530_v55, 0.0  ;;  %v6450_v47 = vpop.permute.xlu1 %6449 }
0x1e67   :  { %6191 = vadd.xlane.f32.xlu0 %v6190_v44  ;;  %v6193_v48 = vsel %vm178_vm2, %v12532_v36, 0.0  ;;  %v6526_v51 = vpop.permute.xlu0 %6525 }
0x1e68   :  { %6194 = vadd.xlane.f32.xlu1 %v6193_v48 }
0x1e69   :  { %v13891_v49 = vpop.eup %12533 }
0x1e6a   :  { %v13893_v14 = vpop.eup %12535  ;;  %v6196_v10 = vsel %vm178_vm2, %v13891_v49, 0.0  ;;  %v6602_v25 = vpop.permute.xlu1 %6601 }
0x1e6b   :  { %6197 = vadd.xlane.f32.xlu0 %v6196_v10  ;;  %v6199_v19 = vsel %vm178_vm2, %v13893_v14, 0.0 }
0x1e6c   :  { %6200 = vadd.xlane.f32.xlu1 %v6199_v19 }
0x1e6d   :  { %v13899_v56 = vpop.eup %12537 }
0x1e6e   :  { %v6202_v0 = vsel %vm178_vm2, %v13899_v56, 0.0 }
0x1e6f   :  { %6203 = vadd.xlane.f32.xlu0 %v6202_v0 }
0x1e7d   :  { %6753 = vrot.lane.b32.xlu1 %v13831_v2, %s12646_s19 }
0x1e81   :  { %12363 = vrot.lane.b32.xlu1 %v13923_v31, %s12646_s19 }
0x1e85   :  { %6677 = vrot.lane.b32.xlu0 %v13809_v22, %s12646_s19 }
0x1e89   :  { %12358 = vrot.lane.b32.xlu0 %v13919_v59, %s12646_s19 }
0x1e97   :  { %v6186_v35 = vpop.xlane.xlu0 %6185 }
0x1e98   :  { %12539 = vrcp.f32 %v6186_v35 }
0x1e9b   :  { %v6183_v18 = vpop.xlane.xlu1 %6182 }
0x1e9c   :  { %12541 = vrcp.f32 %v6183_v18 }
0x1ea2   :  { %v12540_v26 = vpop.eup %12539 }
0x1ea3   :  { %v6208_v38 = vmul.f32 %v12540_v26, %v13878_v8 }
0x1ea5   :  { %11790 = vmatmul.mubr.msk.f32.vlgmr.msra.gmra.mrb[74].mxu1 %vm178_vm2, %v6208_v38 }
0x1ea6   :  { %v12542_v54 = vpop.eup %12541  ;;  %11798 = vmatpush3.msra.mxu1 %v6450_v47  ;;  %11799 = vmatprep.mubr.msk.f32.mxu1 %vm12644_vm1, %v12641_v15 }
0x1ea7   :  { %v6206_v6 = vmul.f32 %v12542_v54, %v13882_v16  ;;  %11807 = vmatprep.subr.mxu1 %v12641_v15 }
0x1ea9   :  { %11785 = vmatmul.mubr.msk.f32.vlgmr.msra.gmra.mrb[62].mxu0 %vm178_vm2, %v6206_v6 }
0x1eaa   :  { %11793 = vmatpush3.msra.mxu0 %v6374_v45  ;;  %11794 = vmatprep.mubr.msk.f32.mxu0 %vm12644_vm1, %v12641_v15 }
0x1eab   :  { %11802 = vmatprep.subr.mxu0 %v12641_v15 }
0x1ef0   :  { %v6189_v8 = vpop.xlane.xlu1 %6188 }
0x1ef1   :  { %12543 = vrcp.f32 %v6189_v8 }
0x1ef4   :  { %v6192_v42 = vpop.xlane.xlu0 %6191 }
0x1ef5   :  { %12545 = vrcp.f32 %v6192_v42  ;;  %v6195_v1 = vpop.xlane.xlu1 %6194 }
0x1ef6   :  { %12547 = vrcp.f32 %v6195_v1 }
0x1ef8   :  { %v6198_v3 = vpop.xlane.xlu0 %6197 }
0x1ef9   :  { %12549 = vrcp.f32 %v6198_v3  ;;  %v6201_v57 = vpop.xlane.xlu1 %6200 }
0x1efa   :  { %12551 = vrcp.f32 %v6201_v57 }
0x1efb   :  { %v12544_v16 = vpop.eup %12543 }
0x1efc   :  { %v6204_v7 = vpop.xlane.xlu0 %6203  ;;  %v6210_v24 = vmul.f32 %v12544_v16, %v12528_v27 }
0x1efd   :  { %12553 = vrcp.f32 %v6204_v7  ;;  %v6754_v39 = vpop.permute.xlu1 %6753 }
0x1efe   :  { %11795 = vmatmul.mubr.msk.f32.vlgmr.msra.gmra.mrb[64].mxu0 %vm178_vm2, %v6210_v24 }
0x1eff   :  { %v12546_v58 = vpop.eup %12545  ;;  %11803 = vmatpush3.msra.mxu0 %v6526_v51  ;;  %11804 = vmatprep.mubr.msk.f32.mxu0 %vm12644_vm1, %v12641_v15 }
0x1f00   :  { %v12548_v52 = vpop.eup %12547  ;;  %11812 = vmatprep.subr.mxu0 %v12641_v15  ;;  %v6212_v13 = vmul.f32 %v12546_v58, %v12530_v55  ;;  %v6678_v17 = vpop.permute.xlu0 %6677 }
0x1f01   :  { %v6214_v20 = vmul.f32 %v12548_v52, %v12532_v36  ;;  %v12364_v45 = vpop.permute.xlu1 %12363 }
0x1f02   :  { %11800 = vmatmul.mubr.msk.f32.vlgmr.msra.gmra.mrb[76].mxu1 %vm178_vm2, %v6212_v13  ;;  %v12366_v47 = vunpack.i.h.bf16 %v12364_v45  ;;  %v12365_v51 = vunpack.i.l.bf16 %v12364_v45 }
0x1f03   :  { %v12550_v30 = vpop.eup %12549  ;;  %11805 = vmatmul.mubr.msk.f32.vlgmr.msra.gmra.mrb[66].mxu0 %vm178_vm2, %v6214_v20  ;;  %11808 = vmatpush3.msra.mxu1 %v6602_v25 }
0x1f04   :  { %v12552_v46 = vpop.eup %12551  ;;  %11813 = vmatpush3.msra.mxu0 %v6678_v17  ;;  %11809 = vmatprep.mubr.msk.f32.mxu1 %vm12644_vm1, %v12641_v15  ;;  %v6216_v27 = vmul.f32 %v12550_v30, %v13891_v49  ;;  %v12359_v36 = vpop.permute.xlu0 %12358  ;;  %v12224_v25 = vpack.c.bf16 %v12366_v47, %v12365_v51 }
0x1f05   :  { %11814 = vmatprep.mubr.msk.f32.mxu0 %vm12644_vm1, %v12641_v15  ;;  %11817 = vmatprep.subr.mxu1 %v12641_v15  ;;  %v6218_v43 = vmul.f32 %v12552_v46, %v13893_v14  ;;  %v12361_v44 = vunpack.i.h.bf16 %v12359_v36  ;;  %v12360_v48 = vunpack.i.l.bf16 %v12359_v36 }
0x1f06   :  { %11810 = vmatmul.mubr.msk.f32.vlgmr.msra.gmra.mrb[78].mxu1 %vm178_vm2, %v6216_v27 }
0x1f07   :  { %v12554_v41 = vpop.eup %12553  ;;  %11815 = vmatmul.mubr.msk.f32.vlgmr.msra.gmra.mrb[68].mxu0 %vm178_vm2, %v6218_v43  ;;  %11818 = vmatpush3.msra.mxu1 %v6754_v39  ;;  %v12220_v49 = vpack.c.bf16 %v12361_v44, %v12360_v48  ;;  %v13965_v39 = vld [vmem:[%s14661_s11] sm:$0xff] }
0x1f08   :  { %11819 = vmatprep.mubr.msk.f32.mxu1 %vm12644_vm1, %v12641_v15  ;;  %v6220_v55 = vmul.f32 %v12554_v41, %v13899_v56  ;;  %v6862_v41 = vrot.slane %v13965_v39, %v13079_v21 }
0x1f09   :  { %12221 = vmatprep.subr.bf16.mxu0 %v12220_v49 }
0x1f0a   :  { %11820 = vmatmul.mubr.msk.f32.vlgmr.msra.gmra.mrb[80].mxu1 %vm178_vm2, %v6220_v55  ;;  %12223 = vmatpush3.bf16.msra.mxu0 %v12220_v49 }
0x1f0b   :  { %12225 = vmatprep.subr.bf16.mxu0 %v12224_v25 }
0x1f0e   :  { %12227 = vmatpush3.bf16.msra.mxu0 %v12224_v25 }
0x1f78   :  { %v6369_v14 = vpop.f32.mrb[74].mxu1 }
0x1f79   :  { %v11791_v10 = vpop.f32.mrb[75].mxu1 }
0x1f7c   :  { %v6293_v19 = vpop.f32.mrb[62].mxu0 }
0x1f7d   :  { %v11786_v0 = vpop.f32.mrb[63].mxu0 }
0x1fd1   :  { %v6445_v35 = vpop.f32.mrb[64].mxu0 }
0x1fd2   :  { %6831 = vrot.lane.b32.xlu0 %v6445_v35, %s14676_s3  ;;  %v11796_v56 = vpop.f32.mrb[65].mxu0 }
0x1fd5   :  { %v6521_v18 = vpop.f32.mrb[76].mxu1 }
0x1fd6   :  { %v6597_v26 = vpop.f32.mrb[66].mxu0  ;;  %6833 = vrot.lane.b32.xlu1 %v6521_v18, %s14676_s3  ;;  %v11801_v38 = vpop.f32.mrb[77].mxu1 }
0x1fd7   :  { %6839 = vrot.lane.b32.xlu0 %v6597_v26, %s14674_s6  ;;  %v11806_v54 = vpop.f32.mrb[67].mxu0 }
0x1fd9   :  { %v6673_v6 = vpop.f32.mrb[78].mxu1 }
0x1fda   :  { %v6749_v8 = vpop.f32.mrb[68].mxu0  ;;  %6841 = vrot.lane.b32.xlu1 %v6673_v6, %s14674_s6  ;;  %v11811_v42 = vpop.f32.mrb[79].mxu1  ;;  %v7099_v6 = vld [vmem:[%s14663_s10] sm:$0xff] }
0x1fdb   :  { %6847 = vrot.lane.b32.xlu0 %v6749_v8, %s14675_s20  ;;  %v11816_v1 = vpop.f32.mrb[69].mxu0  ;;  %v7100_v8 = vld [vmem:[%s14663_s10 + $0x8] sm:$0xff]  ;;  %v7101_v42 = vld [vmem:[%s14663_s10 + $0x10] sm:$0xff] }
0x1fdc   :  { %v12236_v1 = vpack.c.bf16 %v7100_v8, %v7099_v6 }
0x1fdd   :  { %v6825_v3 = vpop.f32.mrb[80].mxu1 }
0x1fde   :  { %6849 = vrot.lane.b32.xlu1 %v6825_v3, %s14675_s20  ;;  %v11821_v57 = vpop.f32.mrb[81].mxu1  ;;  %12237 = vmatprep.subr.bf16.mxu0 %v12236_v1 }
0x1fdf   :  { %v7103_v57 = vld [vmem:[%s14663_s10 + $0x20] sm:$0xff] }
0x2044   :  { %v6832_v16 = vpop.permute.xlu0 %6831 }
0x2045   :  { %v6853_v58 = vsel %vm178_vm2, %v6293_v19, %v6832_v16  ;;  %v7104_v16 = vld [vmem:[%s14663_s10 + $0x28] sm:$0xff] }
0x2048   :  { %v6834_v7 = vpop.permute.xlu1 %6833 }
0x2049   :  { %v6840_v24 = vpop.permute.xlu0 %6839  ;;  %v6854_v30 = vsel %vm178_vm2, %v6369_v14, %v6834_v7  ;;  %v12244_v7 = vpack.c.bf16 %v7104_v16, %v7103_v57 }
0x204a   :  { %v6855_v13 = vsel %vm1525_vm5, %v6853_v58, %v6840_v24 }
0x204c   :  { %v6842_v52 = vpop.permute.xlu1 %6841 }
0x204d   :  { %v6848_v17 = vpop.permute.xlu0 %6847  ;;  %v6856_v46 = vsel %vm1525_vm5, %v6854_v30, %v6842_v52 }
0x204e   :  { %v6857_v20 = vsel %vm1528_vm6, %v6855_v13, %v6848_v17 }
0x204f   :  { %11830 = vmatprep.mubr.msk.f32.mxu0 %vm80_vm0, %v6857_v20 }
0x2050   :  { %v6850_v27 = vpop.permute.xlu1 %6849 }
0x2051   :  { %v6858_v43 = vsel %vm1528_vm6, %v6856_v46, %v6850_v27 }
0x2052   :  { %11831 = vmatmul.mubr.msk.f32.vlgmr.msra.gmra.mrb[70].mxu0 %vm80_vm0, %v6858_v43 }
0x2053   :  { %12239 = vmatpush3.bf16.msra.mxu0 %v12236_v1 }
0x2125   :  { %v11832_v55 = vpop.f32.mrb[70].mxu0 }
0x2126   :  { %v6957_v36 = vadd.f32 %v11832_v55, %v6862_v41  ;;  %v6951_v44 = vpop.f32.mrb[71].mxu0 }
0x2127   :  { %v6952_v48 = vadd.f32 %v6951_v44, %v6862_v41  ;;  %v14000_v41 = vld [vmem:[%s14661_s11 + $0x8] sm:$0xff] }
0x2128   :  { %v6961_v49 = vadd.f32 %v6957_v36, %v13769_v28  ;;  %v6991_v44 = vrot.slane %v14000_v41, %v12775_v11 }
0x2129   :  { %v6960_v14 = vadd.f32 %v6952_v48, %v13765_v40 }
0x212a   :  { %v6965_v10 = vsel %vm80_vm0, %v6961_v49, 0.0 }
0x212b   :  { %6966 = vadd.xlane.f32.xlu1 %v6965_v10  ;;  %v6962_v19 = vsel %vm80_vm0, %v6960_v14, 0.0  ;;  %v6997_v10 = vrot.slane %v14000_v41, %v13010_v32 }
0x212c   :  { %6963 = vadd.xlane.f32.xlu0 %v6962_v19 }
0x213c   :  { %12368 = vrot.lane.b32.xlu1 %v13919_v59, %s12647_s2 }
0x21b8   :  { %v6967_v0 = vpop.xlane.xlu1 %6966 }
0x21b9   :  { %v6969_v45 = vmul.f32 0.03125, %v6967_v0  ;;  %v6964_v47 = vpop.xlane.xlu0 %6963 }
0x21ba   :  { %v6968_v51 = vmul.f32 0.03125, %v6964_v47  ;;  %v7105_v47 = vld [vmem:[%s14663_s10 + $0x30] sm:$0xff] }
0x21bb   :  { %v6971_v25 = vsub.f32 %v6961_v49, %v6969_v45 }
0x21bc   :  { %v6970_v35 = vsub.f32 %v6960_v14, %v6968_v51  ;;  %v12369_v26 = vpop.permute.xlu1 %12368  ;;  %v7106_v51 = vld [vmem:[%s14663_s10 + $0x38] sm:$0xff] }
0x21bd   :  { %v6973_v56 = vmul.f32 %v6971_v25, %v6971_v25  ;;  %v12371_v38 = vunpack.i.h.bf16 %v12369_v26  ;;  %v12370_v59 = vunpack.i.l.bf16 %v12369_v26 }
0x21be   :  { %v6972_v18 = vmul.f32 %v6970_v35, %v6970_v35 }
0x21bf   :  { %v6977_v28 = vsel %vm80_vm0, %v6973_v56, 0.0  ;;  %v12228_v54 = vpack.c.bf16 %v12371_v38, %v12370_v59  ;;  %v7110_v59 = vrot.slane %v13965_v39, %v13054_v63 }
0x21c0   :  { %6978 = vadd.xlane.f32.xlu0 %v6977_v28  ;;  %v6974_v40 = vsel %vm80_vm0, %v6972_v18, 0.0 }
0x21c1   :  { %12229 = vmatprep.subr.bf16.mxu1 %v12228_v54 }
0x21c2   :  { %12231 = vmatpush3.bf16.msra.mxu1 %v12228_v54 }
0x21c4   :  { %6975 = vadd.xlane.f32.xlu0 %v6974_v40 }
0x21da   :  { %12373 = vrot.lane.b32.xlu0 %v13923_v31, %s12647_s2  ;;  %v7102_v31 = vld [vmem:[%s14663_s10 + $0x18] sm:$0xff] }
0x21db   :  { %v12240_v3 = vpack.c.bf16 %v7102_v31, %v7101_v42 }
0x21dd   :  { %12241 = vmatprep.subr.bf16.mxu0 %v12240_v3 }
0x21de   :  { %12243 = vmatpush3.bf16.msra.mxu0 %v12240_v3 }
0x21df   :  { %12245 = vmatprep.subr.bf16.mxu0 %v12244_v7 }
0x21e2   :  { %12247 = vmatpush3.bf16.msra.mxu0 %v12244_v7 }
0x224d   :  { %v6979_v24 = vpop.xlane.xlu0 %6978 }
0x224e   :  { %v6981_v58 = vmul.f32 0.03125, %v6979_v24 }
0x2250   :  { %v6983_v52 = vadd.f32 1e-05, %v6981_v58 }
0x2251   :  { %v6976_v13 = vpop.xlane.xlu0 %6975 }
0x2252   :  { %12555 = vrsqrt.f32 %v6983_v52  ;;  %v6980_v17 = vmul.f32 0.03125, %v6976_v13 }
0x2254   :  { %v6982_v20 = vadd.f32 1e-05, %v6980_v17 }
0x2255   :  { %v12374_v30 = vpop.permute.xlu0 %12373 }
0x2256   :  { %12557 = vrsqrt.f32 %v6982_v20  ;;  %v12376_v46 = vunpack.i.h.bf16 %v12374_v30  ;;  %v12375_v27 = vunpack.i.l.bf16 %v12374_v30 }
0x2258   :  { %v12232_v43 = vpack.c.bf16 %v12376_v46, %v12375_v27  ;;  %v14030_v46 = vld [vmem:[%s14658_s7 + $0x40] sm:$0xff]  ;;  %v14035_v27 = vld [vmem:[%s14658_s7 + $0x50] sm:$0xff] }
0x225a   :  { %12233 = vmatprep.subr.bf16.mxu1 %v12232_v43 }
0x225b   :  { %12235 = vmatpush3.bf16.msra.mxu1 %v12232_v43  ;;  %v12377_v43 = vpack.i.bf16 %v14035_v27, %v14030_v46 }
0x225c   :  { %v12556_v55 = vpop.eup %12555 }
0x225d   :  { %v6987_v36 = vmul.f32 %v12556_v55, %v6971_v25  ;;  %v12248_v25 = vpack.c.bf16 %v7106_v51, %v7105_v47  ;;  %v12252_v55 = vpack.c.bf16 %v14035_v27, %v14030_v46  ;;  %v7223_v51 = vrot.slane %v14000_v41, %v13070_v23 }
0x225f   :  { %v6993_v14 = vmul.f32 %v6991_v44, %v6987_v36  ;;  %12249 = vmatprep.subr.bf16.mxu0 %v12248_v25  ;;  %v14044_v36 = vld [vmem:[%s14658_s7 + $0x60] sm:$0xff]  ;;  %12253 = vmatprep.subr.bf16.mxu1 %v12252_v55 }
0x2260   :  { %v12558_v48 = vpop.eup %12557  ;;  %12251 = vmatpush3.bf16.msra.mxu0 %v12248_v25 }
0x2261   :  { %v6986_v49 = vmul.f32 %v12558_v48, %v6970_v35  ;;  %v6999_v45 = vadd.f32 %v6997_v10, %v6993_v14  ;;  %11884 = vmatprep.subr.mxu0 %v12641_v15  ;;  %v7003_v35 = vrot.slane %v13965_v39, %v13051_v62 }
0x2263   :  { %v6992_v19 = vmul.f32 %v6991_v44, %v6986_v49  ;;  %v14049_v44 = vld [vmem:[%s14658_s7 + $0x70] sm:$0xff] }
0x2264   :  { %v12382_v48 = vpack.i.bf16 %v14049_v44, %v14044_v36  ;;  %v12256_v49 = vpack.c.bf16 %v14049_v44, %v14044_v36 }
0x2265   :  { %v6998_v0 = vadd.f32 %v6997_v10, %v6992_v19 }
0x2267   :  { %11841 = vmatprep.mubr.msk.f32.mxu1 %vm80_vm0, %v6998_v0 }
0x2268   :  { %11842 = vmatmul.mubr.msk.f32.vlgmr.msra.gmra.mrb[82].mxu1 %vm80_vm0, %v6999_v45 }
0x2269   :  { %12255 = vmatpush3.bf16.msra.mxu1 %v12252_v55 }
0x226a   :  { %12257 = vmatprep.subr.bf16.mxu1 %v12256_v49 }
0x226d   :  { %12259 = vmatpush3.bf16.msra.mxu1 %v12256_v49 }
0x226e   :  { %11874 = vmatprep.subr.mxu1 %v12641_v15 }
0x233b   :  { %v11843_v56 = vpop.f32.mrb[82].mxu1 }
0x233c   :  { %v7094_v28 = vadd.f32 %v11843_v56, %v7003_v35  ;;  %v7088_v18 = vpop.f32.mrb[83].mxu1 }
0x233d   :  { %v7089_v40 = vadd.f32 %v7088_v18, %v7003_v35  ;;  %v7229_v18 = vrot.slane %v14000_v41, %v13079_v21 }
0x233e   :  { %v7098_v38 = vmax.f32 %v7094_v28, 0.0 }
0x233f   :  { %v7097_v26 = vmax.f32 %v7089_v40, 0.0 }
0x2341   :  { %11860 = vmatprep.mubr.msk.f32.mxu0 %vm1772_vm7, %v7097_v26 }
0x2342   :  { %11861 = vmatmul.mubr.msk.f32.vlgmr.msra.gmra.mrb[72].mxu0 %vm1772_vm7, %v7098_v38 }
0x2343   :  { %11886 = vmatprep.mubr.msk.f32.mxu0 %vm12644_vm1, %v12641_v15 }
0x2415   :  { %v11862_v54 = vpop.f32.mrb[72].mxu0 }
0x2416   :  { %v7189_v6 = vadd.f32 %v11862_v54, %v7110_v59  ;;  %v7183_v8 = vpop.f32.mrb[73].mxu0  ;;  %v14073_v54 = vld [vmem:[%s14661_s11 + $0x10] sm:$0xff] }
0x2417   :  { %v7184_v42 = vadd.f32 %v7183_v8, %v7110_v59  ;;  %v7247_v41 = vrot.slane %v14073_v54, %v12775_v11 }
0x2418   :  { %v7193_v1 = vadd.f32 %v7189_v6, %v6999_v45 }
0x2419   :  { %v7192_v31 = vadd.f32 %v7184_v42, %v6998_v0 }
0x241a   :  { %v7197_v3 = vsel %vm80_vm0, %v7193_v1, 0.0 }
0x241b   :  { %7198 = vadd.xlane.f32.xlu0 %v7197_v3  ;;  %v7194_v57 = vsel %vm80_vm0, %v7192_v31, 0.0 }
0x241c   :  { %7195 = vadd.xlane.f32.xlu1 %v7194_v57 }
0x24a8   :  { %v7199_v16 = vpop.xlane.xlu0 %7198 }
0x24a9   :  { %v7201_v7 = vmul.f32 0.03125, %v7199_v16  ;;  %v7196_v24 = vpop.xlane.xlu1 %7195 }
0x24aa   :  { %v7200_v58 = vmul.f32 0.03125, %v7196_v24 }
0x24ab   :  { %v7203_v52 = vsub.f32 %v7193_v1, %v7201_v7 }
0x24ac   :  { %v7202_v13 = vsub.f32 %v7192_v31, %v7200_v58 }
0x24ad   :  { %v7205_v17 = vmul.f32 %v7203_v52, %v7203_v52 }
0x24ae   :  { %v7204_v39 = vmul.f32 %v7202_v13, %v7202_v13 }
0x24af   :  { %v7209_v20 = vsel %vm80_vm0, %v7205_v17, 0.0 }
0x24b0   :  { %7210 = vadd.xlane.f32.xlu0 %v7209_v20  ;;  %v7206_v30 = vsel %vm80_vm0, %v7204_v39, 0.0 }
0x24b1   :  { %7207 = vadd.xlane.f32.xlu1 %v7206_v30 }
0x253d   :  { %v7211_v14 = vpop.xlane.xlu0 %7210 }
0x253e   :  { %v7213_v10 = vmul.f32 0.03125, %v7211_v14  ;;  %v7208_v19 = vpop.xlane.xlu1 %7207 }
0x253f   :  { %v7212_v0 = vmul.f32 0.03125, %v7208_v19 }
0x2540   :  { %v7215_v45 = vadd.f32 1e-05, %v7213_v10 }
0x2541   :  { %v7214_v47 = vadd.f32 1e-05, %v7212_v0 }
0x2542   :  { %12559 = vrsqrt.f32 %v7215_v45 }
0x2543   :  { %12561 = vrsqrt.f32 %v7214_v47 }
0x254c   :  { %v12560_v25 = vpop.eup %12559 }
0x254d   :  { %v12562_v35 = vpop.eup %12561  ;;  %v7219_v56 = vmul.f32 %v12560_v25, %v7203_v52 }
0x254e   :  { %v7218_v28 = vmul.f32 %v12562_v35, %v7202_v13 }
0x254f   :  { %v7225_v40 = vmul.f32 %v7223_v51, %v7219_v56 }
0x2550   :  { %v7224_v26 = vmul.f32 %v7223_v51, %v7218_v28 }
0x2551   :  { %v14062_v59 = vadd.f32 %v7229_v18, %v7225_v40 }
0x2552   :  { %v14060_v38 = vadd.f32 %v7229_v18, %v7224_v26 }
0x2554   :  { %11871 = vmatprep.mubr.msk.f32.mxu1 %vm80_vm0, %v14060_v38 }
0x2555   :  { %11872 = vmatmul.mubr.msk.f32.vlgmr.msra.gmra.mrb[84].mxu1 %vm80_vm0, %v14062_v59 }
0x2556   :  { %11876 = vmatprep.mubr.msk.f32.mxu1 %vm12644_vm1, %v12641_v15 }
0x2628   :  { %v11873_v6 = vpop.f32.mrb[84].mxu1 }
0x2629   :  { %v14077_v8 = vadd.f32 %v11873_v6, %v7247_v41  ;;  %v7320_v42 = vpop.f32.mrb[85].mxu1 }
0x262a   :  { %v14079_v1 = vadd.f32 %v7320_v42, %v7247_v41 }
0x262b   :  { %7333 = vrot.lane.b32.xlu0 %v14077_v8, %s12643_s17 }
0x262c   :  { %7331 = vrot.lane.b32.xlu1 %v14079_v1, %s12643_s17 }
0x262f   :  { %7339 = vrot.lane.b32.xlu0 %v14079_v1, %s12645_s18 }
0x2630   :  { %7335 = vrot.lane.b32.xlu1 %v14079_v1, %s12642_s0 }
0x2633   :  { %7343 = vrot.lane.b32.xlu0 %v14079_v1, %s12646_s19 }
0x2634   :  { %7337 = vrot.lane.b32.xlu1 %v14077_v8, %s12642_s0 }
0x2638   :  { %7341 = vrot.lane.b32.xlu1 %v14077_v8, %s12645_s18 }
0x263c   :  { %7419 = vrot.lane.b32.xlu1 %v14077_v8, %s12646_s19 }
0x269d   :  { %v14097_v31 = vpop.permute.xlu0 %7333 }
0x269e   :  { %7571 = vrot.lane.b32.xlu1 %v14097_v31, %s12646_s19  ;;  %v14101_v3 = vpop.permute.xlu1 %7331 }
0x269f   :  { %7495 = vrot.lane.b32.xlu0 %v14101_v3, %s12646_s19 }
0x26a1   :  { %v14105_v57 = vpop.permute.xlu0 %7339 }
0x26a2   :  { %v14107_v16 = vpop.permute.xlu1 %7335 }
0x26a3   :  { %7647 = vrot.lane.b32.xlu0 %v14107_v16, %s12646_s19 }
0x26a5   :  { %v7344_v7 = vpop.permute.xlu0 %7343 }
0x26a6   :  { %11875 = vmatpush3.xpose.msk.msra.mxu1 %vm178_vm2, %v7344_v7  ;;  %v14112_v24 = vpop.permute.xlu1 %7337 }
0x26a7   :  { %7799 = vrot.lane.b32.xlu0 %v14105_v57, %s12646_s19  ;;  %7723 = vrot.lane.b32.xlu1 %v14112_v24, %s12646_s19 }
0x26a8   :  { %11879 = vmatprep.subr.mxu1 %v12641_v15 }
0x26a9   :  { %11877 = vmatmul.mubr.msk.f32.vlgmr.msra.gmra.mrb[86].mxu1 %vm178_vm2, %v14079_v1 }
0x26aa   :  { %v14121_v58 = vpop.permute.xlu1 %7341  ;;  %11881 = vmatprep.mubr.msk.f32.mxu1 %vm12644_vm1, %v12641_v15 }
0x26ab   :  { %7875 = vrot.lane.b32.xlu1 %v14121_v58, %s12646_s19 }
0x26ae   :  { %v7420_v52 = vpop.permute.xlu1 %7419 }
0x26af   :  { %11880 = vmatpush3.xpose.msk.msra.mxu1 %vm178_vm2, %v7420_v52 }
0x26b0   :  { %11889 = vmatprep.subr.mxu1 %v12641_v15 }
0x26b2   :  { %11882 = vmatmul.mubr.msk.f32.vlgmr.msra.gmra.mrb[88].mxu1 %vm178_vm2, %v14077_v8 }
0x26b3   :  { %11891 = vmatprep.mubr.msk.f32.mxu1 %vm12644_vm1, %v12641_v15 }
0x2710   :  { %v7572_v13 = vpop.permute.xlu1 %7571 }
0x2711   :  { %v7496_v17 = vpop.permute.xlu0 %7495  ;;  %11890 = vmatpush3.xpose.msk.msra.mxu1 %vm178_vm2, %v7572_v13 }
0x2712   :  { %11885 = vmatpush3.xpose.msk.msra.mxu0 %vm178_vm2, %v7496_v17  ;;  %11899 = vmatprep.subr.mxu1 %v12641_v15 }
0x2713   :  { %11894 = vmatprep.subr.mxu0 %v12641_v15 }
0x2714   :  { %11892 = vmatmul.mubr.msk.f32.vlgmr.msra.gmra.mrb[90].mxu1 %vm178_vm2, %v14097_v31 }
0x2715   :  { %11887 = vmatmul.mubr.msk.f32.vlgmr.msra.gmra.mrb[74].mxu0 %vm178_vm2, %v14101_v3  ;;  %v7648_v39 = vpop.permute.xlu0 %7647  ;;  %11901 = vmatprep.mubr.msk.f32.mxu1 %vm12644_vm1, %v12641_v15 }
0x2716   :  { %11895 = vmatpush3.xpose.msk.msra.mxu0 %vm178_vm2, %v7648_v39  ;;  %11896 = vmatprep.mubr.msk.f32.mxu0 %vm12644_vm1, %v12641_v15 }
0x2717   :  { %11904 = vmatprep.subr.mxu0 %v12641_v15 }
0x2719   :  { %11897 = vmatmul.mubr.msk.f32.vlgmr.msra.gmra.mrb[76].mxu0 %vm178_vm2, %v14107_v16  ;;  %v7800_v20 = vpop.permute.xlu0 %7799  ;;  %v7724_v30 = vpop.permute.xlu1 %7723 }
0x271a   :  { %11900 = vmatpush3.xpose.msk.msra.mxu1 %vm178_vm2, %v7724_v30  ;;  %11905 = vmatpush3.xpose.msk.msra.mxu0 %vm178_vm2, %v7800_v20 }
0x271b   :  { %11906 = vmatprep.mubr.msk.f32.mxu0 %vm12644_vm1, %v12641_v15  ;;  %11909 = vmatprep.subr.mxu1 %v12641_v15 }
0x271c   :  { %11914 = vmatprep.subr.mxu0 %v12641_v15 }
0x271d   :  { %11902 = vmatmul.mubr.msk.f32.vlgmr.msra.gmra.mrb[92].mxu1 %vm178_vm2, %v14112_v24  ;;  %11907 = vmatmul.mubr.msk.f32.vlgmr.msra.gmra.mrb[78].mxu0 %vm178_vm2, %v14105_v57  ;;  %v7876_v55 = vpop.permute.xlu1 %7875 }
0x271e   :  { %11910 = vmatpush3.xpose.msk.msra.mxu1 %vm178_vm2, %v7876_v55  ;;  %11911 = vmatprep.mubr.msk.f32.mxu1 %vm12644_vm1, %v12641_v15 }
0x271f   :  { %11919 = vmatprep.subr.mxu1 %v12641_v15  ;;  %11916 = vmatprep.mubr.msk.f32.mxu0 %vm12644_vm1, %v12641_v15 }
0x2721   :  { %11912 = vmatmul.mubr.msk.f32.vlgmr.msra.gmra.mrb[94].mxu1 %vm178_vm2, %v14121_v58 }
0x2722   :  { %11921 = vmatprep.mubr.msk.f32.mxu1 %vm12644_vm1, %v12641_v15 }
0x277c   :  { %v7415_v49 = vpop.f32.mrb[86].mxu1 }
0x277d   :  { %v7951_v14 = vmul.f32 0.35355338, %v7415_v49  ;;  %v11878_v10 = vpop.f32.mrb[87].mxu1 }
0x277f   :  { %v7959_v19 = vsel %vm4535_vm8, %v7951_v14, -1e+10 }
0x2780   :  { %v7967_v0 = vsel %vm178_vm2, %v7959_v19, -inf }
0x2781   :  { %7968 = vmax.xlane.f32.xlu0 %v7967_v0 }
0x2785   :  { %v7491_v45 = vpop.f32.mrb[88].mxu1 }
0x2786   :  { %v7952_v47 = vmul.f32 0.35355338, %v7491_v45  ;;  %v11883_v51 = vpop.f32.mrb[89].mxu1 }
0x2788   :  { %v7960_v25 = vsel %vm4536_vm9, %v7952_v47, -1e+10 }
0x2789   :  { %v7970_v35 = vsel %vm178_vm2, %v7960_v25, -inf }
0x278a   :  { %7971 = vmax.xlane.f32.xlu1 %v7970_v35 }
0x27e7   :  { %v7643_v56 = vpop.f32.mrb[90].mxu1 }
0x27e8   :  { %v7567_v28 = vpop.f32.mrb[74].mxu0  ;;  %v11893_v18 = vpop.f32.mrb[91].mxu1  ;;  %v7954_v40 = vmul.f32 0.35355338, %v7643_v56 }
0x27e9   :  { %v7953_v26 = vmul.f32 0.35355338, %v7567_v28  ;;  %v11888_v41 = vpop.f32.mrb[75].mxu0 }
0x27ea   :  { %v7962_v52 = vsel %vm4536_vm9, %v7954_v40, -1e+10 }
0x27eb   :  { %v7961_v6 = vsel %vm4535_vm8, %v7953_v26, -1e+10  ;;  %v7976_v49 = vsel %vm178_vm2, %v7962_v52, -inf }
0x27ec   :  { %v7719_v42 = vpop.f32.mrb[76].mxu0  ;;  %v7973_v7 = vsel %vm178_vm2, %v7961_v6, -inf }
0x27ed   :  { %v7955_v13 = vmul.f32 0.35355338, %v7719_v42  ;;  %7974 = vmax.xlane.f32.xlu0 %v7973_v7  ;;  %v11898_v17 = vpop.f32.mrb[77].mxu0 }
0x27ef   :  { %v7963_v39 = vsel %vm4535_vm8, %v7955_v13, -1e+10 }
0x27f0   :  { %v7795_v20 = vpop.f32.mrb[92].mxu1  ;;  %v7871_v30 = vpop.f32.mrb[78].mxu0  ;;  %v7979_v55 = vsel %vm178_vm2, %v7963_v39, -inf }
0x27f1   :  { %v7956_v14 = vmul.f32 0.35355338, %v7795_v20  ;;  %v7957_v10 = vmul.f32 0.35355338, %v7871_v30  ;;  %v11908_v0 = vpop.f32.mrb[79].mxu0  ;;  %7980 = vmax.xlane.f32.xlu1 %v7979_v55  ;;  %7977 = vmax.xlane.f32.xlu0 %v7976_v49  ;;  %v11903_v45 = vpop.f32.mrb[93].mxu1 }
0x27f3   :  { %v7964_v47 = vsel %vm4536_vm9, %v7956_v14, -1e+10  ;;  %v7965_v51 = vsel %vm4535_vm8, %v7957_v10, -1e+10 }
0x27f4   :  { %v7947_v35 = vpop.f32.mrb[94].mxu1  ;;  %v7985_v56 = vsel %vm178_vm2, %v7965_v51, -inf  ;;  %v7982_v28 = vsel %vm178_vm2, %v7964_v47, -inf }
0x27f5   :  { %v7958_v18 = vmul.f32 0.35355338, %v7947_v35  ;;  %7986 = vmax.xlane.f32.xlu1 %v7985_v56  ;;  %7983 = vmax.xlane.f32.xlu0 %v7982_v28  ;;  %v11913_v40 = vpop.f32.mrb[95].mxu1 }
0x27f7   :  { %v7966_v26 = vsel %vm4536_vm9, %v7958_v18, -1e+10 }
0x27f8   :  { %v7988_v41 = vsel %vm178_vm2, %v7966_v26, -inf }
0x27f9   :  { %7989 = vmax.xlane.f32.xlu0 %v7988_v41 }
0x2806   :  { %8055 = vrot.lane.b32.xlu1 %v14079_v1, %s12647_s2 }
0x280a   :  { %8207 = vrot.lane.b32.xlu1 %v14101_v3, %s12647_s2 }
0x280e   :  { %8283 = vrot.lane.b32.xlu1 %v14097_v31, %s12647_s2  ;;  %v7969_v42 = vpop.xlane.xlu0 %7968 }
0x280f   :  { %8131 = vrot.lane.b32.xlu0 %v14077_v8, %s12647_s2  ;;  %v7991_v7 = vsub.f32 %v7959_v19, %v7969_v42 }
0x2811   :  { %v7999_v13 = vmul.f32 1.442695, %v7991_v7 }
0x2812   :  { %8435 = vrot.lane.b32.xlu1 %v14112_v24, %s12647_s2 }
0x2813   :  { %8359 = vrot.lane.b32.xlu0 %v14107_v16, %s12647_s2 }
0x2817   :  { %v7972_v5 = vpop.xlane.xlu1 %7971 }
0x2818   :  { %v7992_v34 = vsub.f32 %v7960_v25, %v7972_v5 }
0x281a   :  { %v8001_v1 = vmul.f32 1.442695, %v7992_v34 }
0x281c   :  { %12563 = vpow2.f32 %v8001_v1 }
0x281d   :  { %12565 = vpow2.f32 %v7999_v13 }
0x2826   :  { %v14205_v3 = vpop.eup %12563 }
0x2827   :  { %v8018_v31 = vsel %vm178_vm2, %v14205_v3, 0.0  ;;  %v14209_v8 = vpop.eup %12565 }
0x2828   :  { %v8015_v24 = vsel %vm178_vm2, %v14209_v8, 0.0 }
0x2832   :  { %8019 = vadd.xlane.f32.xlu0 %v8018_v31 }
0x2836   :  { %8016 = vadd.xlane.f32.xlu1 %v8015_v24 }
0x287a   :  { %v7975_v16 = vpop.xlane.xlu0 %7974 }
0x287b   :  { %v7993_v25 = vsub.f32 %v7961_v6, %v7975_v16 }
0x287d   :  { %v8003_v17 = vmul.f32 1.442695, %v7993_v25 }
0x287e   :  { %v7978_v19 = vpop.xlane.xlu0 %7977  ;;  %v7981_v20 = vpop.xlane.xlu1 %7980 }
0x287f   :  { %12567 = vpow2.f32 %v8003_v17  ;;  %v7994_v30 = vsub.f32 %v7962_v52, %v7978_v19  ;;  %v7995_v55 = vsub.f32 %v7963_v39, %v7981_v20 }
0x2881   :  { %v8005_v49 = vmul.f32 1.442695, %v7994_v30  ;;  %v8007_v14 = vmul.f32 1.442695, %v7995_v55 }
0x2882   :  { %v7984_v10 = vpop.xlane.xlu0 %7983  ;;  %v7987_v0 = vpop.xlane.xlu1 %7986 }
0x2883   :  { %12569 = vpow2.f32 %v8005_v49  ;;  %v7996_v45 = vsub.f32 %v7964_v47, %v7984_v10  ;;  %v7997_v35 = vsub.f32 %v7965_v51, %v7987_v0 }
0x2884   :  { %12571 = vpow2.f32 %v8007_v14 }
0x2885   :  { %v8009_v56 = vmul.f32 1.442695, %v7996_v45  ;;  %v8011_v28 = vmul.f32 1.442695, %v7997_v35 }
0x2886   :  { %v7990_v18 = vpop.xlane.xlu0 %7989  ;;  %v8056_v40 = vpop.permute.xlu1 %8055 }
0x2887   :  { %12573 = vpow2.f32 %v8009_v56  ;;  %v7998_v6 = vsub.f32 %v7966_v26, %v7990_v18  ;;  %11915 = vmatpush3.msra.mxu0 %v8056_v40 }
0x2888   :  { %12575 = vpow2.f32 %v8011_v28  ;;  %11924 = vmatprep.subr.mxu0 %v12641_v15 }
0x2889   :  { %v12568_v52 = vpop.eup %12567  ;;  %v8013_v39 = vmul.f32 1.442695, %v7998_v6 }
0x288a   :  { %v8132_v41 = vpop.permute.xlu0 %8131  ;;  %v8021_v5 = vsel %vm178_vm2, %v12568_v52, 0.0  ;;  %v8208_v16 = vpop.permute.xlu1 %8207 }
0x288b   :  { %12577 = vpow2.f32 %v8013_v39  ;;  %8022 = vadd.xlane.f32.xlu1 %v8021_v5  ;;  %11920 = vmatpush3.msra.mxu1 %v8132_v41 }
0x288c   :  { %11929 = vmatprep.subr.mxu1 %v12641_v15 }
0x288d   :  { %v12570_v47 = vpop.eup %12569 }
0x288e   :  { %v12572_v51 = vpop.eup %12571  ;;  %v8024_v34 = vsel %vm178_vm2, %v12570_v47, 0.0  ;;  %v8284_v25 = vpop.permute.xlu1 %8283 }
0x288f   :  { %8025 = vadd.xlane.f32.xlu0 %v8024_v34  ;;  %v8027_v26 = vsel %vm178_vm2, %v12572_v51, 0.0  ;;  %v8360_v17 = vpop.permute.xlu0 %8359 }
0x2890   :  { %8028 = vadd.xlane.f32.xlu1 %v8027_v26 }
0x2891   :  { %v12574_v42 = vpop.eup %12573 }
0x2892   :  { %v14218_v7 = vpop.eup %12575  ;;  %v8030_v1 = vsel %vm178_vm2, %v12574_v42, 0.0  ;;  %v8436_v19 = vpop.permute.xlu1 %8435 }
0x2893   :  { %8031 = vadd.xlane.f32.xlu0 %v8030_v1  ;;  %v8033_v13 = vsel %vm178_vm2, %v14218_v7, 0.0 }
0x2894   :  { %8034 = vadd.xlane.f32.xlu1 %v8033_v13 }
0x2895   :  { %v14223_v31 = vpop.eup %12577 }
0x2896   :  { %v8036_v24 = vsel %vm178_vm2, %v14223_v31, 0.0 }
0x2897   :  { %8037 = vadd.xlane.f32.xlu0 %v8036_v24 }
0x28a5   :  { %8587 = vrot.lane.b32.xlu1 %v14121_v58, %s12647_s2 }
0x28a9   :  { %12383 = vrot.lane.b32.xlu1 %v12382_v48, %s12648_s24 }
0x28ad   :  { %8511 = vrot.lane.b32.xlu0 %v14105_v57, %s12647_s2 }
0x28b1   :  { %12378 = vrot.lane.b32.xlu0 %v12377_v43, %s12648_s24 }
0x28bf   :  { %v8020_v20 = vpop.xlane.xlu0 %8019 }
0x28c0   :  { %12579 = vrcp.f32 %v8020_v20 }
0x28c3   :  { %v8017_v58 = vpop.xlane.xlu1 %8016 }
0x28c4   :  { %12581 = vrcp.f32 %v8017_v58 }
0x28ca   :  { %v12580_v30 = vpop.eup %12579 }
0x28cb   :  { %v8042_v36 = vmul.f32 %v12580_v30, %v14205_v3 }
0x28cd   :  { %11922 = vmatmul.mubr.msk.f32.vlgmr.msra.gmra.mrb[96].mxu1 %vm178_vm2, %v8042_v36 }
0x28ce   :  { %v12582_v44 = vpop.eup %12581  ;;  %11930 = vmatpush3.msra.mxu1 %v8284_v25  ;;  %11931 = vmatprep.mubr.msk.f32.mxu1 %vm12644_vm1, %v12641_v15 }
0x28cf   :  { %v8040_v46 = vmul.f32 %v12582_v44, %v14209_v8  ;;  %11939 = vmatprep.subr.mxu1 %v12641_v15 }
0x28d1   :  { %11917 = vmatmul.mubr.msk.f32.vlgmr.msra.gmra.mrb[80].mxu0 %vm178_vm2, %v8040_v46 }
0x28d2   :  { %11925 = vmatpush3.msra.mxu0 %v8208_v16  ;;  %11926 = vmatprep.mubr.msk.f32.mxu0 %vm12644_vm1, %v12641_v15 }
0x28d3   :  { %11934 = vmatprep.subr.mxu0 %v12641_v15 }
0x2918   :  { %v8023_v27 = vpop.xlane.xlu1 %8022 }
0x2919   :  { %12583 = vrcp.f32 %v8023_v27 }
0x291c   :  { %v8026_v43 = vpop.xlane.xlu0 %8025 }
0x291d   :  { %12585 = vrcp.f32 %v8026_v43  ;;  %v8029_v48 = vpop.xlane.xlu1 %8028 }
0x291e   :  { %12587 = vrcp.f32 %v8029_v48 }
0x2920   :  { %v8032_v57 = vpop.xlane.xlu0 %8031 }
0x2921   :  { %12589 = vrcp.f32 %v8032_v57  ;;  %v8035_v3 = vpop.xlane.xlu1 %8034 }
0x2922   :  { %12591 = vrcp.f32 %v8035_v3 }
0x2923   :  { %v12584_v8 = vpop.eup %12583 }
0x2924   :  { %v8044_v55 = vmul.f32 %v12584_v8, %v12568_v52  ;;  %v8038_v49 = vpop.xlane.xlu0 %8037 }
0x2925   :  { %12593 = vrcp.f32 %v8038_v49  ;;  %v8588_v6 = vpop.permute.xlu1 %8587 }
0x2926   :  { %11927 = vmatmul.mubr.msk.f32.vlgmr.msra.gmra.mrb[82].mxu0 %vm178_vm2, %v8044_v55 }
0x2927   :  { %v12586_v14 = vpop.eup %12585  ;;  %11935 = vmatpush3.msra.mxu0 %v8360_v17  ;;  %11936 = vmatprep.mubr.msk.f32.mxu0 %vm12644_vm1, %v12641_v15 }
0x2928   :  { %v12588_v10 = vpop.eup %12587  ;;  %v8046_v0 = vmul.f32 %v12586_v14, %v12570_v47  ;;  %11944 = vmatprep.subr.mxu0 %v12641_v15  ;;  %v8512_v35 = vpop.permute.xlu0 %8511 }
0x2929   :  { %v8048_v45 = vmul.f32 %v12588_v10, %v12572_v51  ;;  %v12384_v1 = vpop.permute.xlu1 %12383 }
0x292a   :  { %11932 = vmatmul.mubr.msk.f32.vlgmr.msra.gmra.mrb[98].mxu1 %vm178_vm2, %v8046_v0  ;;  %v12386_v13 = vunpack.i.h.bf16 %v12384_v1  ;;  %v12385_v24 = vunpack.i.l.bf16 %v12384_v1 }
0x292b   :  { %v12590_v56 = vpop.eup %12589  ;;  %11937 = vmatmul.mubr.msk.f32.vlgmr.msra.gmra.mrb[84].mxu0 %vm178_vm2, %v8048_v45  ;;  %11940 = vmatpush3.msra.mxu1 %v8436_v19 }
0x292c   :  { %v12592_v28 = vpop.eup %12591  ;;  %v8050_v18 = vmul.f32 %v12590_v56, %v12574_v42  ;;  %11945 = vmatpush3.msra.mxu0 %v8512_v35  ;;  %11941 = vmatprep.mubr.msk.f32.mxu1 %vm12644_vm1, %v12641_v15  ;;  %v12379_v41 = vpop.permute.xlu0 %12378  ;;  %v12264_v16 = vpack.c.bf16 %v12386_v13, %v12385_v24 }
0x292d   :  { %v8052_v40 = vmul.f32 %v12592_v28, %v14218_v7  ;;  %11946 = vmatprep.mubr.msk.f32.mxu0 %vm12644_vm1, %v12641_v15  ;;  %11949 = vmatprep.subr.mxu1 %v12641_v15  ;;  %v12381_v5 = vunpack.i.h.bf16 %v12379_v41  ;;  %v12380_v47 = vunpack.i.l.bf16 %v12379_v41  ;;  %v8696_v28 = vrot.slane %v14073_v54, %v13010_v32 }
0x292e   :  { %11942 = vmatmul.mubr.msk.f32.vlgmr.msra.gmra.mrb[100].mxu1 %vm178_vm2, %v8050_v18 }
0x292f   :  { %v12594_v52 = vpop.eup %12593  ;;  %11947 = vmatmul.mubr.msk.f32.vlgmr.msra.gmra.mrb[86].mxu0 %vm178_vm2, %v8052_v40  ;;  %11950 = vmatpush3.msra.mxu1 %v8588_v6  ;;  %v12260_v51 = vpack.c.bf16 %v12381_v5, %v12380_v47 }
0x2930   :  { %v8054_v39 = vmul.f32 %v12594_v52, %v14223_v31  ;;  %11951 = vmatprep.mubr.msk.f32.mxu1 %vm12644_vm1, %v12641_v15 }
0x2931   :  { %12261 = vmatprep.subr.bf16.mxu0 %v12260_v51 }
0x2932   :  { %11952 = vmatmul.mubr.msk.f32.vlgmr.msra.gmra.mrb[102].mxu1 %vm178_vm2, %v8054_v39  ;;  %12263 = vmatpush3.bf16.msra.mxu0 %v12260_v51 }
0x2933   :  { %12265 = vmatprep.subr.bf16.mxu0 %v12264_v16 }
0x2936   :  { %12267 = vmatpush3.bf16.msra.mxu0 %v12264_v16 }
0x2937   :  { %11976 = vmatprep.subr.mxu0 %v12641_v15 }
0x29a0   :  { %v8203_v34 = vpop.f32.mrb[96].mxu1 }
0x29a1   :  { %v11923_v26 = vpop.f32.mrb[97].mxu1 }
0x29a4   :  { %v8127_v42 = vpop.f32.mrb[80].mxu0 }
0x29a5   :  { %v11918_v7 = vpop.f32.mrb[81].mxu0 }
0x29f9   :  { %v8279_v31 = vpop.f32.mrb[82].mxu0 }
0x29fa   :  { %8665 = vrot.lane.b32.xlu0 %v8279_v31, %s14676_s3  ;;  %v11928_v25 = vpop.f32.mrb[83].mxu0  ;;  %v14307_v31 = vld [vmem:[%s14658_s7 + $0x48] sm:$0xff] }
0x29fb   :  { %v14312_v25 = vld [vmem:[%s14658_s7 + $0x58] sm:$0xff] }
0x29fd   :  { %v8355_v17 = vpop.f32.mrb[98].mxu1 }
0x29fe   :  { %v8431_v19 = vpop.f32.mrb[84].mxu0  ;;  %8667 = vrot.lane.b32.xlu1 %v8355_v17, %s14676_s3  ;;  %v11933_v20 = vpop.f32.mrb[99].mxu1  ;;  %v12268_v17 = vpack.c.bf16 %v14312_v25, %v14307_v31 }
0x29ff   :  { %8673 = vrot.lane.b32.xlu0 %v8431_v19, %s14674_s6  ;;  %v11938_v58 = vpop.f32.mrb[85].mxu0  ;;  %v14321_v19 = vld [vmem:[%s14658_s7 + $0x68] sm:$0xff]  ;;  %v14326_v20 = vld [vmem:[%s14658_s7 + $0x78] sm:$0xff] }
0x2a00   :  { %12269 = vmatprep.subr.bf16.mxu1 %v12268_v17  ;;  %v12272_v58 = vpack.c.bf16 %v14326_v20, %v14321_v19 }
0x2a01   :  { %v8507_v30 = vpop.f32.mrb[100].mxu1  ;;  %12271 = vmatpush3.bf16.msra.mxu1 %v12268_v17 }
0x2a02   :  { %v8583_v36 = vpop.f32.mrb[86].mxu0  ;;  %8675 = vrot.lane.b32.xlu1 %v8507_v30, %s14674_s6  ;;  %v11943_v44 = vpop.f32.mrb[101].mxu1  ;;  %12273 = vmatprep.subr.bf16.mxu1 %v12272_v58 }
0x2a03   :  { %8681 = vrot.lane.b32.xlu0 %v8583_v36, %s14675_s20  ;;  %v11948_v46 = vpop.f32.mrb[87].mxu0 }
0x2a05   :  { %v8659_v27 = vpop.f32.mrb[102].mxu1  ;;  %12275 = vmatpush3.bf16.msra.mxu1 %v12272_v58 }
0x2a06   :  { %8683 = vrot.lane.b32.xlu1 %v8659_v27, %s14675_s20  ;;  %v11953_v43 = vpop.f32.mrb[103].mxu1  ;;  %11981 = vmatprep.subr.mxu1 %v12641_v15 }
0x2a6c   :  { %v8666_v48 = vpop.permute.xlu0 %8665 }
0x2a6d   :  { %v8687_v8 = vsel %vm178_vm2, %v8127_v42, %v8666_v48  ;;  %v8825_v48 = vrot.slane %v14073_v54, %v13113_v60 }
0x2a70   :  { %v8668_v57 = vpop.permute.xlu1 %8667 }
0x2a71   :  { %v8674_v3 = vpop.permute.xlu0 %8673  ;;  %v8688_v0 = vsel %vm178_vm2, %v8203_v34, %v8668_v57 }
0x2a72   :  { %v8689_v49 = vsel %vm1525_vm5, %v8687_v8, %v8674_v3  ;;  %v8831_v8 = vrot.slane %v14073_v54, %v13116_v61  ;;  %v8837_v61 = vrot.slane %v14073_v54, %v13070_v23 }
0x2a74   :  { %v8676_v55 = vpop.permute.xlu1 %8675 }
0x2a75   :  { %v8682_v14 = vpop.permute.xlu0 %8681  ;;  %v8690_v45 = vsel %vm1525_vm5, %v8688_v0, %v8676_v55 }
0x2a76   :  { %v8691_v10 = vsel %vm1528_vm6, %v8689_v49, %v8682_v14 }
0x2a77   :  { %11962 = vmatprep.mubr.msk.f32.mxu0 %vm80_vm0, %v8691_v10 }
0x2a78   :  { %v8684_v35 = vpop.permute.xlu1 %8683 }
0x2a79   :  { %v8692_v56 = vsel %vm1528_vm6, %v8690_v45, %v8684_v35 }
0x2a7a   :  { %11963 = vmatmul.mubr.msk.f32.vlgmr.msra.gmra.mrb[88].mxu0 %vm80_vm0, %v8692_v56 }
0x2a7b   :  { %11978 = vmatprep.mubr.msk.f32.mxu0 %vm12644_vm1, %v12641_v15 }
0x2b4d   :  { %v11964_v18 = vpop.f32.mrb[88].mxu0 }
0x2b4e   :  { %v8791_v40 = vadd.f32 %v11964_v18, %v8696_v28  ;;  %v8785_v6 = vpop.f32.mrb[89].mxu0 }
0x2b4f   :  { %v8786_v52 = vadd.f32 %v8785_v6, %v8696_v28 }
0x2b50   :  { %v8795_v39 = vadd.f32 %v8791_v40, %v14062_v59 }
0x2b51   :  { %v8794_v41 = vadd.f32 %v8786_v52, %v14060_v38 }
0x2b52   :  { %v8799_v5 = vsel %vm80_vm0, %v8795_v39, 0.0 }
0x2b53   :  { %8800 = vadd.xlane.f32.xlu1 %v8799_v5  ;;  %v8796_v47 = vsel %vm80_vm0, %v8794_v41, 0.0 }
0x2b54   :  { %8797 = vadd.xlane.f32.xlu0 %v8796_v47 }
0x2b64   :  { %8933 = vrot.lane.b32.xlu1 %v13709_v9, %s12647_s2 }
0x2b68   :  { %9085 = vrot.lane.b32.xlu1 %v13787_v12, %s12647_s2 }
0x2b6c   :  { %9161 = vrot.lane.b32.xlu1 %v13780_v4, %s12647_s2 }
0x2b70   :  { %9313 = vrot.lane.b32.xlu1 %v13804_v53, %s12647_s2 }
0x2b74   :  { %9465 = vrot.lane.b32.xlu1 %v13831_v2, %s12647_s2 }
0x2be0   :  { %v8801_v38 = vpop.xlane.xlu1 %8800 }
0x2be1   :  { %v8803_v59 = vmul.f32 0.03125, %v8801_v38  ;;  %v8798_v51 = vpop.xlane.xlu0 %8797 }
0x2be2   :  { %v8802_v34 = vmul.f32 0.03125, %v8798_v51 }
0x2be3   :  { %v8805_v26 = vsub.f32 %v8795_v39, %v8803_v59 }
0x2be4   :  { %v8804_v42 = vsub.f32 %v8794_v41, %v8802_v34  ;;  %v8934_v7 = vpop.permute.xlu1 %8933 }
0x2be5   :  { %11977 = vmatpush3.xpose.msk.msra.mxu0 %vm178_vm2, %v8934_v7  ;;  %v8807_v24 = vmul.f32 %v8805_v26, %v8805_v26 }
0x2be6   :  { %v8806_v1 = vmul.f32 %v8804_v42, %v8804_v42  ;;  %11986 = vmatprep.subr.mxu0 %v12641_v15 }
0x2be7   :  { %v8811_v16 = vsel %vm80_vm0, %v8807_v24, 0.0 }
0x2be8   :  { %v8808_v13 = vsel %vm80_vm0, %v8806_v1, 0.0  ;;  %v9086_v60 = vpop.permute.xlu1 %9085 }
0x2be9   :  { %8809 = vadd.xlane.f32.xlu0 %v8808_v13 }
0x2bec   :  { %v9162_v6 = vpop.permute.xlu1 %9161 }
0x2bed   :  { %8812 = vadd.xlane.f32.xlu0 %v8811_v16 }
0x2bf0   :  { %v9314_v54 = vpop.permute.xlu1 %9313 }
0x2bf4   :  { %v9466_v39 = vpop.permute.xlu1 %9465 }
0x2c03   :  { %9009 = vrot.lane.b32.xlu0 %v13477_v50, %s12647_s2 }
0x2c07   :  { %9237 = vrot.lane.b32.xlu0 %v13806_v29, %s12647_s2 }
0x2c0b   :  { %9389 = vrot.lane.b32.xlu0 %v13809_v22, %s12647_s2 }
0x2c76   :  { %v8810_v30 = vpop.xlane.xlu0 %8809 }
0x2c77   :  { %v8814_v36 = vmul.f32 0.03125, %v8810_v30 }
0x2c79   :  { %v8816_v44 = vadd.f32 1e-05, %v8814_v36 }
0x2c7a   :  { %v8813_v46 = vpop.xlane.xlu0 %8812 }
0x2c7b   :  { %12595 = vrsqrt.f32 %v8816_v44  ;;  %v8815_v27 = vmul.f32 0.03125, %v8813_v46 }
0x2c7d   :  { %v8817_v43 = vadd.f32 1e-05, %v8815_v27 }
0x2c7e   :  { %v9010_v35 = vpop.permute.xlu0 %9009 }
0x2c7f   :  { %12597 = vrsqrt.f32 %v8817_v43 }
0x2c82   :  { %v9238_v52 = vpop.permute.xlu0 %9237 }
0x2c85   :  { %v12596_v57 = vpop.eup %12595 }
0x2c86   :  { %v8820_v3 = vmul.f32 %v12596_v57, %v8804_v42  ;;  %v9390_v41 = vpop.permute.xlu0 %9389 }
0x2c88   :  { %v8826_v55 = vmul.f32 %v8825_v48, %v8820_v3 }
0x2c89   :  { %v12598_v49 = vpop.eup %12597 }
0x2c8a   :  { %v8821_v14 = vmul.f32 %v12598_v49, %v8805_v26  ;;  %v14339_v10 = vadd.f32 %v8831_v8, %v8826_v55 }
0x2c8c   :  { %v8827_v0 = vmul.f32 %v8825_v48, %v8821_v14  ;;  %11973 = vmatprep.mubr.msk.f32.mxu1 %vm80_vm0, %v14339_v10 }
0x2c8e   :  { %v14343_v45 = vadd.f32 %v8831_v8, %v8827_v0 }
0x2c90   :  { %11974 = vmatmul.mubr.msk.f32.vlgmr.msra.gmra.mrb[104].mxu1 %vm80_vm0, %v14343_v45 }
0x2c91   :  { %11982 = vmatpush3.xpose.msk.msra.mxu1 %vm178_vm2, %v9010_v35  ;;  %11983 = vmatprep.mubr.msk.f32.mxu1 %vm12644_vm1, %v12641_v15 }
0x2c92   :  { %11991 = vmatprep.subr.mxu1 %v12641_v15 }
0x2d63   :  { %v11975_v56 = vpop.f32.mrb[104].mxu1 }
0x2d64   :  { %v8916_v28 = vadd.f32 %v11975_v56, %v8837_v61  ;;  %v8910_v18 = vpop.f32.mrb[105].mxu1 }
0x2d65   :  { %v8911_v40 = vadd.f32 %v8910_v18, %v8837_v61 }
0x2d66   :  { %8923 = vrot.lane.b32.xlu1 %v8916_v28, %s12643_s17  ;;  %11984 = vmatmul.mubr.msk.f32.vlgmr.msra.gmra.mrb[106].mxu1 %vm178_vm2, %v8916_v28 }
0x2d67   :  { %11992 = vmatpush3.xpose.msk.msra.mxu1 %vm178_vm2, %v9162_v6  ;;  %8921 = vrot.lane.b32.xlu0 %v8911_v40, %s12643_s17 }
0x2d68   :  { %11979 = vmatmul.mubr.msk.f32.vlgmr.msra.gmra.mrb[90].mxu0 %vm178_vm2, %v8911_v40  ;;  %11993 = vmatprep.mubr.msk.f32.mxu1 %vm12644_vm1, %v12641_v15 }
0x2d69   :  { %11987 = vmatpush3.xpose.msk.msra.mxu0 %vm178_vm2, %v9086_v60  ;;  %12001 = vmatprep.subr.mxu1 %v12641_v15 }
0x2d6a   :  { %8927 = vrot.lane.b32.xlu1 %v8916_v28, %s12642_s0  ;;  %11988 = vmatprep.mubr.msk.f32.mxu0 %vm12644_vm1, %v12641_v15 }
0x2d6b   :  { %8925 = vrot.lane.b32.xlu0 %v8911_v40, %s12642_s0  ;;  %11996 = vmatprep.subr.mxu0 %v12641_v15 }
0x2d6e   :  { %8931 = vrot.lane.b32.xlu1 %v8916_v28, %s12645_s18 }
0x2d6f   :  { %8929 = vrot.lane.b32.xlu0 %v8911_v40, %s12645_s18 }
0x2dd8   :  { %v8924_v5 = vpop.permute.xlu1 %8923 }
0x2dd9   :  { %11994 = vmatmul.mubr.msk.f32.vlgmr.msra.gmra.mrb[108].mxu1 %vm178_vm2, %v8924_v5  ;;  %v8922_v47 = vpop.permute.xlu0 %8921 }
0x2dda   :  { %12002 = vmatpush3.xpose.msk.msra.mxu1 %vm178_vm2, %v9314_v54  ;;  %11989 = vmatmul.mubr.msk.f32.vlgmr.msra.gmra.mrb[92].mxu0 %vm178_vm2, %v8922_v47 }
0x2ddb   :  { %11997 = vmatpush3.xpose.msk.msra.mxu0 %vm178_vm2, %v9238_v52  ;;  %12003 = vmatprep.mubr.msk.f32.mxu1 %vm12644_vm1, %v12641_v15 }
0x2ddc   :  { %v8928_v38 = vpop.permute.xlu1 %8927  ;;  %12011 = vmatprep.subr.mxu1 %v12641_v15  ;;  %11998 = vmatprep.mubr.msk.f32.mxu0 %vm12644_vm1, %v12641_v15 }
0x2ddd   :  { %12004 = vmatmul.mubr.msk.f32.vlgmr.msra.gmra.mrb[110].mxu1 %vm178_vm2, %v8928_v38  ;;  %12006 = vmatprep.subr.mxu0 %v12641_v15  ;;  %v8926_v59 = vpop.permute.xlu0 %8925 }
0x2dde   :  { %12012 = vmatpush3.xpose.msk.msra.mxu1 %vm178_vm2, %v9466_v39  ;;  %11999 = vmatmul.mubr.msk.f32.vlgmr.msra.gmra.mrb[94].mxu0 %vm178_vm2, %v8926_v59 }
0x2ddf   :  { %12007 = vmatpush3.xpose.msk.msra.mxu0 %vm178_vm2, %v9390_v41  ;;  %12013 = vmatprep.mubr.msk.f32.mxu1 %vm12644_vm1, %v12641_v15 }
0x2de0   :  { %v8932_v51 = vpop.permute.xlu1 %8931  ;;  %12008 = vmatprep.mubr.msk.f32.mxu0 %vm12644_vm1, %v12641_v15  ;;  %12016 = vmatprep.subr.mxu0 %v12641_v15 }
0x2de1   :  { %12014 = vmatmul.mubr.msk.f32.vlgmr.msra.gmra.mrb[112].mxu1 %vm178_vm2, %v8932_v51  ;;  %v8930_v34 = vpop.permute.xlu0 %8929  ;;  %12021 = vmatprep.subr.mxu1 %v12641_v15 }
0x2de2   :  { %12009 = vmatmul.mubr.msk.f32.vlgmr.msra.gmra.mrb[96].mxu0 %vm178_vm2, %v8930_v34  ;;  %12023 = vmatprep.mubr.msk.f32.mxu1 %vm12644_vm1, %v12641_v15 }
0x2de3   :  { %12018 = vmatprep.mubr.msk.f32.mxu0 %vm12644_vm1, %v12641_v15 }
0x2e39   :  { %v9081_v26 = vpop.f32.mrb[106].mxu1 }
0x2e3a   :  { %v9542_v42 = vmul.f32 0.35355338, %v9081_v26  ;;  %v11985_v7 = vpop.f32.mrb[107].mxu1 }
0x2e3b   :  { %v9005_v1 = vpop.f32.mrb[90].mxu0 }
0x2e3c   :  { %v9550_v13 = vsel %vm794_vm4, %v9542_v42, -1e+10  ;;  %v9541_v24 = vmul.f32 0.35355338, %v9005_v1  ;;  %v11980_v16 = vpop.f32.mrb[91].mxu0 }
0x2e3d   :  { %v9560_v17 = vsel %vm178_vm2, %v9550_v13, -inf }
0x2e3e   :  { %v9549_v58 = vsel %vm793_vm3, %v9541_v24, -1e+10  ;;  %9561 = vmax.xlane.f32.xlu1 %v9560_v17 }
0x2e3f   :  { %v9557_v30 = vsel %vm178_vm2, %v9549_v58, -inf }
0x2e40   :  { %9558 = vmax.xlane.f32.xlu0 %v9557_v30 }
0x2eac   :  { %v9233_v36 = vpop.f32.mrb[108].mxu1 }
0x2ead   :  { %v9157_v44 = vpop.f32.mrb[92].mxu0  ;;  %v11995_v46 = vpop.f32.mrb[109].mxu1  ;;  %v9544_v27 = vmul.f32 0.35355338, %v9233_v36 }
0x2eae   :  { %v9543_v43 = vmul.f32 0.35355338, %v9157_v44  ;;  %v11990_v48 = vpop.f32.mrb[93].mxu0 }
0x2eaf   :  { %v9552_v0 = vsel %vm794_vm4, %v9544_v27, -1e+10 }
0x2eb0   :  { %v9551_v57 = vsel %vm793_vm3, %v9543_v43, -1e+10  ;;  %v9385_v3 = vpop.f32.mrb[110].mxu1  ;;  %v9566_v6 = vsel %vm178_vm2, %v9552_v0, -inf }
0x2eb1   :  { %v9546_v8 = vmul.f32 0.35355338, %v9385_v3  ;;  %v9309_v55 = vpop.f32.mrb[94].mxu0  ;;  %v12005_v49 = vpop.f32.mrb[111].mxu1  ;;  %v9563_v14 = vsel %vm178_vm2, %v9551_v57, -inf }
0x2eb2   :  { %v9545_v35 = vmul.f32 0.35355338, %v9309_v55  ;;  %9564 = vmax.xlane.f32.xlu0 %v9563_v14  ;;  %v12000_v60 = vpop.f32.mrb[95].mxu0 }
0x2eb3   :  { %v9554_v28 = vsel %vm794_vm4, %v9546_v8, -1e+10 }
0x2eb4   :  { %v9553_v61 = vsel %vm793_vm3, %v9545_v35, -1e+10  ;;  %v9537_v56 = vpop.f32.mrb[112].mxu1  ;;  %v9572_v47 = vsel %vm178_vm2, %v9554_v28, -inf }
0x2eb5   :  { %v9461_v18 = vpop.f32.mrb[96].mxu0  ;;  %v12015_v40 = vpop.f32.mrb[113].mxu1  ;;  %v9569_v54 = vsel %vm178_vm2, %v9553_v61, -inf  ;;  %v9548_v52 = vmul.f32 0.35355338, %v9537_v56 }
0x2eb6   :  { %v9547_v39 = vmul.f32 0.35355338, %v9461_v18  ;;  %9567 = vmax.xlane.f32.xlu0 %v9566_v6  ;;  %9570 = vmax.xlane.f32.xlu1 %v9569_v54  ;;  %v12010_v41 = vpop.f32.mrb[97].mxu0 }
0x2eb7   :  { %v9556_v59 = vsel %vm794_vm4, %v9548_v52, -1e+10 }
0x2eb8   :  { %v9555_v5 = vsel %vm793_vm3, %v9547_v39, -1e+10  ;;  %v9578_v51 = vsel %vm178_vm2, %v9556_v59, -inf }
0x2eb9   :  { %v9575_v38 = vsel %vm178_vm2, %v9555_v5, -inf }
0x2eba   :  { %9573 = vmax.xlane.f32.xlu0 %v9572_v47  ;;  %9576 = vmax.xlane.f32.xlu1 %v9575_v38 }
0x2ebe   :  { %9579 = vmax.xlane.f32.xlu0 %v9578_v51 }
0x2ecb   :  { %9645 = vrot.lane.b32.xlu1 %v13709_v9, %s12648_s24  ;;  %v9562_v33 = vpop.xlane.xlu1 %9561 }
0x2ecc   :  { %v9582_v37 = vsub.f32 %v9550_v13, %v9562_v33 }
0x2ecd   :  { %v9559_v34 = vpop.xlane.xlu0 %9558 }
0x2ece   :  { %v9591_v26 = vmul.f32 1.442695, %v9582_v37  ;;  %v9581_v9 = vsub.f32 %v9549_v58, %v9559_v34 }
0x2ecf   :  { %9797 = vrot.lane.b32.xlu1 %v13787_v12, %s12648_s24 }
0x2ed0   :  { %12599 = vpow2.f32 %v9591_v26  ;;  %v9589_v42 = vmul.f32 1.442695, %v9581_v9 }
0x2ed2   :  { %12601 = vpow2.f32 %v9589_v42 }
0x2ed3   :  { %9873 = vrot.lane.b32.xlu1 %v13780_v4, %s12648_s24 }
0x2ed4   :  { %9721 = vrot.lane.b32.xlu0 %v13477_v50, %s12648_s24 }
0x2ed7   :  { %10025 = vrot.lane.b32.xlu1 %v13804_v53, %s12648_s24 }
0x2ed8   :  { %9949 = vrot.lane.b32.xlu0 %v13806_v29, %s12648_s24 }
0x2eda   :  { %v14431_v12 = vpop.eup %12599 }
0x2edb   :  { %v9608_v4 = vsel %vm178_vm2, %v14431_v12, 0.0 }
0x2edc   :  { %v14435_v50 = vpop.eup %12601 }
0x2edd   :  { %v9605_v53 = vsel %vm178_vm2, %v14435_v50, 0.0 }
0x2ef7   :  { %9609 = vadd.xlane.f32.xlu0 %v9608_v4 }
0x2efb   :  { %9606 = vadd.xlane.f32.xlu1 %v9605_v53  ;;  %v14477_v53 = vpack.i.bf16 %v14312_v25, %v14307_v31 }
0x2f3f   :  { %v9565_v29 = vpop.xlane.xlu0 %9564 }
0x2f40   :  { %v9583_v7 = vsub.f32 %v9551_v57, %v9565_v29 }
0x2f42   :  { %v9593_v1 = vmul.f32 1.442695, %v9583_v7 }
0x2f43   :  { %v9571_v13 = vpop.xlane.xlu1 %9570  ;;  %v9568_v24 = vpop.xlane.xlu0 %9567 }
0x2f44   :  { %12603 = vpow2.f32 %v9593_v1  ;;  %v9585_v16 = vsub.f32 %v9553_v61, %v9571_v13  ;;  %v9584_v17 = vsub.f32 %v9552_v0, %v9568_v24 }
0x2f46   :  { %v9597_v58 = vmul.f32 1.442695, %v9585_v16  ;;  %v9595_v30 = vmul.f32 1.442695, %v9584_v17 }
0x2f47   :  { %v9577_v36 = vpop.xlane.xlu1 %9576  ;;  %v9574_v44 = vpop.xlane.xlu0 %9573 }
0x2f48   :  { %12605 = vpow2.f32 %v9597_v58  ;;  %v9587_v46 = vsub.f32 %v9555_v5, %v9577_v36  ;;  %v9586_v27 = vsub.f32 %v9554_v28, %v9574_v44  ;;  %v14517_v44 = vpack.i.bf16 %v14326_v20, %v14321_v19 }
0x2f49   :  { %12607 = vpow2.f32 %v9595_v30 }
0x2f4a   :  { %v9601_v43 = vmul.f32 1.442695, %v9587_v46  ;;  %v9599_v48 = vmul.f32 1.442695, %v9586_v27 }
0x2f4b   :  { %v9646_v3 = vpop.permute.xlu1 %9645  ;;  %v9580_v8 = vpop.xlane.xlu0 %9579 }
0x2f4c   :  { %12609 = vpow2.f32 %v9601_v43  ;;  %v9588_v57 = vsub.f32 %v9556_v59, %v9580_v8  ;;  %12017 = vmatpush3.msra.mxu0 %v9646_v3 }
0x2f4d   :  { %12611 = vpow2.f32 %v9599_v48  ;;  %12026 = vmatprep.subr.mxu0 %v12641_v15 }
0x2f4e   :  { %v12604_v55 = vpop.eup %12603  ;;  %v9603_v49 = vmul.f32 1.442695, %v9588_v57 }
0x2f4f   :  { %v9722_v14 = vpop.permute.xlu0 %9721  ;;  %v9611_v0 = vsel %vm178_vm2, %v12604_v55, 0.0  ;;  %v9798_v39 = vpop.permute.xlu1 %9797 }
0x2f50   :  { %12613 = vpow2.f32 %v9603_v49  ;;  %9612 = vadd.xlane.f32.xlu1 %v9611_v0  ;;  %12022 = vmatpush3.msra.mxu1 %v9722_v14 }
0x2f51   :  { %12031 = vmatprep.subr.mxu1 %v12641_v15 }
0x2f52   :  { %v12606_v35 = vpop.eup %12605 }
0x2f53   :  { %v12608_v60 = vpop.eup %12607  ;;  %v9617_v61 = vsel %vm178_vm2, %v12606_v35, 0.0  ;;  %v9874_v41 = vpop.permute.xlu1 %9873 }
0x2f54   :  { %9618 = vadd.xlane.f32.xlu1 %v9617_v61  ;;  %v9614_v56 = vsel %vm178_vm2, %v12608_v60, 0.0  ;;  %v9950_v5 = vpop.permute.xlu0 %9949 }
0x2f55   :  { %9615 = vadd.xlane.f32.xlu0 %v9614_v56 }
0x2f56   :  { %v12610_v28 = vpop.eup %12609 }
0x2f57   :  { %v14444_v18 = vpop.eup %12611  ;;  %v9623_v40 = vsel %vm178_vm2, %v12610_v28, 0.0  ;;  %v10026_v47 = vpop.permute.xlu1 %10025 }
0x2f58   :  { %9624 = vadd.xlane.f32.xlu1 %v9623_v40  ;;  %v9620_v6 = vsel %vm178_vm2, %v14444_v18, 0.0 }
0x2f59   :  { %9621 = vadd.xlane.f32.xlu0 %v9620_v6 }
0x2f5a   :  { %v14449_v54 = vpop.eup %12613 }
0x2f5b   :  { %v9626_v52 = vsel %vm178_vm2, %v14449_v54, 0.0 }
0x2f5d   :  { %9627 = vadd.xlane.f32.xlu0 %v9626_v52 }
0x2f69   :  { %10177 = vrot.lane.b32.xlu1 %v13831_v2, %s12648_s24 }
0x2f6d   :  { %12393 = vrot.lane.b32.xlu1 %v14517_v44, %s12646_s19 }
0x2f73   :  { %10101 = vrot.lane.b32.xlu0 %v13809_v22, %s12648_s24 }
0x2f77   :  { %12388 = vrot.lane.b32.xlu0 %v14477_v53, %s12646_s19 }
0x2f84   :  { %v9610_v38 = vpop.xlane.xlu0 %9609 }
0x2f85   :  { %12615 = vrcp.f32 %v9610_v38 }
0x2f88   :  { %v9607_v59 = vpop.xlane.xlu1 %9606 }
0x2f89   :  { %12617 = vrcp.f32 %v9607_v59 }
0x2f8f   :  { %v12616_v51 = vpop.eup %12615 }
0x2f90   :  { %v14458_v33 = vmul.f32 %v12616_v51, %v14431_v12 }
0x2f92   :  { %12024 = vmatmul.mubr.msk.f32.vlgmr.msra.gmra.mrb[114].mxu1 %vm178_vm2, %v14458_v33 }
0x2f93   :  { %v12618_v37 = vpop.eup %12617  ;;  %12032 = vmatpush3.msra.mxu1 %v9874_v41  ;;  %12033 = vmatprep.mubr.msk.f32.mxu1 %vm12644_vm1, %v12641_v15 }
0x2f94   :  { %v14465_v22 = vmul.f32 %v12618_v37, %v14435_v50  ;;  %12041 = vmatprep.subr.mxu1 %v12641_v15 }
0x2f96   :  { %12019 = vmatmul.mubr.msk.f32.vlgmr.msra.gmra.mrb[98].mxu0 %vm178_vm2, %v14465_v22 }
0x2f97   :  { %12027 = vmatpush3.msra.mxu0 %v9798_v39  ;;  %12028 = vmatprep.mubr.msk.f32.mxu0 %vm12644_vm1, %v12641_v15 }
0x2f98   :  { %12036 = vmatprep.subr.mxu0 %v12641_v15 }
0x2fdd   :  { %v9613_v2 = vpop.xlane.xlu1 %9612 }
0x2fde   :  { %12619 = vrcp.f32 %v9613_v2 }
0x2fe1   :  { %v9619_v34 = vpop.xlane.xlu1 %9618 }
0x2fe2   :  { %12621 = vrcp.f32 %v9619_v34  ;;  %v9616_v26 = vpop.xlane.xlu0 %9615 }
0x2fe3   :  { %12623 = vrcp.f32 %v9616_v26 }
0x2fe5   :  { %v9625_v9 = vpop.xlane.xlu1 %9624 }
0x2fe6   :  { %12625 = vrcp.f32 %v9625_v9  ;;  %v9622_v42 = vpop.xlane.xlu0 %9621 }
0x2fe7   :  { %12627 = vrcp.f32 %v9622_v42  ;;  %v14538_v42 = vld [vmem:[%s14661_s11 + $0x10] sm:$0xff] }
0x2fe8   :  { %v12620_v12 = vpop.eup %12619 }
0x2fe9   :  { %v14473_v4 = vmul.f32 %v12620_v12, %v12604_v55  ;;  %v10178_v58 = vpop.permute.xlu1 %10177  ;;  %v10286_v12 = vrot.slane %v14538_v42, %v13079_v21 }
0x2fea   :  { %v9628_v50 = vpop.xlane.xlu0 %9627 }
0x2feb   :  { %12629 = vrcp.f32 %v9628_v50  ;;  %12029 = vmatmul.mubr.msk.f32.vlgmr.msra.gmra.mrb[100].mxu0 %vm178_vm2, %v14473_v4 }
0x2fec   :  { %v12622_v29 = vpop.eup %12621  ;;  %12037 = vmatpush3.msra.mxu0 %v9950_v5  ;;  %12038 = vmatprep.mubr.msk.f32.mxu0 %vm12644_vm1, %v12641_v15 }
0x2fed   :  { %v12624_v7 = vpop.eup %12623  ;;  %v14483_v1 = vmul.f32 %v12622_v29, %v12606_v35  ;;  %12046 = vmatprep.subr.mxu0 %v12641_v15  ;;  %v12394_v55 = vpop.permute.xlu1 %12393 }
0x2fee   :  { %v14488_v13 = vmul.f32 %v12624_v7, %v12608_v60  ;;  %v10102_v31 = vpop.permute.xlu0 %10101  ;;  %v12396_v49 = vunpack.i.h.bf16 %v12394_v55  ;;  %v12395_v14 = vunpack.i.l.bf16 %v12394_v55 }
0x2fef   :  { %12039 = vmatmul.mubr.msk.f32.vlgmr.msra.gmra.mrb[102].mxu0 %vm178_vm2, %v14483_v1 }
0x2ff0   :  { %v12626_v25 = vpop.eup %12625  ;;  %12034 = vmatmul.mubr.msk.f32.vlgmr.msra.gmra.mrb[116].mxu1 %vm178_vm2, %v14488_v13  ;;  %12047 = vmatpush3.msra.mxu0 %v10102_v31  ;;  %v12280_v0 = vpack.c.bf16 %v12396_v49, %v12395_v14 }
0x2ff1   :  { %v12628_v24 = vpop.eup %12627  ;;  %v14494_v16 = vmul.f32 %v12626_v25, %v12610_v28  ;;  %12042 = vmatpush3.msra.mxu1 %v10026_v47  ;;  %12043 = vmatprep.mubr.msk.f32.mxu1 %vm12644_vm1, %v12641_v15 }
0x2ff2   :  { %v14499_v17 = vmul.f32 %v12628_v24, %v14444_v18  ;;  %12048 = vmatprep.mubr.msk.f32.mxu0 %vm12644_vm1, %v12641_v15  ;;  %12051 = vmatprep.subr.mxu1 %v12641_v15  ;;  %v12389_v46 = vpop.permute.xlu0 %12388 }
0x2ff3   :  { %12049 = vmatmul.mubr.msk.f32.vlgmr.msra.gmra.mrb[104].mxu0 %vm178_vm2, %v14494_v16  ;;  %v12391_v27 = vunpack.i.h.bf16 %v12389_v46  ;;  %v12390_v43 = vunpack.i.l.bf16 %v12389_v46 }
0x2ff4   :  { %12044 = vmatmul.mubr.msk.f32.vlgmr.msra.gmra.mrb[118].mxu1 %vm178_vm2, %v14499_v17 }
0x2ff5   :  { %v12630_v30 = vpop.eup %12629  ;;  %12052 = vmatpush3.msra.mxu1 %v10178_v58  ;;  %12053 = vmatprep.mubr.msk.f32.mxu1 %vm12644_vm1, %v12641_v15  ;;  %v12276_v48 = vpack.c.bf16 %v12391_v27, %v12390_v43 }
0x2ff6   :  { %v14511_v36 = vmul.f32 %v12630_v30, %v14449_v54 }
0x2ff7   :  { %12277 = vmatprep.subr.bf16.mxu0 %v12276_v48 }
0x2ff8   :  { %12054 = vmatmul.mubr.msk.f32.vlgmr.msra.gmra.mrb[120].mxu1 %vm178_vm2, %v14511_v36  ;;  %12279 = vmatpush3.bf16.msra.mxu0 %v12276_v48 }
0x2ff9   :  { %12281 = vmatprep.subr.bf16.mxu0 %v12280_v0 }
0x2ffc   :  { %12283 = vmatpush3.bf16.msra.mxu0 %v12280_v0  ;;  %v11001_v0 = vld [vmem:[%s14663_s10 + $0x40] sm:$0xff] }
0x3065   :  { %v9793_v3 = vpop.f32.mrb[114].mxu1 }
0x3066   :  { %v12025_v15 = vpop.f32.mrb[115].mxu1 }
0x3069   :  { %v9717_v8 = vpop.f32.mrb[98].mxu0 }
0x306a   :  { %v12020_v57 = vpop.f32.mrb[99].mxu0 }
0x30be   :  { %v9869_v19 = vpop.f32.mrb[100].mxu0 }
0x30bf   :  { %v12030_v20 = vpop.f32.mrb[101].mxu0  ;;  %10255 = vrot.lane.b32.xlu0 %v9869_v19, %s14676_s3  ;;  %v11002_v19 = vld [vmem:[%s14663_s10 + $0x48] sm:$0xff] }
0x30c0   :  { %v11003_v20 = vld [vmem:[%s14663_s10 + $0x50] sm:$0xff] }
0x30c2   :  { %v10021_v35 = vpop.f32.mrb[102].mxu0 }
0x30c3   :  { %v9945_v60 = vpop.f32.mrb[116].mxu1  ;;  %10263 = vrot.lane.b32.xlu0 %v10021_v35, %s14674_s6  ;;  %v12040_v61 = vpop.f32.mrb[103].mxu0  ;;  %v12292_v35 = vpack.c.bf16 %v11002_v19, %v11001_v0 }
0x30c4   :  { %10257 = vrot.lane.b32.xlu1 %v9945_v60, %s14676_s3  ;;  %v12035_v56 = vpop.f32.mrb[117].mxu1  ;;  %v11005_v61 = vld [vmem:[%s14663_s10 + $0x60] sm:$0xff] }
0x30c5   :  { %v11006_v56 = vld [vmem:[%s14663_s10 + $0x68] sm:$0xff]  ;;  %12293 = vmatprep.subr.bf16.mxu0 %v12292_v35 }
0x30c6   :  { %v10173_v28 = vpop.f32.mrb[104].mxu0 }
0x30c7   :  { %v10097_v18 = vpop.f32.mrb[118].mxu1  ;;  %10271 = vrot.lane.b32.xlu0 %v10173_v28, %s14675_s20  ;;  %v12050_v40 = vpop.f32.mrb[105].mxu0  ;;  %v12300_v28 = vpack.c.bf16 %v11006_v56, %v11005_v61 }
0x30c8   :  { %10265 = vrot.lane.b32.xlu1 %v10097_v18, %s14674_s6  ;;  %v12045_v6 = vpop.f32.mrb[119].mxu1 }
0x30cb   :  { %v10249_v54 = vpop.f32.mrb[120].mxu1 }
0x30cc   :  { %10273 = vrot.lane.b32.xlu1 %v10249_v54, %s14675_s20  ;;  %v12055_v52 = vpop.f32.mrb[121].mxu1 }
0x3131   :  { %v10256_v39 = vpop.permute.xlu0 %10255 }
0x3132   :  { %v10277_v47 = vsel %vm178_vm2, %v9717_v8, %v10256_v39 }
0x3135   :  { %v10264_v41 = vpop.permute.xlu0 %10263 }
0x3136   :  { %v10258_v5 = vpop.permute.xlu1 %10257  ;;  %v10279_v38 = vsel %vm1525_vm5, %v10277_v47, %v10264_v41 }
0x3137   :  { %v10278_v2 = vsel %vm178_vm2, %v9793_v3, %v10258_v5 }
0x3139   :  { %v10272_v59 = vpop.permute.xlu0 %10271 }
0x313a   :  { %v10266_v51 = vpop.permute.xlu1 %10265  ;;  %v10281_v37 = vsel %vm1528_vm6, %v10279_v38, %v10272_v59  ;;  %v14573_v59 = vld [vmem:[%s14661_s11 + $0x18] sm:$0xff] }
0x313b   :  { %12064 = vmatprep.mubr.msk.f32.mxu0 %vm80_vm0, %v10281_v37  ;;  %v10280_v34 = vsel %vm1525_vm5, %v10278_v2, %v10266_v51  ;;  %v10439_v2 = vrot.slane %v14573_v59, %v12775_v11  ;;  %v11008_v11 = vld [vmem:[%s14663_s10 + $0x78] sm:$0xff] }
0x313e   :  { %v10274_v26 = vpop.permute.xlu1 %10273 }
0x313f   :  { %v10282_v9 = vsel %vm1528_vm6, %v10280_v34, %v10274_v26 }
0x3140   :  { %12065 = vmatmul.mubr.msk.f32.vlgmr.msra.gmra.mrb[106].mxu0 %vm80_vm0, %v10282_v9 }
0x3141   :  { %12295 = vmatpush3.bf16.msra.mxu0 %v12292_v35 }
0x3213   :  { %v12066_v50 = vpop.f32.mrb[106].mxu0 }
0x3214   :  { %v10381_v29 = vadd.f32 %v12066_v50, %v10286_v12  ;;  %v10375_v7 = vpop.f32.mrb[107].mxu0 }
0x3215   :  { %v10376_v31 = vadd.f32 %v10375_v7, %v10286_v12  ;;  %v10445_v12 = vrot.slane %v14573_v59, %v13010_v32  ;;  %v10451_v32 = vrot.slane %v14538_v42, %v13051_v62 }
0x3216   :  { %v10409_v25 = vadd.f32 %v10381_v29, %v14343_v45 }
0x3217   :  { %v10408_v24 = vadd.f32 %v10376_v31, %v14339_v10  ;;  %v11007_v31 = vld [vmem:[%s14663_s10 + $0x70] sm:$0xff] }
0x3218   :  { %v10413_v58 = vsel %vm80_vm0, %v10409_v25, 0.0 }
0x3219   :  { %10414 = vadd.xlane.f32.xlu1 %v10413_v58  ;;  %v10410_v30 = vsel %vm80_vm0, %v10408_v24, 0.0 }
0x321a   :  { %10411 = vadd.xlane.f32.xlu0 %v10410_v30 }
0x322a   :  { %12398 = vrot.lane.b32.xlu1 %v14477_v53, %s12647_s2 }
0x32a6   :  { %v10415_v46 = vpop.xlane.xlu1 %10414 }
0x32a7   :  { %v10417_v27 = vmul.f32 0.03125, %v10415_v46  ;;  %v10412_v43 = vpop.xlane.xlu0 %10411 }
0x32a8   :  { %v10416_v48 = vmul.f32 0.03125, %v10412_v43 }
0x32a9   :  { %v10419_v3 = vsub.f32 %v10409_v25, %v10417_v27  ;;  %v12304_v25 = vpack.c.bf16 %v11008_v11, %v11007_v31 }
0x32aa   :  { %v10418_v15 = vsub.f32 %v10408_v24, %v10416_v48  ;;  %v12399_v55 = vpop.permute.xlu1 %12398  ;;  %v10559_v48 = vrot.slane %v14538_v42, %v13054_v63 }
0x32ab   :  { %v10421_v8 = vmul.f32 %v10419_v3, %v10419_v3  ;;  %v12401_v49 = vunpack.i.h.bf16 %v12399_v55  ;;  %v12400_v53 = vunpack.i.l.bf16 %v12399_v55 }
0x32ac   :  { %v10420_v57 = vmul.f32 %v10418_v15, %v10418_v15 }
0x32ad   :  { %v10425_v45 = vsel %vm80_vm0, %v10421_v8, 0.0  ;;  %v12284_v14 = vpack.c.bf16 %v12401_v49, %v12400_v53 }
0x32ae   :  { %10426 = vadd.xlane.f32.xlu0 %v10425_v45  ;;  %v10422_v10 = vsel %vm80_vm0, %v10420_v57, 0.0 }
0x32af   :  { %12285 = vmatprep.subr.bf16.mxu1 %v12284_v14 }
0x32b0   :  { %12287 = vmatpush3.bf16.msra.mxu1 %v12284_v14 }
0x32b2   :  { %10423 = vadd.xlane.f32.xlu0 %v10422_v10 }
0x32c8   :  { %12403 = vrot.lane.b32.xlu0 %v14517_v44, %s12647_s2  ;;  %v11004_v44 = vld [vmem:[%s14663_s10 + $0x58] sm:$0xff] }
0x32c9   :  { %v12296_v60 = vpack.c.bf16 %v11004_v44, %v11003_v20 }
0x32cb   :  { %12297 = vmatprep.subr.bf16.mxu0 %v12296_v60 }
0x32cc   :  { %12299 = vmatpush3.bf16.msra.mxu0 %v12296_v60  ;;  %v10681_v60 = vld [vmem:[%s14664_s12] sm:$0xff] }
0x32cd   :  { %12301 = vmatprep.subr.bf16.mxu0 %v12300_v28 }
0x32d0   :  { %12303 = vmatpush3.bf16.msra.mxu0 %v12300_v28 }
0x32d1   :  { %12305 = vmatprep.subr.bf16.mxu0 %v12304_v25 }
0x32d4   :  { %12307 = vmatpush3.bf16.msra.mxu0 %v12304_v25 }
0x333b   :  { %v10427_v18 = vpop.xlane.xlu0 %10426 }
0x333c   :  { %v10429_v40 = vmul.f32 0.03125, %v10427_v18 }
0x333e   :  { %v10431_v6 = vadd.f32 1e-05, %v10429_v40 }
0x333f   :  { %v10424_v54 = vpop.xlane.xlu0 %10423 }
0x3340   :  { %12631 = vrsqrt.f32 %v10431_v6  ;;  %v10428_v52 = vmul.f32 0.03125, %v10424_v54 }
0x3342   :  { %v10430_v39 = vadd.f32 1e-05, %v10428_v52 }
0x3343   :  { %v12404_v41 = vpop.permute.xlu0 %12403 }
0x3344   :  { %12633 = vrsqrt.f32 %v10430_v39  ;;  %v12406_v5 = vunpack.i.h.bf16 %v12404_v41  ;;  %v12405_v47 = vunpack.i.l.bf16 %v12404_v41 }
0x3346   :  { %v12288_v38 = vpack.c.bf16 %v12406_v5, %v12405_v47 }
0x3348   :  { %12289 = vmatprep.subr.bf16.mxu1 %v12288_v38 }
0x3349   :  { %12291 = vmatpush3.bf16.msra.mxu1 %v12288_v38 }
0x334a   :  { %v12632_v51 = vpop.eup %12631 }
0x334b   :  { %v10435_v37 = vmul.f32 %v12632_v51, %v10419_v3 }
0x334d   :  { %v10441_v9 = vmul.f32 %v10439_v2, %v10435_v37  ;;  %v10672_v37 = vrot.slane %v14573_v59, %v13070_v23 }
0x334e   :  { %v12634_v34 = vpop.eup %12633 }
0x334f   :  { %v10434_v26 = vmul.f32 %v12634_v34, %v10418_v15  ;;  %v10447_v7 = vadd.f32 %v10445_v12, %v10441_v9 }
0x3351   :  { %v10440_v50 = vmul.f32 %v10439_v2, %v10434_v26 }
0x3353   :  { %v10446_v29 = vadd.f32 %v10445_v12, %v10440_v50 }
0x3355   :  { %12075 = vmatprep.mubr.msk.f32.mxu1 %vm80_vm0, %v10446_v29 }
0x3356   :  { %12076 = vmatmul.mubr.msk.f32.vlgmr.msra.gmra.mrb[122].mxu1 %vm80_vm0, %v10447_v7 }
0x3429   :  { %v12077_v24 = vpop.f32.mrb[122].mxu1 }
0x342a   :  { %v10542_v58 = vadd.f32 %v12077_v24, %v10451_v32  ;;  %v10536_v30 = vpop.f32.mrb[123].mxu1 }
0x342b   :  { %v10537_v46 = vadd.f32 %v10536_v30, %v10451_v32 }
0x342c   :  { %v10546_v43 = vmax.f32 %v10542_v58, 0.0 }
0x342d   :  { %v10545_v27 = vmax.f32 %v10537_v46, 0.0 }
0x342f   :  { %12094 = vmatprep.mubr.msk.f32.mxu0 %vm1772_vm7, %v10545_v27 }
0x3430   :  { %12095 = vmatmul.mubr.msk.f32.vlgmr.msra.gmra.mrb[108].mxu0 %vm1772_vm7, %v10546_v43 }
0x3503   :  { %v12096_v3 = vpop.f32.mrb[108].mxu0 }
0x3504   :  { %v10638_v15 = vadd.f32 %v12096_v3, %v10559_v48  ;;  %v10632_v8 = vpop.f32.mrb[109].mxu0 }
0x3505   :  { %v10633_v45 = vadd.f32 %v10632_v8, %v10559_v48 }
0x3506   :  { %v10642_v57 = vadd.f32 %v10638_v15, %v10447_v7 }
0x3507   :  { %v10641_v10 = vadd.f32 %v10633_v45, %v10446_v29  ;;  %v10678_v29 = vrot.slane %v14573_v59, %v13079_v21  ;;  %v11011_v21 = vld [vmem:[%s14666_s13] ss:$0 sm:$0xff] }
0x3508   :  { %v10646_v62 = vsel %vm80_vm0, %v10642_v57, 0.0 }
0x3509   :  { %10647 = vadd.xlane.f32.xlu0 %v10646_v62  ;;  %v10643_v55 = vsel %vm80_vm0, %v10641_v10, 0.0 }
0x350a   :  { %10644 = vadd.xlane.f32.xlu1 %v10643_v55 }
0x3596   :  { %v10648_v49 = vpop.xlane.xlu0 %10647 }
0x3597   :  { %v10650_v53 = vmul.f32 0.03125, %v10648_v49  ;;  %v10645_v14 = vpop.xlane.xlu1 %10644 }
0x3598   :  { %v10649_v0 = vmul.f32 0.03125, %v10645_v14 }
0x3599   :  { %v10652_v19 = vsub.f32 %v10642_v57, %v10650_v53 }
0x359a   :  { %v10651_v20 = vsub.f32 %v10641_v10, %v10649_v0 }
0x359b   :  { %v10654_v35 = vmul.f32 %v10652_v19, %v10652_v19 }
0x359c   :  { %v10653_v63 = vmul.f32 %v10651_v20, %v10651_v20 }
0x359d   :  { %v10658_v42 = vsel %vm80_vm0, %v10654_v35, 0.0 }
0x359e   :  { %10659 = vadd.xlane.f32.xlu0 %v10658_v42  ;;  %v10655_v44 = vsel %vm80_vm0, %v10653_v63, 0.0 }
0x359f   :  { %10656 = vadd.xlane.f32.xlu1 %v10655_v44 }
0x35b0   :  { %10384 = vrot.lane.b32.xlu1 %v14473_v4, %s14676_s3  ;;  %v10682_v4 = vld [vmem:[%s14664_s12 + $0x8] sm:$0xff] }
0x35b1   :  { %v12308_v61 = vpack.c.bf16 %v10682_v4, %v10681_v60 }
0x35b3   :  { %12309 = vmatprep.subr.bf16.mxu1 %v12308_v61 }
0x35b4   :  { %10386 = vrot.lane.b32.xlu0 %v14488_v13, %s14676_s3  ;;  %10390 = vrot.lane.b32.xlu1 %v14483_v1, %s14674_s6  ;;  %v10683_v1 = vld [vmem:[%s14664_s12 + $0x10] sm:$0xff]  ;;  %v10684_v13 = vld [vmem:[%s14664_s12 + $0x18] sm:$0xff] }
0x35b5   :  { %12311 = vmatpush3.bf16.msra.mxu1 %v12308_v61 }
0x35b8   :  { %10396 = vrot.lane.b32.xlu0 %v14494_v16, %s14675_s20  ;;  %10392 = vrot.lane.b32.xlu1 %v14499_v17, %s14674_s6  ;;  %v12312_v16 = vpack.c.bf16 %v10684_v13, %v10683_v1 }
0x35ba   :  { %12313 = vmatprep.subr.bf16.mxu1 %v12312_v16 }
0x35bb   :  { %12315 = vmatpush3.bf16.msra.mxu1 %v12312_v16 }
0x35bc   :  { %10398 = vrot.lane.b32.xlu1 %v14511_v36, %s14675_s20 }
0x362b   :  { %v10660_v17 = vpop.xlane.xlu0 %10659 }
0x362c   :  { %v10662_v56 = vmul.f32 0.03125, %v10660_v17  ;;  %v10657_v28 = vpop.xlane.xlu1 %10656 }
0x362d   :  { %v10661_v18 = vmul.f32 0.03125, %v10657_v28 }
0x362e   :  { %v10664_v40 = vadd.f32 1e-05, %v10662_v56 }
0x362f   :  { %v10663_v6 = vadd.f32 1e-05, %v10661_v18  ;;  %v10387_v36 = vpop.permute.xlu0 %10386 }
0x3630   :  { %12635 = vrsqrt.f32 %v10664_v40  ;;  %v10385_v54 = vpop.permute.xlu1 %10384 }
0x3631   :  { %12637 = vrsqrt.f32 %v10663_v6  ;;  %v10402_v52 = vsel %vm178_vm2, %v14465_v22, %v10385_v54  ;;  %v10403_v22 = vsel %vm178_vm2, %v14458_v33, %v10387_v36 }
0x3633   :  { %v10397_v41 = vpop.permute.xlu0 %10396 }
0x3634   :  { %v10391_v39 = vpop.permute.xlu1 %10390 }
0x3635   :  { %v10404_v5 = vsel %vm1525_vm5, %v10402_v52, %v10391_v39 }
0x3636   :  { %v10406_v47 = vsel %vm1528_vm6, %v10404_v5, %v10397_v41 }
0x3637   :  { %v10775_v38 = vsel %vm80_vm0, %v10406_v47, 0.0 }
0x3638   :  { %v10393_v51 = vpop.permute.xlu1 %10392  ;;  %10777 = vst [vmem:[%s14665_s15] sm:$0xff] %v10775_v38 }
0x3639   :  { %v10405_v9 = vsel %vm1525_vm5, %v10403_v22, %v10393_v51 }
0x363a   :  { %v12636_v2 = vpop.eup %12635 }
0x363b   :  { %v12638_v34 = vpop.eup %12637  ;;  %v10668_v26 = vmul.f32 %v12636_v2, %v10652_v19 }
0x363c   :  { %v10399_v12 = vpop.permute.xlu1 %10398  ;;  %v10667_v50 = vmul.f32 %v12638_v34, %v10651_v20 }
0x363d   :  { %v10407_v7 = vsel %vm1528_vm6, %v10405_v9, %v10399_v12  ;;  %v10674_v31 = vmul.f32 %v10672_v37, %v10668_v26 }
0x363e   :  { %v10776_v11 = vsel %vm80_vm0, %v10407_v7, 0.0  ;;  %v10673_v25 = vmul.f32 %v10672_v37, %v10667_v50 }
0x363f   :  { %10778 = vst [vmem:[%s14665_s15 + $0x8] sm:$0xff] %v10776_v11  ;;  %v10680_v32 = vadd.f32 %v10678_v29, %v10674_v31 }
0x3640   :  { %v10679_v23 = vadd.f32 %v10678_v29, %v10673_v25 }
0x3642   :  { %12105 = vmatprep.mubr.msk.f32.mxu1 %vm80_vm0, %v10679_v23 }
0x3643   :  { %12106 = vmatmul.mubr.msk.f32.vlgmr.msra.gmra.mrb[124].mxu1 %vm80_vm0, %v10680_v32 }
0x3716   :  { %v12107_v33 = vpop.f32.mrb[124].mxu1 }
0x3717   :  { %v10770_v59 = vadd.f32 %v12107_v33, %v11011_v21  ;;  %v10764_v24 = vpop.f32.mrb[125].mxu1 }
0x3718   :  { %v10765_v58 = vadd.f32 %v11011_v21, %v10764_v24 }
0x3719   :  { %10774 = vst [vmem:[%s14667_s14 + $0x8] sm:$0xff] %v10770_v59 }
0x371a   :  { %10773 = vst [vmem:[%s14667_s14] sm:$0xff] %v10765_v58 }

</bundles_post_ra>
